<compile_context>
chip_gen: v5e
topology: v5e:2x2
jax: 0.10.0
libtpu: 0.0.40
codegen_flags: <defaults>
</compile_context>

<pallas_src>
import jax
import jax.numpy as jnp
from jax.experimental import pallas as pl
from jax.experimental.pallas import tpu as pltpu

EXPANSION = 4
BN_EPS = 1e-5
MXU_DTYPE = jnp.bfloat16            # MXU operand dtype (f32 accumulation)
VMEM_LIMIT = 48 * 1024 * 1024       # explicit scoped-VMEM budget (fits v7x 64 MiB)


def _round_up(x, m):
    return ((x + m - 1) // m) * m


# ------------------------------------------------------------------ kernels --

def _make_mm_kernel(pre_act: bool, rows_valid):
    """Matmul with (optional) fused BN+ReLU pre-activation of the input tile and
    fused per-tile partial BN statistics (sum / sum-of-squares) of the output."""

    def kernel(x_ref, sc_ref, sh_ref, w_ref, o_ref, ps_ref, pq_ref):
        x = x_ref[...]
        if pre_act:                                  # consumer-side BN+ReLU fusion
            x = jnp.maximum(x * sc_ref[...] + sh_ref[...], 0.0)
        y = jnp.dot(x.astype(MXU_DTYPE), w_ref[...],
                    preferred_element_type=jnp.float32)
        if rows_valid is not None:                   # zero padded rows (ragged M)
            tm = x_ref.shape[0]
            rid = pl.program_id(0) * tm + jax.lax.broadcasted_iota(
                jnp.int32, (tm, 1), 0)
            y = jnp.where(rid < rows_valid, y, 0.0)
        o_ref[...] = y
        ps_ref[0] = jnp.sum(y, axis=0, keepdims=True)
        pq_ref[0] = jnp.sum(y * y, axis=0, keepdims=True)

    return kernel


def _make_conv2_kernel(stride, H, W, Ho, Wo, C):
    """Direct 3x3 conv (padding=1) for one (n, ho) output row.  The producer's
    BN+ReLU is applied on the fly to the loaded rows; the three kw windows are
    read back from a small zero-bordered VMEM scratch (strided for stride>1)."""

    def kernel(r0_ref, r1_ref, r2_ref, w_ref, sc_ref, sh_ref,
               y_ref, ps_ref, pq_ref, row_scr):
        rows = (r0_ref, r1_ref, r2_ref)
        ho = pl.program_id(1)
        cout = y_ref.shape[1]
        acc = jnp.zeros((Wo, cout), jnp.float32)

        # rows 0 and W+1 of the scratch act as the conv's zero padding along W.
        row_scr[...] = jnp.zeros((W + 2, C), jnp.float32)

        for kh in range(3):                                   # static unroll
            h_in = stride * ho + (kh - 1)                     # original-coord row
            valid_h = jnp.logical_and(h_in >= 0, h_in <= H - 1)
            raw = rows[kh][0, 0]                              # [W, C] pre-BN input
            act = jnp.maximum(raw * sc_ref[...] + sh_ref[...], 0.0)
            act = jnp.where(valid_h, act, 0.0)                # H zero-padding
            row_scr[pl.ds(1, W), :] = act                     # padded-row interior
            for kw in range(3):                               # static unroll
                if stride == 1:
                    win = row_scr[pl.ds(kw, Wo), :]
                else:
                    win = row_scr[pl.ds(kw, Wo, stride=stride), :]
                acc = acc + jnp.dot(win.astype(MXU_DTYPE), w_ref[kh * 3 + kw],
                                    preferred_element_type=jnp.float32)

        y_ref[...] = acc
        ps_ref[0] = jnp.sum(acc, axis=0, keepdims=True)
        pq_ref[0] = jnp.sum(acc * acc, axis=0, keepdims=True)

    return kernel


def _add_bn_relu_kernel(x_ref, sx_ref, bx_ref, r_ref, sr_ref, br_ref, o_ref):
    main = x_ref[...] * sx_ref[...] + bx_ref[...]
    shortcut = r_ref[...] * sr_ref[...] + br_ref[...]
    o_ref[...] = jnp.maximum(main + shortcut, 0.0)


# ------------------------------------------------------------------ wrappers --

def pallas_mm_bn(x, w, scale=None, shift=None, *, pre_act=False):
    """y = [relu(x*scale+shift) if pre_act else x] @ w plus fused per-channel
    (sum, sum_of_squares) of y — one HBM pass for matmul + BN stats."""
    M, K = x.shape
    N = w.shape[1]
    tm = min(512, _round_up(M, 8))
    Mp = _round_up(M, tm)
    grid_m = Mp // tm
    if Mp != M:
        x = jnp.pad(x, ((0, Mp - M), (0, 0)))
    if scale is None:
        scale = jnp.ones((1, K), jnp.float32)
        shift = jnp.zeros((1, K), jnp.float32)
    rows_valid = M if (Mp != M and pre_act) else None
    kernel = _make_mm_kernel(pre_act, rows_valid)

    y, ps, pq = pl.pallas_call(
        kernel,
        out_shape=(jax.ShapeDtypeStruct((Mp, N), jnp.float32),
                   jax.ShapeDtypeStruct((grid_m, 1, N), jnp.float32),
                   jax.ShapeDtypeStruct((grid_m, 1, N), jnp.float32)),
        grid_spec=pltpu.PrefetchScalarGridSpec(
            num_scalar_prefetch=0, grid=(grid_m,),
            in_specs=[pl.BlockSpec((tm, K), lambda i: (i, 0)),
                      pl.BlockSpec((1, K), lambda i: (0, 0)),
                      pl.BlockSpec((1, K), lambda i: (0, 0)),
                      pl.BlockSpec((K, N), lambda i: (0, 0))],
            out_specs=(pl.BlockSpec((tm, N), lambda i: (i, 0)),
                       pl.BlockSpec((1, 1, N), lambda i: (i, 0, 0)),
                       pl.BlockSpec((1, 1, N), lambda i: (i, 0, 0)))),
        compiler_params=pltpu.CompilerParams(
            dimension_semantics=("parallel",),
            vmem_limit_bytes=VMEM_LIMIT),
    )(x, scale, shift, w)

    if Mp != M:
        y = y[:M]
    return y, jnp.sum(ps, axis=(0, 1)), jnp.sum(pq, axis=(0, 1))


def pallas_conv3x3_bn(y1, scale1, shift1, w_taps, N, H, W, stride):
    """3x3 conv (pad=1, stride) of relu(bn1(y1)) without materialising either the
    activation or an im2col buffer; fused per-channel BN stats of the output.
    y1: [N*H*W, Cin] (pre-BN producer output), w_taps: [9, Cin, Cout] bf16."""
    Cin = y1.shape[1]
    Cout = w_taps.shape[2]
    Ho = (H - 1) // stride + 1
    Wo = (W - 1) // stride + 1
    M2 = N * Ho * Wo
    assert Wo % 8 == 0, "demo assumes the conv output width tiles the sublane dim"
    y1_nhwc = y1.reshape(N, H, W, Cin)
    kernel = _make_conv2_kernel(stride, H, W, Ho, Wo, Cin)

    def row_spec(kh):
        def imap(n, ho):
            h = stride * ho + (kh - 1)
            h = jnp.maximum(jnp.minimum(h, H - 1), 0)   # clamp; masked in-kernel
            return (n, h, 0, 0)
        return pl.BlockSpec((1, 1, W, Cin), imap)

    y2, ps, pq = pl.pallas_call(
        kernel,
        out_shape=(jax.ShapeDtypeStruct((M2, Cout), jnp.float32),
                   jax.ShapeDtypeStruct((N * Ho, 1, Cout), jnp.float32),
                   jax.ShapeDtypeStruct((N * Ho, 1, Cout), jnp.float32)),
        grid_spec=pltpu.PrefetchScalarGridSpec(
            num_scalar_prefetch=0, grid=(N, Ho),
            in_specs=[row_spec(0), row_spec(1), row_spec(2),
                      pl.BlockSpec((9, Cin, Cout), lambda n, ho: (0, 0, 0)),
                      pl.BlockSpec((1, Cin), lambda n, ho: (0, 0)),
                      pl.BlockSpec((1, Cin), lambda n, ho: (0, 0))],
            out_specs=(pl.BlockSpec((Wo, Cout), lambda n, ho: (n * Ho + ho, 0)),
                       pl.BlockSpec((1, 1, Cout), lambda n, ho: (n * Ho + ho, 0, 0)),
                       pl.BlockSpec((1, 1, Cout), lambda n, ho: (n * Ho + ho, 0, 0))),
            scratch_shapes=[pltpu.VMEM((W + 2, Cin), jnp.float32)]),
        compiler_params=pltpu.CompilerParams(
            dimension_semantics=("parallel", "parallel"),
            vmem_limit_bytes=VMEM_LIMIT),
    )(y1_nhwc, y1_nhwc, y1_nhwc, w_taps, scale1, shift1)

    return y2, jnp.sum(ps, axis=(0, 1)), jnp.sum(pq, axis=(0, 1)), Ho, Wo


def pallas_add_bn_relu(y, sy, by, r, sr, br):
    M, C = y.shape
    tm = min(1024, _round_up(M, 8))
    Mp = _round_up(M, tm)
    if Mp != M:
        y = jnp.pad(y, ((0, Mp - M), (0, 0)))
        r = jnp.pad(r, ((0, Mp - M), (0, 0)))
    out = pl.pallas_call(
        _add_bn_relu_kernel,
        out_shape=jax.ShapeDtypeStruct((Mp, C), jnp.float32),
        grid_spec=pltpu.PrefetchScalarGridSpec(
            num_scalar_prefetch=0, grid=(Mp // tm,),
            in_specs=[pl.BlockSpec((tm, C), lambda i: (i, 0)),
                      pl.BlockSpec((1, C), lambda i: (0, 0)),
                      pl.BlockSpec((1, C), lambda i: (0, 0)),
                      pl.BlockSpec((tm, C), lambda i: (i, 0)),
                      pl.BlockSpec((1, C), lambda i: (0, 0)),
                      pl.BlockSpec((1, C), lambda i: (0, 0))],
            out_specs=pl.BlockSpec((tm, C), lambda i: (i, 0))),
        compiler_params=pltpu.CompilerParams(
            dimension_semantics=("parallel",),
            vmem_limit_bytes=VMEM_LIMIT),
    )(y, sy, by, r, sr, br)
    return out[:M] if Mp != M else out


# ------------------------------------------------------------ BN fold (glue) --

def _bn_fold(sums, sqs, count, gamma, beta):
    """Training-mode BN folded into per-channel (scale, shift) from fused stats."""
    mean = sums / count
    var = jnp.maximum(sqs / count - mean * mean, 0.0)  # clamp cancellation
    # TODO(synk): a two-pass / Welford reduction would be safer at very large M.
    scale = gamma * jax.lax.rsqrt(var + BN_EPS)
    shift = beta - mean * scale
    C = sums.shape[0]
    return scale.reshape(1, C), shift.reshape(1, C)


# ---------------------------------------------------------- forward pass -----

def bottleneck_forward(x_nhwc, params, stride):
    """BottleNeck forward. x_nhwc: [N, H, W, Cin] f32 -> [N, Ho, Wo, 4*out_ch]."""
    N, H, W, Cin = x_nhwc.shape
    w1, g1, b1, w2, g2, b2, w3, g3, b3, ws, gs, bs = params
    Cmid = w1.shape[0]
    Cout = w3.shape[0]

    # pre-cast / pre-layout weights once (bf16 MXU operands, f32 accumulation)
    w1m = w1.reshape(Cmid, Cin).T.astype(MXU_DTYPE)                      # [Cin,Cmid]
    w2t = jnp.transpose(w2, (2, 3, 1, 0)).reshape(9, Cmid, Cmid).astype(MXU_DTYPE)
    w3m = w3.reshape(Cout, Cmid).T.astype(MXU_DTYPE)                     # [Cmid,Cout]

    x_flat = x_nhwc.reshape(N * H * W, Cin)

    # conv1 (1x1) + fused BN1 stats
    y1, s1_sum, s1_sq = pallas_mm_bn(x_flat, w1m)
    scale1, shift1 = _bn_fold(s1_sum, s1_sq, N * H * W, g1, b1)

    # conv2 (3x3, stride, pad=1): BN1+ReLU fused on load, no im2col, fused BN2 stats
    y2, s2_sum, s2_sq, Ho, Wo = pallas_conv3x3_bn(y1, scale1, shift1, w2t,
                                                  N, H, W, stride)
    M2 = N * Ho * Wo
    scale2, shift2 = _bn_fold(s2_sum, s2_sq, M2, g2, b2)

    # conv3 (1x1): BN2+ReLU fused as pre-activation, fused BN3 stats
    y3, s3_sum, s3_sq = pallas_mm_bn(y2, w3m, scale2, shift2, pre_act=True)
    scale3, shift3 = _bn_fold(s3_sum, s3_sq, M2, g3, b3)

    # shortcut branch
    if ws is not None:
        wsm = ws.reshape(Cout, Cin).T.astype(MXU_DTYPE)
        xs = x_nhwc[:, ::stride, ::stride, :].reshape(M2, Cin)
        r, ss_sum, ss_sq = pallas_mm_bn(xs, wsm)
        scale_s, shift_s = _bn_fold(ss_sum, ss_sq, M2, gs, bs)
    else:
        r = x_flat
        scale_s = jnp.ones((1, Cout), jnp.float32)
        shift_s = jnp.zeros((1, Cout), jnp.float32)

    out = pallas_add_bn_relu(y3, scale3, shift3, r, scale_s, shift_s)
    return out.reshape(N, Ho, Wo, Cout)


# ----------------------------------------------------- pure-JAX reference ----

def _bn_train_ref(x, gamma, beta):
    mean = x.mean(axis=(0, 1, 2))
    var = x.var(axis=(0, 1, 2))
    return (x - mean) / jnp.sqrt(var + BN_EPS) * gamma + beta


def _conv_ref(x, w_oihw, stride, pad):
    w_hwio = jnp.transpose(w_oihw, (2, 3, 1, 0))
    return jax.lax.conv_general_dilated(
        x, w_hwio, window_strides=(stride, stride),
        padding=((pad, pad), (pad, pad)),
        dimension_numbers=("NHWC", "HWIO", "NHWC"))


def bottleneck_ref(x, params, stride):
    w1, g1, b1, w2, g2, b2, w3, g3, b3, ws, gs, bs = params
    h = jax.nn.relu(_bn_train_ref(_conv_ref(x, w1, 1, 0), g1, b1))
    h = jax.nn.relu(_bn_train_ref(_conv_ref(h, w2, stride, 1), g2, b2))
    h = _bn_train_ref(_conv_ref(h, w3, 1, 0), g3, b3)
    if ws is not None:
        sc = _bn_train_ref(_conv_ref(x, ws, stride, 0), gs, bs)
    else:
        sc = x
    return jax.nn.relu(h + sc)


# ------------------------------------------------------------------- main ----

def make_params(key, in_channels, out_channels, stride):
    Cmid = out_channels
    Cout = out_channels * EXPANSION
    k1, k2, k3, k4 = jax.random.split(key, 4)

    def winit(k, shape, fan_in):
        return jax.random.normal(k, shape, jnp.float32) * (1.0 / fan_in) ** 0.5

    w1 = winit(k1, (Cmid, in_channels, 1, 1), in_channels)
    w2 = winit(k2, (Cmid, Cmid, 3, 3), Cmid * 9)
    w3 = winit(k3, (Cout, Cmid, 1, 1), Cmid)
    g1 = jnp.ones((Cmid,), jnp.float32); b1 = jnp.zeros((Cmid,), jnp.float32)
    g2 = jnp.ones((Cmid,), jnp.float32); b2 = jnp.zeros((Cmid,), jnp.float32)
    g3 = jnp.ones((Cout,), jnp.float32); b3 = jnp.zeros((Cout,), jnp.float32)
    if stride != 1 or in_channels != Cout:
        ws = winit(k4, (Cout, in_channels, 1, 1), in_channels)
        gs = jnp.ones((Cout,), jnp.float32); bs = jnp.zeros((Cout,), jnp.float32)
    else:
        ws = gs = bs = None
    return (w1, g1, b1, w2, g2, b2, w3, g3, b3, ws, gs, bs)


if __name__ == "__main__":
    N, H, W = 2, 16, 16
    in_channels, out_channels, stride = 128, 32, 2   # Cout = 128 (lane-dense)

    key = jax.random.PRNGKey(0)
    kx, kp = jax.random.split(key)
    x_nchw = jax.random.normal(kx, (N, in_channels, H, W), jnp.float32)
    x_nhwc = jnp.transpose(x_nchw, (0, 2, 3, 1))     # NCHW -> NHWC

    params = make_params(kp, in_channels, out_channels, stride)

    fwd = jax.jit(bottleneck_forward, static_argnums=2)
    out = jax.block_until_ready(fwd(x_nhwc, params, stride))

    ref = bottleneck_ref(x_nhwc, params, stride)
    assert out.shape == ref.shape
    # bf16 MXU operands (f32 accumulation) vs. the pure-f32 reference.
    max_err = float(jnp.max(jnp.abs(out - ref)))
    assert jnp.allclose(out, ref, atol=5e-2, rtol=5e-2), max_err

    print("KERNEL_OK")
</pallas_src>

<mosaic_0001>
module attributes {stable_mosaic.version = 11 : i64} {
  func.func @kernel(%arg0: i32, %arg1: memref<512x128xf32, #tpu.memory_space<vmem>>, %arg2: memref<1x128xf32, #tpu.memory_space<vmem>>, %arg3: memref<1x128xf32, #tpu.memory_space<vmem>>, %arg4: memref<128x32xbf16, #tpu.memory_space<vmem>>, %arg5: memref<512x32xf32, #tpu.memory_space<vmem>>, %arg6: memref<1x1x32xf32, #tpu.memory_space<vmem>>, %arg7: memref<1x1x32xf32, #tpu.memory_space<vmem>>) attributes {dimension_semantics = [#tpu.dimension_semantics<parallel>], iteration_bounds = array<i64: 1>, scalar_prefetch = 0 : i64, scratch_operands = 0 : i64, tpu.core_type = #tpu.core_type<tc>, window_params = [{transform_indices = @transform_0, window_bounds = array<i64: 512, 128>}, {pipeline_mode = #tpu.pipeline_mode<synchronous>, transform_indices = @transform_1, window_bounds = array<i64: 1, 128>}, {pipeline_mode = #tpu.pipeline_mode<synchronous>, transform_indices = @transform_2, window_bounds = array<i64: 1, 128>}, {pipeline_mode = #tpu.pipeline_mode<synchronous>, transform_indices = @transform_3, window_bounds = array<i64: 128, 32>}, {transform_indices = @transform_4, window_bounds = array<i64: 512, 32>}, {transform_indices = @transform_5, window_bounds = array<i64: 1, 1, 32>}, {transform_indices = @transform_6, window_bounds = array<i64: 1, 1, 32>}]} {
    %c0 = arith.constant 0 : index
    %c0_0 = arith.constant 0 : index
    %0 = vector.load %arg1[%c0, %c0_0] : memref<512x128xf32, #tpu.memory_space<vmem>>, vector<512x128xf32>
    %1 = arith.truncf %0 : vector<512x128xf32> to vector<512x128xbf16>
    %c0_1 = arith.constant 0 : index
    %c0_2 = arith.constant 0 : index
    %2 = vector.load %arg4[%c0_1, %c0_2] : memref<128x32xbf16, #tpu.memory_space<vmem>>, vector<128x32xbf16>
    %cst = arith.constant dense<0.000000e+00> : vector<512x32xf32>
    %3 = tpu.matmul %1, %2, %cst {dimension_numbers = #tpu.dot_dimension_numbers<[1], [0], [0], [1], [0, 0, 1, 1], [], []>} : vector<512x128xbf16>, vector<128x32xbf16>, vector<512x32xf32> -> vector<512x32xf32>
    %c0_3 = arith.constant 0 : index
    %c0_4 = arith.constant 0 : index
    %4 = vector.load %arg5[%c0_3, %c0_4] : memref<512x32xf32, #tpu.memory_space<vmem>>, vector<512x32xf32>
    tpu.vector_store %arg5[%c0_3, %c0_4], %3 {strides = array<i32>} : memref<512x32xf32, #tpu.memory_space<vmem>>, vector<512x32xf32>,
    %cst_5 = arith.constant dense<0.000000e+00> : vector<32xf32>
    %5 = vector.multi_reduction <add>, %3, %cst_5 [0] : vector<512x32xf32> to vector<32xf32>
    %6 = vector.shape_cast %5 : vector<32xf32> to vector<1x32xf32>
    %c0_6 = arith.constant 0 : index
    %c0_7 = arith.constant 0 : index
    %c0_8 = arith.constant 0 : index
    %7 = vector.load %arg6[%c0_6, %c0_7, %c0_8] : memref<1x1x32xf32, #tpu.memory_space<vmem>>, vector<1x1x32xf32>
    %8 = vector.shape_cast %7 : vector<1x1x32xf32> to vector<1x32xf32>
    %9 = vector.shape_cast %6 : vector<1x32xf32> to vector<1x1x32xf32>
    tpu.vector_store %arg6[%c0_6, %c0_7, %c0_8], %9 {strides = array<i32>} : memref<1x1x32xf32, #tpu.memory_space<vmem>>, vector<1x1x32xf32>,
    %10 = arith.mulf %3, %3 : vector<512x32xf32>
    %cst_9 = arith.constant dense<0.000000e+00> : vector<32xf32>
    %11 = vector.multi_reduction <add>, %10, %cst_9 [0] : vector<512x32xf32> to vector<32xf32>
    %12 = vector.shape_cast %11 : vector<32xf32> to vector<1x32xf32>
    %c0_10 = arith.constant 0 : index
    %c0_11 = arith.constant 0 : index
    %c0_12 = arith.constant 0 : index
    %13 = vector.load %arg7[%c0_10, %c0_11, %c0_12] : memref<1x1x32xf32, #tpu.memory_space<vmem>>, vector<1x1x32xf32>
    %14 = vector.shape_cast %13 : vector<1x1x32xf32> to vector<1x32xf32>
    %15 = vector.shape_cast %12 : vector<1x32xf32> to vector<1x1x32xf32>
    tpu.vector_store %arg7[%c0_10, %c0_11, %c0_12], %15 {strides = array<i32>} : memref<1x1x32xf32, #tpu.memory_space<vmem>>, vector<1x1x32xf32>,
    return
  }
  func.func @transform_0(%arg0: i32) -> (i32, i32) {
    %c0_i32 = arith.constant 0 : i32
    %c0_i32_0 = arith.constant 0 : i32
    return %arg0, %c0_i32 : i32, i32
  }
  func.func @transform_1(%arg0: i32) -> (i32, i32) {
    %c0_i32 = arith.constant 0 : i32
    %c0_i32_0 = arith.constant 0 : i32
    %c0_i32_1 = arith.constant 0 : i32
    return %c0_i32, %c0_i32_0 : i32, i32
  }
  func.func @transform_2(%arg0: i32) -> (i32, i32) {
    %c0_i32 = arith.constant 0 : i32
    %c0_i32_0 = arith.constant 0 : i32
    %c0_i32_1 = arith.constant 0 : i32
    return %c0_i32, %c0_i32_0 : i32, i32
  }
  func.func @transform_3(%arg0: i32) -> (i32, i32) {
    %c0_i32 = arith.constant 0 : i32
    %c0_i32_0 = arith.constant 0 : i32
    %c0_i32_1 = arith.constant 0 : i32
    return %c0_i32, %c0_i32_0 : i32, i32
  }
  func.func @transform_4(%arg0: i32) -> (i32, i32) {
    %c0_i32 = arith.constant 0 : i32
    %c0_i32_0 = arith.constant 0 : i32
    return %arg0, %c0_i32 : i32, i32
  }
  func.func @transform_5(%arg0: i32) -> (i32, i32, i32) {
    %c0_i32 = arith.constant 0 : i32
    %c0_i32_0 = arith.constant 0 : i32
    %c0_i32_1 = arith.constant 0 : i32
    return %arg0, %c0_i32, %c0_i32_0 : i32, i32, i32
  }
  func.func @transform_6(%arg0: i32) -> (i32, i32, i32) {
    %c0_i32 = arith.constant 0 : i32
    %c0_i32_0 = arith.constant 0 : i32
    %c0_i32_1 = arith.constant 0 : i32
    return %arg0, %c0_i32, %c0_i32_0 : i32, i32, i32
  }
}

module attributes {stable_mosaic.version = 11 : i64} {
  func.func @kernel(%arg0: i32, %arg1: memref<128x32xf32, #tpu.memory_space<vmem>>, %arg2: memref<1x32xf32, #tpu.memory_space<vmem>>, %arg3: memref<1x32xf32, #tpu.memory_space<vmem>>, %arg4: memref<32x128xbf16, #tpu.memory_space<vmem>>, %arg5: memref<128x128xf32, #tpu.memory_space<vmem>>, %arg6: memref<1x1x128xf32, #tpu.memory_space<vmem>>, %arg7: memref<1x1x128xf32, #tpu.memory_space<vmem>>) attributes {dimension_semantics = [#tpu.dimension_semantics<parallel>], iteration_bounds = array<i64: 1>, scalar_prefetch = 0 : i64, scratch_operands = 0 : i64, tpu.core_type = #tpu.core_type<tc>, window_params = [{transform_indices = @transform_0, window_bounds = array<i64: 128, 32>}, {pipeline_mode = #tpu.pipeline_mode<synchronous>, transform_indices = @transform_1, window_bounds = array<i64: 1, 32>}, {pipeline_mode = #tpu.pipeline_mode<synchronous>, transform_indices = @transform_2, window_bounds = array<i64: 1, 32>}, {pipeline_mode = #tpu.pipeline_mode<synchronous>, transform_indices = @transform_3, window_bounds = array<i64: 32, 128>}, {transform_indices = @transform_4, window_bounds = array<i64: 128, 128>}, {transform_indices = @transform_5, window_bounds = array<i64: 1, 1, 128>}, {transform_indices = @transform_6, window_bounds = array<i64: 1, 1, 128>}]} {
    %c0 = arith.constant 0 : index
    %c0_0 = arith.constant 0 : index
    %0 = vector.load %arg1[%c0, %c0_0] : memref<128x32xf32, #tpu.memory_space<vmem>>, vector<128x32xf32>
    %c0_1 = arith.constant 0 : index
    %c0_2 = arith.constant 0 : index
    %1 = vector.load %arg2[%c0_1, %c0_2] : memref<1x32xf32, #tpu.memory_space<vmem>>, vector<1x32xf32>
    %2 = vector.broadcast %1 : vector<1x32xf32> to vector<128x32xf32>
    %3 = arith.mulf %0, %2 : vector<128x32xf32>
    %c0_3 = arith.constant 0 : index
    %c0_4 = arith.constant 0 : index
    %4 = vector.load %arg3[%c0_3, %c0_4] : memref<1x32xf32, #tpu.memory_space<vmem>>, vector<1x32xf32>
    %5 = vector.broadcast %4 : vector<1x32xf32> to vector<128x32xf32>
    %6 = arith.addf %3, %5 : vector<128x32xf32>
    %cst = arith.constant 0.000000e+00 : f32
    %7 = vector.broadcast %cst : f32 to vector<128x32xf32>
    %8 = arith.maximumf %6, %7 : vector<128x32xf32>
    %9 = arith.truncf %8 : vector<128x32xf32> to vector<128x32xbf16>
    %c0_5 = arith.constant 0 : index
    %c0_6 = arith.constant 0 : index
    %10 = vector.load %arg4[%c0_5, %c0_6] : memref<32x128xbf16, #tpu.memory_space<vmem>>, vector<32x128xbf16>
    %cst_7 = arith.constant dense<0.000000e+00> : vector<128x128xf32>
    %11 = tpu.matmul %9, %10, %cst_7 {dimension_numbers = #tpu.dot_dimension_numbers<[1], [0], [0], [1], [0, 0, 1, 1], [], []>} : vector<128x32xbf16>, vector<32x128xbf16>, vector<128x128xf32> -> vector<128x128xf32>
    %c0_8 = arith.constant 0 : index
    %c0_9 = arith.constant 0 : index
    %12 = vector.load %arg5[%c0_8, %c0_9] : memref<128x128xf32, #tpu.memory_space<vmem>>, vector<128x128xf32>
    tpu.vector_store %arg5[%c0_8, %c0_9], %11 {strides = array<i32>} : memref<128x128xf32, #tpu.memory_space<vmem>>, vector<128x128xf32>,
    %cst_10 = arith.constant dense<0.000000e+00> : vector<128xf32>
    %13 = vector.multi_reduction <add>, %11, %cst_10 [0] : vector<128x128xf32> to vector<128xf32>
    %14 = vector.shape_cast %13 : vector<128xf32> to vector<1x128xf32>
    %c0_11 = arith.constant 0 : index
    %c0_12 = arith.constant 0 : index
    %c0_13 = arith.constant 0 : index
    %15 = vector.load %arg6[%c0_11, %c0_12, %c0_13] : memref<1x1x128xf32, #tpu.memory_space<vmem>>, vector<1x1x128xf32>
    %16 = vector.shape_cast %15 : vector<1x1x128xf32> to vector<1x128xf32>
    %17 = vector.shape_cast %14 : vector<1x128xf32> to vector<1x1x128xf32>
    tpu.vector_store %arg6[%c0_11, %c0_12, %c0_13], %17 {strides = array<i32>} : memref<1x1x128xf32, #tpu.memory_space<vmem>>, vector<1x1x128xf32>,
    %18 = arith.mulf %11, %11 : vector<128x128xf32>
    %cst_14 = arith.constant dense<0.000000e+00> : vector<128xf32>
    %19 = vector.multi_reduction <add>, %18, %cst_14 [0] : vector<128x128xf32> to vector<128xf32>
    %20 = vector.shape_cast %19 : vector<128xf32> to vector<1x128xf32>
    %c0_15 = arith.constant 0 : index
    %c0_16 = arith.constant 0 : index
    %c0_17 = arith.constant 0 : index
    %21 = vector.load %arg7[%c0_15, %c0_16, %c0_17] : memref<1x1x128xf32, #tpu.memory_space<vmem>>, vector<1x1x128xf32>
    %22 = vector.shape_cast %21 : vector<1x1x128xf32> to vector<1x128xf32>
    %23 = vector.shape_cast %20 : vector<1x128xf32> to vector<1x1x128xf32>
    tpu.vector_store %arg7[%c0_15, %c0_16, %c0_17], %23 {strides = array<i32>} : memref<1x1x128xf32, #tpu.memory_space<vmem>>, vector<1x1x128xf32>,
    return
  }
  func.func @transform_0(%arg0: i32) -> (i32, i32) {
    %c0_i32 = arith.constant 0 : i32
    %c0_i32_0 = arith.constant 0 : i32
    return %arg0, %c0_i32 : i32, i32
  }
  func.func @transform_1(%arg0: i32) -> (i32, i32) {
    %c0_i32 = arith.constant 0 : i32
    %c0_i32_0 = arith.constant 0 : i32
    %c0_i32_1 = arith.constant 0 : i32
    return %c0_i32, %c0_i32_0 : i32, i32
  }
  func.func @transform_2(%arg0: i32) -> (i32, i32) {
    %c0_i32 = arith.constant 0 : i32
    %c0_i32_0 = arith.constant 0 : i32
    %c0_i32_1 = arith.constant 0 : i32
    return %c0_i32, %c0_i32_0 : i32, i32
  }
  func.func @transform_3(%arg0: i32) -> (i32, i32) {
    %c0_i32 = arith.constant 0 : i32
    %c0_i32_0 = arith.constant 0 : i32
    %c0_i32_1 = arith.constant 0 : i32
    return %c0_i32, %c0_i32_0 : i32, i32
  }
  func.func @transform_4(%arg0: i32) -> (i32, i32) {
    %c0_i32 = arith.constant 0 : i32
    %c0_i32_0 = arith.constant 0 : i32
    return %arg0, %c0_i32 : i32, i32
  }
  func.func @transform_5(%arg0: i32) -> (i32, i32, i32) {
    %c0_i32 = arith.constant 0 : i32
    %c0_i32_0 = arith.constant 0 : i32
    %c0_i32_1 = arith.constant 0 : i32
    return %arg0, %c0_i32, %c0_i32_0 : i32, i32, i32
  }
  func.func @transform_6(%arg0: i32) -> (i32, i32, i32) {
    %c0_i32 = arith.constant 0 : i32
    %c0_i32_0 = arith.constant 0 : i32
    %c0_i32_1 = arith.constant 0 : i32
    return %arg0, %c0_i32, %c0_i32_0 : i32, i32, i32
  }
}

module attributes {stable_mosaic.version = 11 : i64} {
  func.func @kernel(%arg0: i32, %arg1: i32, %arg2: memref<1x1x16x32xf32, #tpu.memory_space<vmem>>, %arg3: memref<1x1x16x32xf32, #tpu.memory_space<vmem>>, %arg4: memref<1x1x16x32xf32, #tpu.memory_space<vmem>>, %arg5: memref<9x32x32xbf16, #tpu.memory_space<vmem>>, %arg6: memref<1x32xf32, #tpu.memory_space<vmem>>, %arg7: memref<1x32xf32, #tpu.memory_space<vmem>>, %arg8: memref<8x32xf32, #tpu.memory_space<vmem>>, %arg9: memref<1x1x32xf32, #tpu.memory_space<vmem>>, %arg10: memref<1x1x32xf32, #tpu.memory_space<vmem>>, %arg11: memref<18x32xf32, #tpu.memory_space<vmem>>) attributes {dimension_semantics = [#tpu.dimension_semantics<parallel>, #tpu.dimension_semantics<parallel>], iteration_bounds = array<i64: 2, 8>, scalar_prefetch = 0 : i64, scratch_operands = 1 : i64, tpu.core_type = #tpu.core_type<tc>, window_params = [{transform_indices = @transform_0, window_bounds = array<i64: 1, 1, 16, 32>}, {transform_indices = @transform_1, window_bounds = array<i64: 1, 1, 16, 32>}, {transform_indices = @transform_2, window_bounds = array<i64: 1, 1, 16, 32>}, {pipeline_mode = #tpu.pipeline_mode<synchronous>, transform_indices = @transform_3, window_bounds = array<i64: 9, 32, 32>}, {pipeline_mode = #tpu.pipeline_mode<synchronous>, transform_indices = @transform_4, window_bounds = array<i64: 1, 32>}, {pipeline_mode = #tpu.pipeline_mode<synchronous>, transform_indices = @transform_5, window_bounds = array<i64: 1, 32>}, {transform_indices = @transform_6, window_bounds = array<i64: 8, 32>}, {transform_indices = @transform_7, window_bounds = array<i64: 1, 1, 32>}, {transform_indices = @transform_8, window_bounds = array<i64: 1, 1, 32>}]} {
    %cst = arith.constant 0.000000e+00 : f32
    %0 = vector.broadcast %cst : f32 to vector<8x32xf32>
    %cst_0 = arith.constant 0.000000e+00 : f32
    %1 = vector.broadcast %cst_0 : f32 to vector<18x32xf32>
    %c0 = arith.constant 0 : index
    %c0_1 = arith.constant 0 : index
    %2 = vector.load %arg11[%c0, %c0_1] : memref<18x32xf32, #tpu.memory_space<vmem>>, vector<18x32xf32>
    tpu.vector_store %arg11[%c0, %c0_1], %1 {strides = array<i32>} : memref<18x32xf32, #tpu.memory_space<vmem>>, vector<18x32xf32>,
    %c2_i32 = arith.constant 2 : i32
    %3 = arith.muli %c2_i32, %arg1 : i32
    %c-1_i32 = arith.constant -1 : i32
    %4 = arith.addi %3, %c-1_i32 : i32
    %c0_i32 = arith.constant 0 : i32
    %5 = arith.cmpi sge, %4, %c0_i32 : i32
    %c15_i32 = arith.constant 15 : i32
    %6 = arith.cmpi sle, %4, %c15_i32 : i32
    %7 = arith.andi %5, %6 : i1
    %c0_2 = arith.constant 0 : index
    %c0_3 = arith.constant 0 : index
    %c0_4 = arith.constant 0 : index
    %c0_5 = arith.constant 0 : index
    %8 = vector.load %arg2[%c0_2, %c0_3, %c0_4, %c0_5] : memref<1x1x16x32xf32, #tpu.memory_space<vmem>>, vector<1x1x16x32xf32>
    %9 = vector.shape_cast %8 : vector<1x1x16x32xf32> to vector<16x32xf32>
    %c0_6 = arith.constant 0 : index
    %c0_7 = arith.constant 0 : index
    %10 = vector.load %arg6[%c0_6, %c0_7] : memref<1x32xf32, #tpu.memory_space<vmem>>, vector<1x32xf32>
    %11 = vector.broadcast %10 : vector<1x32xf32> to vector<16x32xf32>
    %12 = arith.mulf %9, %11 : vector<16x32xf32>
    %c0_8 = arith.constant 0 : index
    %c0_9 = arith.constant 0 : index
    %13 = vector.load %arg7[%c0_8, %c0_9] : memref<1x32xf32, #tpu.memory_space<vmem>>, vector<1x32xf32>
    %14 = vector.broadcast %13 : vector<1x32xf32> to vector<16x32xf32>
    %15 = arith.addf %12, %14 : vector<16x32xf32>
    %cst_10 = arith.constant 0.000000e+00 : f32
    %16 = vector.broadcast %cst_10 : f32 to vector<16x32xf32>
    %17 = arith.maximumf %15, %16 : vector<16x32xf32>
    %cst_11 = arith.constant 0.000000e+00 : f32
    %18 = vector.broadcast %cst_11 : f32 to vector<16x32xf32>
    %19 = arith.select %7, %17, %18 : vector<16x32xf32>
    %c1 = arith.constant 1 : index
    %c0_12 = arith.constant 0 : index
    %20 = vector.load %arg11[%c1, %c0_12] : memref<18x32xf32, #tpu.memory_space<vmem>>, vector<16x32xf32>
    tpu.vector_store %arg11[%c1, %c0_12], %19 {strides = array<i32>} : memref<18x32xf32, #tpu.memory_space<vmem>>, vector<16x32xf32>,
    %c0_13 = arith.constant 0 : index
    %c0_14 = arith.constant 0 : index
    %21 = tpu.strided_load %arg11[%c0_13, %c0_14] {strides = array<i32: 2, 1>} : memref<18x32xf32, #tpu.memory_space<vmem>>, vector<8x32xf32>
    %22 = arith.truncf %21 : vector<8x32xf32> to vector<8x32xbf16>
    %c0_15 = arith.constant 0 : index
    %c0_16 = arith.constant 0 : index
    %c0_17 = arith.constant 0 : index
    %23 = vector.load %arg5[%c0_15, %c0_16, %c0_17] : memref<9x32x32xbf16, #tpu.memory_space<vmem>>, vector<1x32x32xbf16>
    %24 = vector.shape_cast %23 : vector<1x32x32xbf16> to vector<32x32xbf16>
    %cst_18 = arith.constant dense<0.000000e+00> : vector<8x32xf32>
    %25 = tpu.matmul %22, %24, %cst_18 {dimension_numbers = #tpu.dot_dimension_numbers<[1], [0], [0], [1], [0, 0, 1, 1], [], []>} : vector<8x32xbf16>, vector<32x32xbf16>, vector<8x32xf32> -> vector<8x32xf32>
    %26 = arith.addf %0, %25 : vector<8x32xf32>
    %c1_19 = arith.constant 1 : index
    %c0_20 = arith.constant 0 : index
    %27 = tpu.strided_load %arg11[%c1_19, %c0_20] {strides = array<i32: 2, 1>} : memref<18x32xf32, #tpu.memory_space<vmem>>, vector<8x32xf32>
    %28 = arith.truncf %27 : vector<8x32xf32> to vector<8x32xbf16>
    %c1_21 = arith.constant 1 : index
    %c0_22 = arith.constant 0 : index
    %c0_23 = arith.constant 0 : index
    %29 = vector.load %arg5[%c1_21, %c0_22, %c0_23] : memref<9x32x32xbf16, #tpu.memory_space<vmem>>, vector<1x32x32xbf16>
    %30 = vector.shape_cast %29 : vector<1x32x32xbf16> to vector<32x32xbf16>
    %cst_24 = arith.constant dense<0.000000e+00> : vector<8x32xf32>
    %31 = tpu.matmul %28, %30, %cst_24 {dimension_numbers = #tpu.dot_dimension_numbers<[1], [0], [0], [1], [0, 0, 1, 1], [], []>} : vector<8x32xbf16>, vector<32x32xbf16>, vector<8x32xf32> -> vector<8x32xf32>
    %32 = arith.addf %26, %31 : vector<8x32xf32>
    %c2 = arith.constant 2 : index
    %c0_25 = arith.constant 0 : index
    %33 = tpu.strided_load %arg11[%c2, %c0_25] {strides = array<i32: 2, 1>} : memref<18x32xf32, #tpu.memory_space<vmem>>, vector<8x32xf32>
    %34 = arith.truncf %33 : vector<8x32xf32> to vector<8x32xbf16>
    %c2_26 = arith.constant 2 : index
    %c0_27 = arith.constant 0 : index
    %c0_28 = arith.constant 0 : index
    %35 = vector.load %arg5[%c2_26, %c0_27, %c0_28] : memref<9x32x32xbf16, #tpu.memory_space<vmem>>, vector<1x32x32xbf16>
    %36 = vector.shape_cast %35 : vector<1x32x32xbf16> to vector<32x32xbf16>
    %cst_29 = arith.constant dense<0.000000e+00> : vector<8x32xf32>
    %37 = tpu.matmul %34, %36, %cst_29 {dimension_numbers = #tpu.dot_dimension_numbers<[1], [0], [0], [1], [0, 0, 1, 1], [], []>} : vector<8x32xbf16>, vector<32x32xbf16>, vector<8x32xf32> -> vector<8x32xf32>
    %38 = arith.addf %32, %37 : vector<8x32xf32>
    %c2_i32_30 = arith.constant 2 : i32
    %39 = arith.muli %c2_i32_30, %arg1 : i32
    %c0_i32_31 = arith.constant 0 : i32
    %40 = arith.addi %39, %c0_i32_31 : i32
    %c0_i32_32 = arith.constant 0 : i32
    %41 = arith.cmpi sge, %40, %c0_i32_32 : i32
    %c15_i32_33 = arith.constant 15 : i32
    %42 = arith.cmpi sle, %40, %c15_i32_33 : i32
    %43 = arith.andi %41, %42 : i1
    %c0_34 = arith.constant 0 : index
    %c0_35 = arith.constant 0 : index
    %c0_36 = arith.constant 0 : index
    %c0_37 = arith.constant 0 : index
    %44 = vector.load %arg3[%c0_34, %c0_35, %c0_36, %c0_37] : memref<1x1x16x32xf32, #tpu.memory_space<vmem>>, vector<1x1x16x32xf32>
    %45 = vector.shape_cast %44 : vector<1x1x16x32xf32> to vector<16x32xf32>
    %c0_38 = arith.constant 0 : index
    %c0_39 = arith.constant 0 : index
    %46 = vector.load %arg6[%c0_38, %c0_39] : memref<1x32xf32, #tpu.memory_space<vmem>>, vector<1x32xf32>
    %47 = vector.broadcast %46 : vector<1x32xf32> to vector<16x32xf32>
    %48 = arith.mulf %45, %47 : vector<16x32xf32>
    %c0_40 = arith.constant 0 : index
    %c0_41 = arith.constant 0 : index
    %49 = vector.load %arg7[%c0_40, %c0_41] : memref<1x32xf32, #tpu.memory_space<vmem>>, vector<1x32xf32>
    %50 = vector.broadcast %49 : vector<1x32xf32> to vector<16x32xf32>
    %51 = arith.addf %48, %50 : vector<16x32xf32>
    %cst_42 = arith.constant 0.000000e+00 : f32
    %52 = vector.broadcast %cst_42 : f32 to vector<16x32xf32>
    %53 = arith.maximumf %51, %52 : vector<16x32xf32>
    %cst_43 = arith.constant 0.000000e+00 : f32
    %54 = vector.broadcast %cst_43 : f32 to vector<16x32xf32>
    %55 = arith.select %43, %53, %54 : vector<16x32xf32>
    %c1_44 = arith.constant 1 : index
    %c0_45 = arith.constant 0 : index
    %56 = vector.load %arg11[%c1_44, %c0_45] : memref<18x32xf32, #tpu.memory_space<vmem>>, vector<16x32xf32>
    tpu.vector_store %arg11[%c1_44, %c0_45], %55 {strides = array<i32>} : memref<18x32xf32, #tpu.memory_space<vmem>>, vector<16x32xf32>,
    %c0_46 = arith.constant 0 : index
    %c0_47 = arith.constant 0 : index
    %57 = tpu.strided_load %arg11[%c0_46, %c0_47] {strides = array<i32: 2, 1>} : memref<18x32xf32, #tpu.memory_space<vmem>>, vector<8x32xf32>
    %58 = arith.truncf %57 : vector<8x32xf32> to vector<8x32xbf16>
    %c3 = arith.constant 3 : index
    %c0_48 = arith.constant 0 : index
    %c0_49 = arith.constant 0 : index
    %59 = vector.load %arg5[%c3, %c0_48, %c0_49] : memref<9x32x32xbf16, #tpu.memory_space<vmem>>, vector<1x32x32xbf16>
    %60 = vector.shape_cast %59 : vector<1x32x32xbf16> to vector<32x32xbf16>
    %cst_50 = arith.constant dense<0.000000e+00> : vector<8x32xf32>
    %61 = tpu.matmul %58, %60, %cst_50 {dimension_numbers = #tpu.dot_dimension_numbers<[1], [0], [0], [1], [0, 0, 1, 1], [], []>} : vector<8x32xbf16>, vector<32x32xbf16>, vector<8x32xf32> -> vector<8x32xf32>
    %62 = arith.addf %38, %61 : vector<8x32xf32>
    %c1_51 = arith.constant 1 : index
    %c0_52 = arith.constant 0 : index
    %63 = tpu.strided_load %arg11[%c1_51, %c0_52] {strides = array<i32: 2, 1>} : memref<18x32xf32, #tpu.memory_space<vmem>>, vector<8x32xf32>
    %64 = arith.truncf %63 : vector<8x32xf32> to vector<8x32xbf16>
    %c4 = arith.constant 4 : index
    %c0_53 = arith.constant 0 : index
    %c0_54 = arith.constant 0 : index
    %65 = vector.load %arg5[%c4, %c0_53, %c0_54] : memref<9x32x32xbf16, #tpu.memory_space<vmem>>, vector<1x32x32xbf16>
    %66 = vector.shape_cast %65 : vector<1x32x32xbf16> to vector<32x32xbf16>
    %cst_55 = arith.constant dense<0.000000e+00> : vector<8x32xf32>
    %67 = tpu.matmul %64, %66, %cst_55 {dimension_numbers = #tpu.dot_dimension_numbers<[1], [0], [0], [1], [0, 0, 1, 1], [], []>} : vector<8x32xbf16>, vector<32x32xbf16>, vector<8x32xf32> -> vector<8x32xf32>
    %68 = arith.addf %62, %67 : vector<8x32xf32>
    %c2_56 = arith.constant 2 : index
    %c0_57 = arith.constant 0 : index
    %69 = tpu.strided_load %arg11[%c2_56, %c0_57] {strides = array<i32: 2, 1>} : memref<18x32xf32, #tpu.memory_space<vmem>>, vector<8x32xf32>
    %70 = arith.truncf %69 : vector<8x32xf32> to vector<8x32xbf16>
    %c5 = arith.constant 5 : index
    %c0_58 = arith.constant 0 : index
    %c0_59 = arith.constant 0 : index
    %71 = vector.load %arg5[%c5, %c0_58, %c0_59] : memref<9x32x32xbf16, #tpu.memory_space<vmem>>, vector<1x32x32xbf16>
    %72 = vector.shape_cast %71 : vector<1x32x32xbf16> to vector<32x32xbf16>
    %cst_60 = arith.constant dense<0.000000e+00> : vector<8x32xf32>
    %73 = tpu.matmul %70, %72, %cst_60 {dimension_numbers = #tpu.dot_dimension_numbers<[1], [0], [0], [1], [0, 0, 1, 1], [], []>} : vector<8x32xbf16>, vector<32x32xbf16>, vector<8x32xf32> -> vector<8x32xf32>
    %74 = arith.addf %68, %73 : vector<8x32xf32>
    %c2_i32_61 = arith.constant 2 : i32
    %75 = arith.muli %c2_i32_61, %arg1 : i32
    %c1_i32 = arith.constant 1 : i32
    %76 = arith.addi %75, %c1_i32 : i32
    %c0_i32_62 = arith.constant 0 : i32
    %77 = arith.cmpi sge, %76, %c0_i32_62 : i32
    %c15_i32_63 = arith.constant 15 : i32
    %78 = arith.cmpi sle, %76, %c15_i32_63 : i32
    %79 = arith.andi %77, %78 : i1
    %c0_64 = arith.constant 0 : index
    %c0_65 = arith.constant 0 : index
    %c0_66 = arith.constant 0 : index
    %c0_67 = arith.constant 0 : index
    %80 = vector.load %arg4[%c0_64, %c0_65, %c0_66, %c0_67] : memref<1x1x16x32xf32, #tpu.memory_space<vmem>>, vector<1x1x16x32xf32>
    %81 = vector.shape_cast %80 : vector<1x1x16x32xf32> to vector<16x32xf32>
    %c0_68 = arith.constant 0 : index
    %c0_69 = arith.constant 0 : index
    %82 = vector.load %arg6[%c0_68, %c0_69] : memref<1x32xf32, #tpu.memory_space<vmem>>, vector<1x32xf32>
    %83 = vector.broadcast %82 : vector<1x32xf32> to vector<16x32xf32>
    %84 = arith.mulf %81, %83 : vector<16x32xf32>
    %c0_70 = arith.constant 0 : index
    %c0_71 = arith.constant 0 : index
    %85 = vector.load %arg7[%c0_70, %c0_71] : memref<1x32xf32, #tpu.memory_space<vmem>>, vector<1x32xf32>
    %86 = vector.broadcast %85 : vector<1x32xf32> to vector<16x32xf32>
    %87 = arith.addf %84, %86 : vector<16x32xf32>
    %cst_72 = arith.constant 0.000000e+00 : f32
    %88 = vector.broadcast %cst_72 : f32 to vector<16x32xf32>
    %89 = arith.maximumf %87, %88 : vector<16x32xf32>
    %cst_73 = arith.constant 0.000000e+00 : f32
    %90 = vector.broadcast %cst_73 : f32 to vector<16x32xf32>
    %91 = arith.select %79, %89, %90 : vector<16x32xf32>
    %c1_74 = arith.constant 1 : index
    %c0_75 = arith.constant 0 : index
    %92 = vector.load %arg11[%c1_74, %c0_75] : memref<18x32xf32, #tpu.memory_space<vmem>>, vector<16x32xf32>
    tpu.vector_store %arg11[%c1_74, %c0_75], %91 {strides = array<i32>} : memref<18x32xf32, #tpu.memory_space<vmem>>, vector<16x32xf32>,
    %c0_76 = arith.constant 0 : index
    %c0_77 = arith.constant 0 : index
    %93 = tpu.strided_load %arg11[%c0_76, %c0_77] {strides = array<i32: 2, 1>} : memref<18x32xf32, #tpu.memory_space<vmem>>, vector<8x32xf32>
    %94 = arith.truncf %93 : vector<8x32xf32> to vector<8x32xbf16>
    %c6 = arith.constant 6 : index
    %c0_78 = arith.constant 0 : index
    %c0_79 = arith.constant 0 : index
    %95 = vector.load %arg5[%c6, %c0_78, %c0_79] : memref<9x32x32xbf16, #tpu.memory_space<vmem>>, vector<1x32x32xbf16>
    %96 = vector.shape_cast %95 : vector<1x32x32xbf16> to vector<32x32xbf16>
    %cst_80 = arith.constant dense<0.000000e+00> : vector<8x32xf32>
    %97 = tpu.matmul %94, %96, %cst_80 {dimension_numbers = #tpu.dot_dimension_numbers<[1], [0], [0], [1], [0, 0, 1, 1], [], []>} : vector<8x32xbf16>, vector<32x32xbf16>, vector<8x32xf32> -> vector<8x32xf32>
    %98 = arith.addf %74, %97 : vector<8x32xf32>
    %c1_81 = arith.constant 1 : index
    %c0_82 = arith.constant 0 : index
    %99 = tpu.strided_load %arg11[%c1_81, %c0_82] {strides = array<i32: 2, 1>} : memref<18x32xf32, #tpu.memory_space<vmem>>, vector<8x32xf32>
    %100 = arith.truncf %99 : vector<8x32xf32> to vector<8x32xbf16>
    %c7 = arith.constant 7 : index
    %c0_83 = arith.constant 0 : index
    %c0_84 = arith.constant 0 : index
    %101 = vector.load %arg5[%c7, %c0_83, %c0_84] : memref<9x32x32xbf16, #tpu.memory_space<vmem>>, vector<1x32x32xbf16>
    %102 = vector.shape_cast %101 : vector<1x32x32xbf16> to vector<32x32xbf16>
    %cst_85 = arith.constant dense<0.000000e+00> : vector<8x32xf32>
    %103 = tpu.matmul %100, %102, %cst_85 {dimension_numbers = #tpu.dot_dimension_numbers<[1], [0], [0], [1], [0, 0, 1, 1], [], []>} : vector<8x32xbf16>, vector<32x32xbf16>, vector<8x32xf32> -> vector<8x32xf32>
    %104 = arith.addf %98, %103 : vector<8x32xf32>
    %c2_86 = arith.constant 2 : index
    %c0_87 = arith.constant 0 : index
    %105 = tpu.strided_load %arg11[%c2_86, %c0_87] {strides = array<i32: 2, 1>} : memref<18x32xf32, #tpu.memory_space<vmem>>, vector<8x32xf32>
    %106 = arith.truncf %105 : vector<8x32xf32> to vector<8x32xbf16>
    %c8 = arith.constant 8 : index
    %c0_88 = arith.constant 0 : index
    %c0_89 = arith.constant 0 : index
    %107 = vector.load %arg5[%c8, %c0_88, %c0_89] : memref<9x32x32xbf16, #tpu.memory_space<vmem>>, vector<1x32x32xbf16>
    %108 = vector.shape_cast %107 : vector<1x32x32xbf16> to vector<32x32xbf16>
    %cst_90 = arith.constant dense<0.000000e+00> : vector<8x32xf32>
    %109 = tpu.matmul %106, %108, %cst_90 {dimension_numbers = #tpu.dot_dimension_numbers<[1], [0], [0], [1], [0, 0, 1, 1], [], []>} : vector<8x32xbf16>, vector<32x32xbf16>, vector<8x32xf32> -> vector<8x32xf32>
    %110 = arith.addf %104, %109 : vector<8x32xf32>
    %c0_91 = arith.constant 0 : index
    %c0_92 = arith.constant 0 : index
    %111 = vector.load %arg8[%c0_91, %c0_92] : memref<8x32xf32, #tpu.memory_space<vmem>>, vector<8x32xf32>
    tpu.vector_store %arg8[%c0_91, %c0_92], %110 {strides = array<i32>} : memref<8x32xf32, #tpu.memory_space<vmem>>, vector<8x32xf32>,
    %cst_93 = arith.constant dense<0.000000e+00> : vector<32xf32>
    %112 = vector.multi_reduction <add>, %110, %cst_93 [0] : vector<8x32xf32> to vector<32xf32>
    %113 = vector.shape_cast %112 : vector<32xf32> to vector<1x32xf32>
    %c0_94 = arith.constant 0 : index
    %c0_95 = arith.constant 0 : index
    %c0_96 = arith.constant 0 : index
    %114 = vector.load %arg9[%c0_94, %c0_95, %c0_96] : memref<1x1x32xf32, #tpu.memory_space<vmem>>, vector<1x1x32xf32>
    %115 = vector.shape_cast %114 : vector<1x1x32xf32> to vector<1x32xf32>
    %116 = vector.shape_cast %113 : vector<1x32xf32> to vector<1x1x32xf32>
    tpu.vector_store %arg9[%c0_94, %c0_95, %c0_96], %116 {strides = array<i32>} : memref<1x1x32xf32, #tpu.memory_space<vmem>>, vector<1x1x32xf32>,
    %117 = arith.mulf %110, %110 : vector<8x32xf32>
    %cst_97 = arith.constant dense<0.000000e+00> : vector<32xf32>
    %118 = vector.multi_reduction <add>, %117, %cst_97 [0] : vector<8x32xf32> to vector<32xf32>
    %119 = vector.shape_cast %118 : vector<32xf32> to vector<1x32xf32>
    %c0_98 = arith.constant 0 : index
    %c0_99 = arith.constant 0 : index
    %c0_100 = arith.constant 0 : index
    %120 = vector.load %arg10[%c0_98, %c0_99, %c0_100] : memref<1x1x32xf32, #tpu.memory_space<vmem>>, vector<1x1x32xf32>
    %121 = vector.shape_cast %120 : vector<1x1x32xf32> to vector<1x32xf32>
    %122 = vector.shape_cast %119 : vector<1x32xf32> to vector<1x1x32xf32>
    tpu.vector_store %arg10[%c0_98, %c0_99, %c0_100], %122 {strides = array<i32>} : memref<1x1x32xf32, #tpu.memory_space<vmem>>, vector<1x1x32xf32>,
    return
  }
  func.func @transform_0(%arg0: i32, %arg1: i32) -> (i32, i32, i32, i32) {
    %c2_i32 = arith.constant 2 : i32
    %0 = arith.muli %c2_i32, %arg1 : i32
    %c-1_i32 = arith.constant -1 : i32
    %1 = arith.addi %0, %c-1_i32 : i32
    %c15_i32 = arith.constant 15 : i32
    %2 = arith.minsi %1, %c15_i32 : i32
    %c0_i32 = arith.constant 0 : i32
    %3 = arith.maxsi %2, %c0_i32 : i32
    %c0_i32_0 = arith.constant 0 : i32
    %c0_i32_1 = arith.constant 0 : i32
    %c0_i32_2 = arith.constant 0 : i32
    return %arg0, %3, %c0_i32_0, %c0_i32_1 : i32, i32, i32, i32
  }
  func.func @transform_1(%arg0: i32, %arg1: i32) -> (i32, i32, i32, i32) {
    %c2_i32 = arith.constant 2 : i32
    %0 = arith.muli %c2_i32, %arg1 : i32
    %c0_i32 = arith.constant 0 : i32
    %1 = arith.addi %0, %c0_i32 : i32
    %c15_i32 = arith.constant 15 : i32
    %2 = arith.minsi %1, %c15_i32 : i32
    %c0_i32_0 = arith.constant 0 : i32
    %3 = arith.maxsi %2, %c0_i32_0 : i32
    %c0_i32_1 = arith.constant 0 : i32
    %c0_i32_2 = arith.constant 0 : i32
    %c0_i32_3 = arith.constant 0 : i32
    return %arg0, %3, %c0_i32_1, %c0_i32_2 : i32, i32, i32, i32
  }
  func.func @transform_2(%arg0: i32, %arg1: i32) -> (i32, i32, i32, i32) {
    %c2_i32 = arith.constant 2 : i32
    %0 = arith.muli %c2_i32, %arg1 : i32
    %c1_i32 = arith.constant 1 : i32
    %1 = arith.addi %0, %c1_i32 : i32
    %c15_i32 = arith.constant 15 : i32
    %2 = arith.minsi %1, %c15_i32 : i32
    %c0_i32 = arith.constant 0 : i32
    %3 = arith.maxsi %2, %c0_i32 : i32
    %c0_i32_0 = arith.constant 0 : i32
    %c0_i32_1 = arith.constant 0 : i32
    %c0_i32_2 = arith.constant 0 : i32
    return %arg0, %3, %c0_i32_0, %c0_i32_1 : i32, i32, i32, i32
  }
  func.func @transform_3(%arg0: i32, %arg1: i32) -> (i32, i32, i32) {
    %c0_i32 = arith.constant 0 : i32
    %c0_i32_0 = arith.constant 0 : i32
    %c0_i32_1 = arith.constant 0 : i32
    %c0_i32_2 = arith.constant 0 : i32
    return %c0_i32, %c0_i32_0, %c0_i32_1 : i32, i32, i32
  }
  func.func @transform_4(%arg0: i32, %arg1: i32) -> (i32, i32) {
    %c0_i32 = arith.constant 0 : i32
    %c0_i32_0 = arith.constant 0 : i32
    %c0_i32_1 = arith.constant 0 : i32
    return %c0_i32, %c0_i32_0 : i32, i32
  }
  func.func @transform_5(%arg0: i32, %arg1: i32) -> (i32, i32) {
    %c0_i32 = arith.constant 0 : i32
    %c0_i32_0 = arith.constant 0 : i32
    %c0_i32_1 = arith.constant 0 : i32
    return %c0_i32, %c0_i32_0 : i32, i32
  }
  func.func @transform_6(%arg0: i32, %arg1: i32) -> (i32, i32) {
    %c8_i32 = arith.constant 8 : i32
    %0 = arith.muli %arg0, %c8_i32 : i32
    %1 = arith.addi %0, %arg1 : i32
    %c0_i32 = arith.constant 0 : i32
    %c0_i32_0 = arith.constant 0 : i32
    return %1, %c0_i32 : i32, i32
  }
  func.func @transform_7(%arg0: i32, %arg1: i32) -> (i32, i32, i32) {
    %c8_i32 = arith.constant 8 : i32
    %0 = arith.muli %arg0, %c8_i32 : i32
    %1 = arith.addi %0, %arg1 : i32
    %c0_i32 = arith.constant 0 : i32
    %c0_i32_0 = arith.constant 0 : i32
    %c0_i32_1 = arith.constant 0 : i32
    return %1, %c0_i32, %c0_i32_0 : i32, i32, i32
  }
  func.func @transform_8(%arg0: i32, %arg1: i32) -> (i32, i32, i32) {
    %c8_i32 = arith.constant 8 : i32
    %0 = arith.muli %arg0, %c8_i32 : i32
    %1 = arith.addi %0, %arg1 : i32
    %c0_i32 = arith.constant 0 : i32
    %c0_i32_0 = arith.constant 0 : i32
    %c0_i32_1 = arith.constant 0 : i32
    return %1, %c0_i32, %c0_i32_0 : i32, i32, i32
  }
}

module attributes {stable_mosaic.version = 11 : i64} {
  func.func @kernel(%arg0: i32, %arg1: memref<128x128xf32, #tpu.memory_space<vmem>>, %arg2: memref<1x128xf32, #tpu.memory_space<vmem>>, %arg3: memref<1x128xf32, #tpu.memory_space<vmem>>, %arg4: memref<128x128xbf16, #tpu.memory_space<vmem>>, %arg5: memref<128x128xf32, #tpu.memory_space<vmem>>, %arg6: memref<1x1x128xf32, #tpu.memory_space<vmem>>, %arg7: memref<1x1x128xf32, #tpu.memory_space<vmem>>) attributes {dimension_semantics = [#tpu.dimension_semantics<parallel>], iteration_bounds = array<i64: 1>, scalar_prefetch = 0 : i64, scratch_operands = 0 : i64, tpu.core_type = #tpu.core_type<tc>, window_params = [{transform_indices = @transform_0, window_bounds = array<i64: 128, 128>}, {pipeline_mode = #tpu.pipeline_mode<synchronous>, transform_indices = @transform_1, window_bounds = array<i64: 1, 128>}, {pipeline_mode = #tpu.pipeline_mode<synchronous>, transform_indices = @transform_2, window_bounds = array<i64: 1, 128>}, {pipeline_mode = #tpu.pipeline_mode<synchronous>, transform_indices = @transform_3, window_bounds = array<i64: 128, 128>}, {transform_indices = @transform_4, window_bounds = array<i64: 128, 128>}, {transform_indices = @transform_5, window_bounds = array<i64: 1, 1, 128>}, {transform_indices = @transform_6, window_bounds = array<i64: 1, 1, 128>}]} {
    %c0 = arith.constant 0 : index
    %c0_0 = arith.constant 0 : index
    %0 = vector.load %arg1[%c0, %c0_0] : memref<128x128xf32, #tpu.memory_space<vmem>>, vector<128x128xf32>
    %1 = arith.truncf %0 : vector<128x128xf32> to vector<128x128xbf16>
    %c0_1 = arith.constant 0 : index
    %c0_2 = arith.constant 0 : index
    %2 = vector.load %arg4[%c0_1, %c0_2] : memref<128x128xbf16, #tpu.memory_space<vmem>>, vector<128x128xbf16>
    %cst = arith.constant dense<0.000000e+00> : vector<128x128xf32>
    %3 = tpu.matmul %1, %2, %cst {dimension_numbers = #tpu.dot_dimension_numbers<[1], [0], [0], [1], [0, 0, 1, 1], [], []>} : vector<128x128xbf16>, vector<128x128xbf16>, vector<128x128xf32> -> vector<128x128xf32>
    %c0_3 = arith.constant 0 : index
    %c0_4 = arith.constant 0 : index
    %4 = vector.load %arg5[%c0_3, %c0_4] : memref<128x128xf32, #tpu.memory_space<vmem>>, vector<128x128xf32>
    tpu.vector_store %arg5[%c0_3, %c0_4], %3 {strides = array<i32>} : memref<128x128xf32, #tpu.memory_space<vmem>>, vector<128x128xf32>,
    %cst_5 = arith.constant dense<0.000000e+00> : vector<128xf32>
    %5 = vector.multi_reduction <add>, %3, %cst_5 [0] : vector<128x128xf32> to vector<128xf32>
    %6 = vector.shape_cast %5 : vector<128xf32> to vector<1x128xf32>
    %c0_6 = arith.constant 0 : index
    %c0_7 = arith.constant 0 : index
    %c0_8 = arith.constant 0 : index
    %7 = vector.load %arg6[%c0_6, %c0_7, %c0_8] : memref<1x1x128xf32, #tpu.memory_space<vmem>>, vector<1x1x128xf32>
    %8 = vector.shape_cast %7 : vector<1x1x128xf32> to vector<1x128xf32>
    %9 = vector.shape_cast %6 : vector<1x128xf32> to vector<1x1x128xf32>
    tpu.vector_store %arg6[%c0_6, %c0_7, %c0_8], %9 {strides = array<i32>} : memref<1x1x128xf32, #tpu.memory_space<vmem>>, vector<1x1x128xf32>,
    %10 = arith.mulf %3, %3 : vector<128x128xf32>
    %cst_9 = arith.constant dense<0.000000e+00> : vector<128xf32>
    %11 = vector.multi_reduction <add>, %10, %cst_9 [0] : vector<128x128xf32> to vector<128xf32>
    %12 = vector.shape_cast %11 : vector<128xf32> to vector<1x128xf32>
    %c0_10 = arith.constant 0 : index
    %c0_11 = arith.constant 0 : index
    %c0_12 = arith.constant 0 : index
    %13 = vector.load %arg7[%c0_10, %c0_11, %c0_12] : memref<1x1x128xf32, #tpu.memory_space<vmem>>, vector<1x1x128xf32>
    %14 = vector.shape_cast %13 : vector<1x1x128xf32> to vector<1x128xf32>
    %15 = vector.shape_cast %12 : vector<1x128xf32> to vector<1x1x128xf32>
    tpu.vector_store %arg7[%c0_10, %c0_11, %c0_12], %15 {strides = array<i32>} : memref<1x1x128xf32, #tpu.memory_space<vmem>>, vector<1x1x128xf32>,
    return
  }
  func.func @transform_0(%arg0: i32) -> (i32, i32) {
    %c0_i32 = arith.constant 0 : i32
    %c0_i32_0 = arith.constant 0 : i32
    return %arg0, %c0_i32 : i32, i32
  }
  func.func @transform_1(%arg0: i32) -> (i32, i32) {
    %c0_i32 = arith.constant 0 : i32
    %c0_i32_0 = arith.constant 0 : i32
    %c0_i32_1 = arith.constant 0 : i32
    return %c0_i32, %c0_i32_0 : i32, i32
  }
  func.func @transform_2(%arg0: i32) -> (i32, i32) {
    %c0_i32 = arith.constant 0 : i32
    %c0_i32_0 = arith.constant 0 : i32
    %c0_i32_1 = arith.constant 0 : i32
    return %c0_i32, %c0_i32_0 : i32, i32
  }
  func.func @transform_3(%arg0: i32) -> (i32, i32) {
    %c0_i32 = arith.constant 0 : i32
    %c0_i32_0 = arith.constant 0 : i32
    %c0_i32_1 = arith.constant 0 : i32
    return %c0_i32, %c0_i32_0 : i32, i32
  }
  func.func @transform_4(%arg0: i32) -> (i32, i32) {
    %c0_i32 = arith.constant 0 : i32
    %c0_i32_0 = arith.constant 0 : i32
    return %arg0, %c0_i32 : i32, i32
  }
  func.func @transform_5(%arg0: i32) -> (i32, i32, i32) {
    %c0_i32 = arith.constant 0 : i32
    %c0_i32_0 = arith.constant 0 : i32
    %c0_i32_1 = arith.constant 0 : i32
    return %arg0, %c0_i32, %c0_i32_0 : i32, i32, i32
  }
  func.func @transform_6(%arg0: i32) -> (i32, i32, i32) {
    %c0_i32 = arith.constant 0 : i32
    %c0_i32_0 = arith.constant 0 : i32
    %c0_i32_1 = arith.constant 0 : i32
    return %arg0, %c0_i32, %c0_i32_0 : i32, i32, i32
  }
}

module attributes {stable_mosaic.version = 11 : i64} {
  func.func @_add_bn_relu_kernel(%arg0: i32, %arg1: memref<128x128xf32, #tpu.memory_space<vmem>>, %arg2: memref<1x128xf32, #tpu.memory_space<vmem>>, %arg3: memref<1x128xf32, #tpu.memory_space<vmem>>, %arg4: memref<128x128xf32, #tpu.memory_space<vmem>>, %arg5: memref<1x128xf32, #tpu.memory_space<vmem>>, %arg6: memref<1x128xf32, #tpu.memory_space<vmem>>, %arg7: memref<128x128xf32, #tpu.memory_space<vmem>>) attributes {dimension_semantics = [#tpu.dimension_semantics<parallel>], iteration_bounds = array<i64: 1>, scalar_prefetch = 0 : i64, scratch_operands = 0 : i64, tpu.core_type = #tpu.core_type<tc>, window_params = [{transform_indices = @transform_0, window_bounds = array<i64: 128, 128>}, {pipeline_mode = #tpu.pipeline_mode<synchronous>, transform_indices = @transform_1, window_bounds = array<i64: 1, 128>}, {pipeline_mode = #tpu.pipeline_mode<synchronous>, transform_indices = @transform_2, window_bounds = array<i64: 1, 128>}, {transform_indices = @transform_3, window_bounds = array<i64: 128, 128>}, {pipeline_mode = #tpu.pipeline_mode<synchronous>, transform_indices = @transform_4, window_bounds = array<i64: 1, 128>}, {pipeline_mode = #tpu.pipeline_mode<synchronous>, transform_indices = @transform_5, window_bounds = array<i64: 1, 128>}, {transform_indices = @transform_6, window_bounds = array<i64: 128, 128>}]} {
    %c0 = arith.constant 0 : index
    %c0_0 = arith.constant 0 : index
    %0 = vector.load %arg1[%c0, %c0_0] : memref<128x128xf32, #tpu.memory_space<vmem>>, vector<128x128xf32>
    %c0_1 = arith.constant 0 : index
    %c0_2 = arith.constant 0 : index
    %1 = vector.load %arg2[%c0_1, %c0_2] : memref<1x128xf32, #tpu.memory_space<vmem>>, vector<1x128xf32>
    %2 = vector.broadcast %1 : vector<1x128xf32> to vector<128x128xf32>
    %3 = arith.mulf %0, %2 : vector<128x128xf32>
    %c0_3 = arith.constant 0 : index
    %c0_4 = arith.constant 0 : index
    %4 = vector.load %arg3[%c0_3, %c0_4] : memref<1x128xf32, #tpu.memory_space<vmem>>, vector<1x128xf32>
    %5 = vector.broadcast %4 : vector<1x128xf32> to vector<128x128xf32>
    %6 = arith.addf %3, %5 : vector<128x128xf32>
    %c0_5 = arith.constant 0 : index
    %c0_6 = arith.constant 0 : index
    %7 = vector.load %arg4[%c0_5, %c0_6] : memref<128x128xf32, #tpu.memory_space<vmem>>, vector<128x128xf32>
    %c0_7 = arith.constant 0 : index
    %c0_8 = arith.constant 0 : index
    %8 = vector.load %arg5[%c0_7, %c0_8] : memref<1x128xf32, #tpu.memory_space<vmem>>, vector<1x128xf32>
    %9 = vector.broadcast %8 : vector<1x128xf32> to vector<128x128xf32>
    %10 = arith.mulf %7, %9 : vector<128x128xf32>
    %c0_9 = arith.constant 0 : index
    %c0_10 = arith.constant 0 : index
    %11 = vector.load %arg6[%c0_9, %c0_10] : memref<1x128xf32, #tpu.memory_space<vmem>>, vector<1x128xf32>
    %12 = vector.broadcast %11 : vector<1x128xf32> to vector<128x128xf32>
    %13 = arith.addf %10, %12 : vector<128x128xf32>
    %14 = arith.addf %6, %13 : vector<128x128xf32>
    %cst = arith.constant 0.000000e+00 : f32
    %15 = vector.broadcast %cst : f32 to vector<128x128xf32>
    %16 = arith.maximumf %14, %15 : vector<128x128xf32>
    %c0_11 = arith.constant 0 : index
    %c0_12 = arith.constant 0 : index
    %17 = vector.load %arg7[%c0_11, %c0_12] : memref<128x128xf32, #tpu.memory_space<vmem>>, vector<128x128xf32>
    tpu.vector_store %arg7[%c0_11, %c0_12], %16 {strides = array<i32>} : memref<128x128xf32, #tpu.memory_space<vmem>>, vector<128x128xf32>,
    return
  }
  func.func @transform_0(%arg0: i32) -> (i32, i32) {
    %c0_i32 = arith.constant 0 : i32
    %c0_i32_0 = arith.constant 0 : i32
    return %arg0, %c0_i32 : i32, i32
  }
  func.func @transform_1(%arg0: i32) -> (i32, i32) {
    %c0_i32 = arith.constant 0 : i32
    %c0_i32_0 = arith.constant 0 : i32
    %c0_i32_1 = arith.constant 0 : i32
    return %c0_i32, %c0_i32_0 : i32, i32
  }
  func.func @transform_2(%arg0: i32) -> (i32, i32) {
    %c0_i32 = arith.constant 0 : i32
    %c0_i32_0 = arith.constant 0 : i32
    %c0_i32_1 = arith.constant 0 : i32
    return %c0_i32, %c0_i32_0 : i32, i32
  }
  func.func @transform_3(%arg0: i32) -> (i32, i32) {
    %c0_i32 = arith.constant 0 : i32
    %c0_i32_0 = arith.constant 0 : i32
    return %arg0, %c0_i32 : i32, i32
  }
  func.func @transform_4(%arg0: i32) -> (i32, i32) {
    %c0_i32 = arith.constant 0 : i32
    %c0_i32_0 = arith.constant 0 : i32
    %c0_i32_1 = arith.constant 0 : i32
    return %c0_i32, %c0_i32_0 : i32, i32
  }
  func.func @transform_5(%arg0: i32) -> (i32, i32) {
    %c0_i32 = arith.constant 0 : i32
    %c0_i32_0 = arith.constant 0 : i32
    %c0_i32_1 = arith.constant 0 : i32
    return %c0_i32, %c0_i32_0 : i32, i32
  }
  func.func @transform_6(%arg0: i32) -> (i32, i32) {
    %c0_i32 = arith.constant 0 : i32
    %c0_i32_0 = arith.constant 0 : i32
    return %arg0, %c0_i32 : i32, i32
  }
}

</mosaic_0001>

<bundles_post_ra>
// kernel: bottleneck_forward.7
= control target key start
LH: loop header
LB: loop body
LE: loop exit
PB: predicated region body
PF: predicated region fallthrough
CT: control target
= control target key end

     0   :  { %vm117_vm0 = vcmask 261120   ;;  %s498_s3 = inlined_call_operand.vmem [shape: bf16[32,128], index: 3, kind: input, shape index: {}]   ;;  %s499_s0 = inlined_call_operand.vmem [shape: f32[128,32], index: 0, kind: input, shape index: {}]   ;;  %s500_s1 = inlined_call_operand.vmem [shape: f32[1,32], index: 1, kind: input, shape index: {}]   ;;  %s501_s2 = inlined_call_operand.vmem [shape: f32[1,32], index: 2, kind: input, shape index: {}]   ;;  %s502_s4 = inlined_call_operand.vmem [shape: f32[128,128], index: 4, kind: output, shape index: {0}]   ;;  %s503_s5 = inlined_call_operand.vmem [shape: f32[1,1,128], index: 5, kind: output, shape index: {1}]   ;;  %s504_s6 = inlined_call_operand.vmem [shape: f32[1,1,128], index: 6, kind: output, shape index: {2}]  }
   0x1   :  { %v296_v0 = vld [vmem:[%s498_s3 + $0x8] sm:$0xff]  ;;  %v295_v1 = vld [vmem:[%s498_s3] sm:$0xff]  ;;  %v23_v33 = vld [vmem:[%s499_s0 + $0x10] sm:$0xff] }
   0x2   :  { %v21_v2 = vld [vmem:[%s499_s0] sm:$0xff]  ;;  %v22_v3 = vld [vmem:[%s499_s0 + $0x8] sm:$0xff]  ;;  %148 = vmatpush.bf16.msra.mxu0 %v296_v0  ;;  %297 = vmatpush.bf16.msra.mxu1 %v296_v0  ;;  %v24_v34 = vld [vmem:[%s499_s0 + $0x18] sm:$0xff] }
   0x3   :  { %v355_v4 = vld [vmem:[%s500_s1] ss:$0 sm:$0xff]  ;;  %298 = vmatpush.bf16.msra.mxu2 %v296_v0  ;;  %v26_v9 = vld [vmem:[%s499_s0 + $0x28] sm:$0xff]  ;;  %299 = vmatpush.bf16.msra.mxu3 %v296_v0  ;;  %v27_v35 = vld [vmem:[%s499_s0 + $0x30] sm:$0xff] }
   0x4   :  { %v360_v5 = vld [vmem:[%s501_s2] ss:$0 sm:$0xff]  ;;  %v41_v7 = vmul.f32 %v355_v4, %v21_v2  ;;  %v42_v8 = vmul.f32 %v355_v4, %v22_v3  ;;  %v30_v12 = vld [vmem:[%s499_s0 + $0x48] sm:$0xff]  ;;  %v46_v13 = vmul.f32 %v355_v4, %v26_v9  ;;  %v28_v38 = vld [vmem:[%s499_s0 + $0x38] sm:$0xff]  ;;  %v43_v45 = vmul.f32 %v355_v4, %v23_v33 }
   0x5   :  { %v25_v6 = vld [vmem:[%s499_s0 + $0x20] sm:$0xff]  ;;  %v50_v15 = vmul.f32 %v355_v4, %v30_v12  ;;  %v34_v17 = vld [vmem:[%s499_s0 + $0x68] sm:$0xff]  ;;  %v31_v39 = vld [vmem:[%s499_s0 + $0x50] sm:$0xff]  ;;  %v44_v46 = vmul.f32 %v355_v4, %v24_v34  ;;  %v47_v47 = vmul.f32 %v355_v4, %v27_v35  ;;  %v48_v48 = vmul.f32 %v355_v4, %v28_v38 }
   0x6   :  { %v45_v10 = vmul.f32 %v355_v4, %v25_v6  ;;  %v29_v11 = vld [vmem:[%s499_s0 + $0x40] sm:$0xff]  ;;  %v61_v18 = vadd.f32 %v360_v5, %v41_v7  ;;  %v62_v19 = vadd.f32 %v360_v5, %v42_v8  ;;  %149 = vmatpush.bf16.msra.mxu0 %v295_v1  ;;  %300 = vmatpush.bf16.msra.mxu1 %v295_v1  ;;  %v32_v40 = vld [vmem:[%s499_s0 + $0x58] sm:$0xff]  ;;  %v35_v51 = vld [vmem:[%s499_s0 + $0x70] sm:$0xff] }
   0x7   :  { %v49_v14 = vmul.f32 %v355_v4, %v29_v11  ;;  %v33_v16 = vld [vmem:[%s499_s0 + $0x60] sm:$0xff]  ;;  %v66_v22 = vadd.f32 %v360_v5, %v46_v13  ;;  %v70_v24 = vadd.f32 %v360_v5, %v50_v15  ;;  %301 = vmatpush.bf16.msra.mxu2 %v295_v1  ;;  %302 = vmatpush.bf16.msra.mxu3 %v295_v1  ;;  %v36_v52 = vld [vmem:[%s499_s0 + $0x78] sm:$0xff] }
   0x8   :  { %v65_v20 = vadd.f32 %v360_v5, %v45_v10  ;;  %v53_v21 = vmul.f32 %v355_v4, %v33_v16  ;;  %v77_v25 = vmax.f32 %v61_v18, 0.0  ;;  %v78_v26 = vmax.f32 %v62_v19, 0.0 }
   0x9   :  { %v69_v23 = vadd.f32 %v360_v5, %v49_v14  ;;  %v54_v28 = vmul.f32 %v355_v4, %v34_v17  ;;  %v82_v29 = vmax.f32 %v66_v22, 0.0  ;;  %v86_v31 = vmax.f32 %v70_v24, 0.0 }
   0xa   :  { %v81_v27 = vmax.f32 %v65_v20, 0.0  ;;  %v73_v32 = vadd.f32 %v360_v5, %v53_v21  ;;  %v93_v36 = vpack.c.bf16 %v78_v26, %v77_v25  ;;  %v51_v49 = vmul.f32 %v355_v4, %v31_v39 }
   0xb   :  { %v85_v30 = vmax.f32 %v69_v23, 0.0  ;;  %v74_v37 = vadd.f32 %v360_v5, %v54_v28  ;;  %v52_v50 = vmul.f32 %v355_v4, %v32_v40  ;;  %v63_v54 = vadd.f32 %v360_v5, %v43_v45 }
   0xc   :  { %v95_v41 = vpack.c.bf16 %v82_v29, %v81_v27  ;;  %v89_v43 = vmax.f32 %v73_v32, 0.0  ;;  %287 = vmatmul.msk.bf16.vlgmr.msra.gmra.mxu0 %vm117_vm0, %v93_v36  ;;  %v64_v55 = vadd.f32 %v360_v5, %v44_v46  ;;  %v55_v56 = vmul.f32 %v355_v4, %v35_v51 }
   0xd   :  { %v97_v42 = vpack.c.bf16 %v86_v31, %v85_v30  ;;  %v90_v44 = vmax.f32 %v74_v37, 0.0  ;;  %v56_v57 = vmul.f32 %v355_v4, %v36_v52  ;;  %v67_v58 = vadd.f32 %v360_v5, %v47_v47 }
   0xe   :  { %289 = vmatmul.msk.bf16.vlgmr.msra.gmra.mxu1 %vm117_vm0, %v95_v41  ;;  %v68_v59 = vadd.f32 %v360_v5, %v48_v48  ;;  %v71_v60 = vadd.f32 %v360_v5, %v51_v49  ;;  %v72_v61 = vadd.f32 %v360_v5, %v52_v50  ;;  %v79_v62 = vmax.f32 %v63_v54, 0.0 }
   0xf   :  { %291 = vmatmul.msk.bf16.vlgmr.msra.gmra.mxu2 %vm117_vm0, %v97_v42  ;;  %v99_v53 = vpack.c.bf16 %v90_v44, %v89_v43  ;;  %v80_v63 = vmax.f32 %v64_v55, 0.0  ;;  %v75_v0 = vadd.f32 %v360_v5, %v55_v56  ;;  %v76_v1 = vadd.f32 %v360_v5, %v56_v57 }
  0x10   :  { %v83_v2 = vmax.f32 %v67_v58, 0.0  ;;  %v84_v3 = vmax.f32 %v68_v59, 0.0  ;;  %v87_v6 = vmax.f32 %v71_v60, 0.0  ;;  %v88_v7 = vmax.f32 %v72_v61, 0.0 }
  0x11   :  { %293 = vmatmul.msk.bf16.vlgmr.msra.gmra.mxu3 %vm117_vm0, %v99_v53  ;;  %v94_v8 = vpack.c.bf16 %v80_v63, %v79_v62  ;;  %v91_v4 = vmax.f32 %v75_v0, 0.0  ;;  %v92_v9 = vmax.f32 %v76_v1, 0.0 }
  0x12   :  { %v96_v10 = vpack.c.bf16 %v84_v3, %v83_v2  ;;  %v98_v11 = vpack.c.bf16 %v88_v7, %v87_v6 }
  0x13   :  { %v100_v12 = vpack.c.bf16 %v92_v9, %v91_v4 }
  0x1c   :  { %288 = vmatmul.msk.bf16.gmra.mxu0 %vm117_vm0, %v94_v8 }
  0x1e   :  { %290 = vmatmul.msk.bf16.gmra.mxu1 %vm117_vm0, %v96_v10 }
  0x1f   :  { %292 = vmatmul.msk.bf16.gmra.mxu2 %vm117_vm0, %v98_v11 }
  0x21   :  { %294 = vmatmul.msk.bf16.gmra.mxu3 %vm117_vm0, %v100_v12 }
  0x89   :  { %v151_v13 = vpop.f32.mrf.mxu0 }
  0x8a   :  { %191 = vst [vmem:[%s502_s4] sm:$0xff] %v151_v13  ;;  %v229_v23 = vmul.f32 %v151_v13, %v151_v13 }
  0x8b   :  { %v161_v5 = vpop.f32.mrf.mxu1 }
  0x8c   :  { %195 = vst [vmem:[%s502_s4 + $0x20] sm:$0xff] %v161_v5  ;;  %v233_v35 = vmul.f32 %v161_v5, %v161_v5 }
  0x91   :  { %v153_v15 = vpop.f32.mrf.mxu0 }
  0x92   :  { %v171_v14 = vpop.f32.mrf.mxu2  ;;  %192 = vst [vmem:[%s502_s4 + $0x8] sm:$0xff] %v153_v15  ;;  %v230_v22 = vmul.f32 %v153_v15, %v153_v15  ;;  %v207_v24 = vadd.f32 %v153_v15, %v151_v13 }
  0x93   :  { %199 = vst [vmem:[%s502_s4 + $0x40] sm:$0xff] %v171_v14  ;;  %v163_v16 = vpop.f32.mrf.mxu1  ;;  %v237_v49 = vmul.f32 %v171_v14, %v171_v14 }
  0x94   :  { %196 = vst [vmem:[%s502_s4 + $0x28] sm:$0xff] %v163_v16  ;;  %v181_v17 = vpop.f32.mrf.mxu3  ;;  %v245_v26 = vadd.f32 %v230_v22, %v229_v23  ;;  %v234_v38 = vmul.f32 %v163_v16, %v163_v16 }
  0x95   :  { %203 = vst [vmem:[%s502_s4 + $0x60] sm:$0xff] %v181_v17  ;;  %v241_v61 = vmul.f32 %v181_v17, %v181_v17 }
  0x99   :  { %v156_v19 = vpop.f32.mrf.mxu0 }
  0x9a   :  { %v173_v18 = vpop.f32.mrf.mxu2  ;;  %193 = vst [vmem:[%s502_s4 + $0x10] sm:$0xff] %v156_v19  ;;  %v231_v25 = vmul.f32 %v156_v19, %v156_v19  ;;  %v208_v27 = vadd.f32 %v207_v24, %v156_v19 }
  0x9b   :  { %200 = vst [vmem:[%s502_s4 + $0x48] sm:$0xff] %v173_v18  ;;  %v166_v20 = vpop.f32.mrf.mxu1  ;;  %v238_v52 = vmul.f32 %v173_v18, %v173_v18 }
  0x9c   :  { %197 = vst [vmem:[%s502_s4 + $0x30] sm:$0xff] %v166_v20  ;;  %v183_v21 = vpop.f32.mrf.mxu3  ;;  %v246_v30 = vadd.f32 %v245_v26, %v231_v25  ;;  %v235_v41 = vmul.f32 %v166_v20, %v166_v20 }
  0x9d   :  { %204 = vst [vmem:[%s502_s4 + $0x68] sm:$0xff] %v183_v21  ;;  %v242_v0 = vmul.f32 %v183_v21, %v183_v21 }
  0xa1   :  { %v158_v29 = vpop.f32.mrf.mxu0 }
  0xa2   :  { %v176_v28 = vpop.f32.mrf.mxu2  ;;  %194 = vst [vmem:[%s502_s4 + $0x18] sm:$0xff] %v158_v29  ;;  %v209_v31 = vadd.f32 %v208_v27, %v158_v29  ;;  %v232_v32 = vmul.f32 %v158_v29, %v158_v29 }
  0xa3   :  { %201 = vst [vmem:[%s502_s4 + $0x50] sm:$0xff] %v176_v28  ;;  %v168_v33 = vpop.f32.mrf.mxu1  ;;  %v239_v56 = vmul.f32 %v176_v28, %v176_v28 }
  0xa4   :  { %198 = vst [vmem:[%s502_s4 + $0x38] sm:$0xff] %v168_v33  ;;  %v186_v34 = vpop.f32.mrf.mxu3  ;;  %v210_v36 = vadd.f32 %v209_v31, %v161_v5  ;;  %v247_v37 = vadd.f32 %v246_v30, %v232_v32  ;;  %v236_v46 = vmul.f32 %v168_v33, %v168_v33 }
  0xa5   :  { %205 = vst [vmem:[%s502_s4 + $0x70] sm:$0xff] %v186_v34  ;;  %v243_v6 = vmul.f32 %v186_v34, %v186_v34 }
  0xa6   :  { %v248_v39 = vadd.f32 %v247_v37, %v233_v35  ;;  %v211_v40 = vadd.f32 %v210_v36, %v163_v16 }
  0xa8   :  { %v212_v42 = vadd.f32 %v211_v40, %v166_v20  ;;  %v249_v43 = vadd.f32 %v248_v39, %v234_v38 }
  0xaa   :  { %v178_v44 = vpop.f32.mrf.mxu2  ;;  %v213_v45 = vadd.f32 %v212_v42, %v168_v33  ;;  %v250_v47 = vadd.f32 %v249_v43, %v235_v41 }
  0xab   :  { %202 = vst [vmem:[%s502_s4 + $0x58] sm:$0xff] %v178_v44  ;;  %v240_v60 = vmul.f32 %v178_v44, %v178_v44 }
  0xac   :  { %v188_v48 = vpop.f32.mrf.mxu3  ;;  %v214_v50 = vadd.f32 %v213_v45, %v171_v14  ;;  %v251_v51 = vadd.f32 %v250_v47, %v236_v46 }
  0xad   :  { %206 = vst [vmem:[%s502_s4 + $0x78] sm:$0xff] %v188_v48  ;;  %v244_v9 = vmul.f32 %v188_v48, %v188_v48 }
  0xae   :  { %v252_v53 = vadd.f32 %v251_v51, %v237_v49  ;;  %v215_v54 = vadd.f32 %v214_v50, %v173_v18 }
  0xb0   :  { %v216_v55 = vadd.f32 %v215_v54, %v176_v28  ;;  %v253_v57 = vadd.f32 %v252_v53, %v238_v52 }
  0xb2   :  { %v254_v58 = vadd.f32 %v253_v57, %v239_v56  ;;  %v217_v59 = vadd.f32 %v216_v55, %v178_v44 }
  0xb4   :  { %v218_v62 = vadd.f32 %v217_v59, %v181_v17  ;;  %v255_v63 = vadd.f32 %v254_v58, %v240_v60 }
  0xb6   :  { %v256_v1 = vadd.f32 %v255_v63, %v241_v61  ;;  %v219_v2 = vadd.f32 %v218_v62, %v183_v21 }
  0xb8   :  { %v220_v3 = vadd.f32 %v219_v2, %v186_v34  ;;  %v257_v7 = vadd.f32 %v256_v1, %v242_v0 }
  0xba   :  { %v258_v8 = vadd.f32 %v257_v7, %v243_v6  ;;  %v221_v4 = vadd.f32 %v220_v3, %v188_v48 }
  0xbc   :  { %v222_v10 = vrot.slane %v221_v4, 4  ;;  %v259_v11 = vadd.f32 %v258_v8, %v244_v9 }
  0xbe   :  { %v223_v12 = vadd.f32 %v222_v10, %v221_v4  ;;  %v260_v13 = vrot.slane %v259_v11, 4 }
  0xc0   :  { %v224_v5 = vrot.slane %v223_v12, 2  ;;  %v261_v14 = vadd.f32 %v260_v13, %v259_v11 }
  0xc2   :  { %v225_v15 = vadd.f32 %v224_v5, %v223_v12  ;;  %v262_v16 = vrot.slane %v261_v14, 2 }
  0xc4   :  { %v226_v18 = vrot.slane %v225_v15, 1  ;;  %v263_v17 = vadd.f32 %v262_v16, %v261_v14 }
  0xc6   :  { %v227_v19 = vadd.f32 %v226_v18, %v225_v15  ;;  %v264_v20 = vrot.slane %v263_v17, 1 }
  0xc8   :  { %228 = vst [vmem:[%s503_s5] sm:$0x1] %v227_v19  ;;  %v265_v21 = vadd.f32 %v264_v20, %v263_v17 }
  0xca   :  { %266 = vst [vmem:[%s504_s6] sm:$0x1] %v265_v21 }

// kernel: bottleneck_forward.5
= control target key start
LH: loop header
LB: loop body
LE: loop exit
PB: predicated region body
PF: predicated region fallthrough
CT: control target
= control target key end

     0   :  { %12 = vsyncpa [#allocation3], 0  ;;  %s869_s23 = smov [#allocation2]   ;;  %s870_s24 = smov 128   ;;  %s1618_s0 = inlined_call_operand.hbm [shape: f32[512,128], index: 0, kind: input, shape index: {}]   ;;  %s1619_s1 = inlined_call_operand.vmem [shape: f32[1,128], index: 1, kind: input, shape index: {}]   ;;  %s1620_s2 = inlined_call_operand.vmem [shape: f32[1,128], index: 2, kind: input, shape index: {}]   ;;  %s1621_s3 = inlined_call_operand.vmem [shape: bf16[128,32], index: 3, kind: input, shape index: {}]   ;;  %s1622_s4 = inlined_call_operand.vmem [shape: f32[512,32], index: 4, kind: output, shape index: {0}]   ;;  %s1623_s5 = inlined_call_operand.vmem [shape: f32[1,1,32], index: 5, kind: output, shape index: {1}]   ;;  %s1624_s6 = inlined_call_operand.vmem [shape: f32[1,1,32], index: 6, kind: output, shape index: {2}]  }
   0x1   :  { %s17_s1 = sshll.u32 %s1618_s0, 4  ;;  %s19_s2 = sshll.u32 %s869_s23, 4  ;;  %s18_s1 = int_to_ptr.hbm [resolvable:$true] %s17_s1  ;;  %s20_s2 = int_to_ptr.vmem [resolvable:$true] %s19_s2 }
   0x2   :  { %s871_s25 = smov 8  }
   0x3   :  { %25 = dma.hbm_to_vmem [thread:$0]  %s18_s1, 8192, %s20_s2, [#allocation3], %s870_s24, %s870_s24, %s871_s25  }
   0x4   :  { %867 = dma.done.wait [#allocation3], 8192  }
   0x5   :  { %868 = vsyncadd [#allocation3], 4294959104  ;;  %v815_v0 = vld [vmem:[%s1621_s3 + $0x38] sm:$0xff]  ;;  %v814_v1 = vld [vmem:[%s1621_s3 + $0x30] sm:$0xff]  ;;  %vm365_vm0 = vcmask 261120   ;;  %vm563_vm1 = vcmask 253952  }
   0x6   :  { %196 = vmatpush.bf16.msra.mxu0 %v815_v0  ;;  %816 = vmatpush.bf16.msra.mxu1 %v815_v0  ;;  %v813_v2 = vld [vmem:[%s1621_s3 + $0x28] sm:$0xff]  ;;  %v812_v3 = vld [vmem:[%s1621_s3 + $0x20] sm:$0xff]  ;;  %v811_v4 = vld [vmem:[%s1621_s3 + $0x18] sm:$0xff] }
   0x7   :  { %817 = vmatpush.bf16.msra.mxu2 %v815_v0  ;;  %818 = vmatpush.bf16.msra.mxu3 %v815_v0  ;;  %v810_v5 = vld [vmem:[%s1621_s3 + $0x10] sm:$0xff]  ;;  %v809_v6 = vld [vmem:[%s1621_s3 + $0x8] sm:$0xff]  ;;  %v808_v7 = vld [vmem:[%s1621_s3] sm:$0xff] }
   0x8   :  { %v36_v8 = vld [vmem:[#allocation2] sm:$0xff]  ;;  %v37_v9 = vld [vmem:[#allocation2 + $0x8] sm:$0xff]  ;;  %v38_v14 = vld [vmem:[#allocation2 + $0x10] sm:$0xff] }
   0x9   :  { %v52_v10 = vld [vmem:[#allocation2 + $0x80] sm:$0xff]  ;;  %v53_v11 = vld [vmem:[#allocation2 + $0x88] sm:$0xff]  ;;  %v100_v12 = vpack.c.bf16 %v37_v9, %v36_v8  ;;  %v39_v15 = vld [vmem:[#allocation2 + $0x18] sm:$0xff] }
   0xa   :  { %197 = vmatpush.bf16.msra.mxu0 %v814_v1  ;;  %819 = vmatpush.bf16.msra.mxu1 %v814_v1  ;;  %v108_v13 = vpack.c.bf16 %v53_v11, %v52_v10  ;;  %v54_v16 = vld [vmem:[#allocation2 + $0x90] sm:$0xff]  ;;  %v55_v17 = vld [vmem:[#allocation2 + $0x98] sm:$0xff]  ;;  %v101_v18 = vpack.c.bf16 %v39_v15, %v38_v14  ;;  %v68_v20 = vld [vmem:[#allocation2 + $0x100] sm:$0xff] }
   0xb   :  { %820 = vmatpush.bf16.msra.mxu2 %v814_v1  ;;  %821 = vmatpush.bf16.msra.mxu3 %v814_v1  ;;  %v109_v19 = vpack.c.bf16 %v55_v17, %v54_v16  ;;  %v69_v21 = vld [vmem:[#allocation2 + $0x108] sm:$0xff]  ;;  %v40_v23 = vld [vmem:[#allocation2 + $0x20] sm:$0xff]  ;;  %v70_v29 = vld [vmem:[#allocation2 + $0x110] sm:$0xff] }
   0xc   :  { %v116_v22 = vpack.c.bf16 %v69_v21, %v68_v20  ;;  %v41_v24 = vld [vmem:[#allocation2 + $0x28] sm:$0xff]  ;;  %v56_v25 = vld [vmem:[#allocation2 + $0xa0] sm:$0xff]  ;;  %v71_v30 = vld [vmem:[#allocation2 + $0x118] sm:$0xff] }
   0xd   :  { %v57_v26 = vld [vmem:[#allocation2 + $0xa8] sm:$0xff]  ;;  %v102_v27 = vpack.c.bf16 %v41_v24, %v40_v23  ;;  %v117_v31 = vpack.c.bf16 %v71_v30, %v70_v29  ;;  %v42_v32 = vld [vmem:[#allocation2 + $0x30] sm:$0xff]  ;;  %v43_v33 = vld [vmem:[#allocation2 + $0x38] sm:$0xff] }
   0xe   :  { %198 = vmatpush.bf16.msra.mxu0 %v813_v2  ;;  %822 = vmatpush.bf16.msra.mxu1 %v813_v2  ;;  %v110_v28 = vpack.c.bf16 %v57_v26, %v56_v25  ;;  %v58_v34 = vld [vmem:[#allocation2 + $0xb0] sm:$0xff]  ;;  %v59_v35 = vld [vmem:[#allocation2 + $0xb8] sm:$0xff]  ;;  %v103_v36 = vpack.c.bf16 %v43_v33, %v42_v32  ;;  %v72_v38 = vld [vmem:[#allocation2 + $0x120] sm:$0xff] }
   0xf   :  { %823 = vmatpush.bf16.msra.mxu2 %v813_v2  ;;  %824 = vmatpush.bf16.msra.mxu3 %v813_v2  ;;  %v111_v37 = vpack.c.bf16 %v59_v35, %v58_v34  ;;  %v73_v39 = vld [vmem:[#allocation2 + $0x128] sm:$0xff]  ;;  %v84_v40 = vld [vmem:[#allocation2 + $0x180] sm:$0xff]  ;;  %v74_v50 = vld [vmem:[#allocation2 + $0x130] sm:$0xff] }
  0x10   :  { %v118_v41 = vpack.c.bf16 %v73_v39, %v72_v38  ;;  %v85_v42 = vld [vmem:[#allocation2 + $0x188] sm:$0xff]  ;;  %v44_v44 = vld [vmem:[#allocation2 + $0x40] sm:$0xff]  ;;  %v75_v51 = vld [vmem:[#allocation2 + $0x138] sm:$0xff] }
  0x11   :  { %v124_v43 = vpack.c.bf16 %v85_v42, %v84_v40  ;;  %v45_v45 = vld [vmem:[#allocation2 + $0x48] sm:$0xff]  ;;  %v60_v46 = vld [vmem:[#allocation2 + $0xc0] sm:$0xff]  ;;  %v86_v52 = vld [vmem:[#allocation2 + $0x190] sm:$0xff]  ;;  %v119_v53 = vpack.c.bf16 %v75_v51, %v74_v50 }
  0x12   :  { %199 = vmatpush.bf16.msra.mxu0 %v812_v3  ;;  %825 = vmatpush.bf16.msra.mxu1 %v812_v3  ;;  %v61_v47 = vld [vmem:[#allocation2 + $0xc8] sm:$0xff]  ;;  %v104_v48 = vpack.c.bf16 %v45_v45, %v44_v44  ;;  %v87_v54 = vld [vmem:[#allocation2 + $0x198] sm:$0xff]  ;;  %v46_v56 = vld [vmem:[#allocation2 + $0x50] sm:$0xff] }
  0x13   :  { %826 = vmatpush.bf16.msra.mxu2 %v812_v3  ;;  %827 = vmatpush.bf16.msra.mxu3 %v812_v3  ;;  %v112_v49 = vpack.c.bf16 %v61_v47, %v60_v46  ;;  %v125_v55 = vpack.c.bf16 %v87_v54, %v86_v52  ;;  %v47_v57 = vld [vmem:[#allocation2 + $0x58] sm:$0xff]  ;;  %v62_v58 = vld [vmem:[#allocation2 + $0xd0] sm:$0xff]  ;;  %v76_v62 = vld [vmem:[#allocation2 + $0x140] sm:$0xff] }
  0x14   :  { %v63_v59 = vld [vmem:[#allocation2 + $0xd8] sm:$0xff]  ;;  %v105_v60 = vpack.c.bf16 %v47_v57, %v46_v56  ;;  %v77_v63 = vld [vmem:[#allocation2 + $0x148] sm:$0xff]  ;;  %v88_v0 = vld [vmem:[#allocation2 + $0x1a0] sm:$0xff] }
  0x15   :  { %v113_v61 = vpack.c.bf16 %v63_v59, %v62_v58  ;;  %v120_v1 = vpack.c.bf16 %v77_v63, %v76_v62  ;;  %v89_v2 = vld [vmem:[#allocation2 + $0x1a8] sm:$0xff]  ;;  %v78_v10 = vld [vmem:[#allocation2 + $0x150] sm:$0xff]  ;;  %v79_v11 = vld [vmem:[#allocation2 + $0x158] sm:$0xff] }
  0x16   :  { %200 = vmatpush.bf16.msra.mxu0 %v811_v4  ;;  %828 = vmatpush.bf16.msra.mxu1 %v811_v4  ;;  %v126_v3 = vpack.c.bf16 %v89_v2, %v88_v0  ;;  %v91_v14 = vld [vmem:[#allocation2 + $0x1b8] sm:$0xff]  ;;  %v50_v16 = vld [vmem:[#allocation2 + $0x70] sm:$0xff]  ;;  %v81_v23 = vld [vmem:[#allocation2 + $0x168] sm:$0xff] }
  0x17   :  { %829 = vmatpush.bf16.msra.mxu2 %v811_v4  ;;  %830 = vmatpush.bf16.msra.mxu3 %v811_v4  ;;  %v48_v4 = vld [vmem:[#allocation2 + $0x60] sm:$0xff]  ;;  %v51_v17 = vld [vmem:[#allocation2 + $0x78] sm:$0xff]  ;;  %v93_v26 = vld [vmem:[#allocation2 + $0x1c8] sm:$0xff] }
  0x18   :  { %v107_v20 = vpack.c.bf16 %v51_v17, %v50_v16  ;;  %v92_v24 = vld [vmem:[#allocation2 + $0x1c0] sm:$0xff]  ;;  %v82_v30 = vld [vmem:[#allocation2 + $0x170] sm:$0xff]  ;;  %v95_v34 = vld [vmem:[#allocation2 + $0x1d8] sm:$0xff] }
  0x19   :  { %v94_v32 = vld [vmem:[#allocation2 + $0x1d0] sm:$0xff]  ;;  %v96_v51 = vld [vmem:[#allocation2 + $0x1e0] sm:$0xff]  ;;  %v97_v52 = vld [vmem:[#allocation2 + $0x1e8] sm:$0xff] }
  0x1a   :  { %201 = vmatpush.bf16.msra.mxu0 %v810_v5  ;;  %831 = vmatpush.bf16.msra.mxu1 %v810_v5  ;;  %v129_v35 = vpack.c.bf16 %v95_v34, %v94_v32  ;;  %v130_v54 = vpack.c.bf16 %v97_v52, %v96_v51 }
  0x1b   :  { %832 = vmatpush.bf16.msra.mxu2 %v810_v5  ;;  %833 = vmatpush.bf16.msra.mxu3 %v810_v5  ;;  %v49_v5 = vld [vmem:[#allocation2 + $0x68] sm:$0xff] }
  0x1c   :  { %v106_v8 = vpack.c.bf16 %v49_v5, %v48_v4 }
  0x1e   :  { %202 = vmatpush.bf16.msra.mxu0 %v809_v6  ;;  %834 = vmatpush.bf16.msra.mxu1 %v809_v6 }
  0x1f   :  { %835 = vmatpush.bf16.msra.mxu2 %v809_v6  ;;  %836 = vmatpush.bf16.msra.mxu3 %v809_v6  ;;  %v64_v6 = vld [vmem:[#allocation2 + $0xe0] sm:$0xff] }
  0x22   :  { %203 = vmatpush.bf16.msra.mxu0 %v808_v7  ;;  %837 = vmatpush.bf16.msra.mxu1 %v808_v7 }
  0x23   :  { %838 = vmatpush.bf16.msra.mxu2 %v808_v7  ;;  %839 = vmatpush.bf16.msra.mxu3 %v808_v7  ;;  %v65_v7 = vld [vmem:[#allocation2 + $0xe8] sm:$0xff] }
  0x24   :  { %v114_v9 = vpack.c.bf16 %v65_v7, %v64_v6  ;;  %v98_v6 = vld [vmem:[#allocation2 + $0x1f0] sm:$0xff]  ;;  %v99_v7 = vld [vmem:[#allocation2 + $0x1f8] sm:$0xff] }
  0x25   :  { %204 = vmatmul.bf16.vlgmr.msra.gmra.mxu0 %v100_v12  ;;  %244 = vmatmul.bf16.vlgmr.msra.gmra.mxu1 %v108_v13  ;;  %v90_v12 = vld [vmem:[#allocation2 + $0x1b0] sm:$0xff]  ;;  %v121_v13 = vpack.c.bf16 %v79_v11, %v78_v10 }
  0x26   :  { %284 = vmatmul.bf16.vlgmr.msra.gmra.mxu2 %v116_v22  ;;  %324 = vmatmul.bf16.vlgmr.msra.gmra.mxu3 %v124_v43  ;;  %v127_v15 = vpack.c.bf16 %v91_v14, %v90_v12  ;;  %v80_v22 = vld [vmem:[#allocation2 + $0x160] sm:$0xff] }
  0x27   :  { %v122_v25 = vpack.c.bf16 %v81_v23, %v80_v22 }
  0x35   :  { %209 = vmatmul.bf16.gmra.mxu0 %v101_v18  ;;  %249 = vmatmul.bf16.gmra.mxu1 %v109_v19  ;;  %v66_v18 = vld [vmem:[#allocation2 + $0xf0] sm:$0xff]  ;;  %v67_v19 = vld [vmem:[#allocation2 + $0xf8] sm:$0xff] }
  0x36   :  { %289 = vmatmul.bf16.gmra.mxu2 %v117_v31  ;;  %329 = vmatmul.bf16.gmra.mxu3 %v125_v55  ;;  %v115_v21 = vpack.c.bf16 %v67_v19, %v66_v18  ;;  %v83_v31 = vld [vmem:[#allocation2 + $0x178] sm:$0xff] }
  0x37   :  { %v123_v33 = vpack.c.bf16 %v83_v31, %v82_v30 }
  0x45   :  { %214 = vmatmul.bf16.gmra.mxu0 %v102_v27  ;;  %254 = vmatmul.bf16.gmra.mxu1 %v110_v28  ;;  %v128_v27 = vpack.c.bf16 %v93_v26, %v92_v24 }
  0x46   :  { %294 = vmatmul.bf16.gmra.mxu2 %v118_v41  ;;  %334 = vmatmul.bf16.gmra.mxu3 %v126_v3 }
  0x55   :  { %219 = vmatmul.bf16.gmra.mxu0 %v103_v36  ;;  %259 = vmatmul.bf16.gmra.mxu1 %v111_v37 }
  0x56   :  { %299 = vmatmul.bf16.gmra.mxu2 %v119_v53  ;;  %339 = vmatmul.bf16.gmra.mxu3 %v127_v15 }
  0x65   :  { %224 = vmatmul.bf16.gmra.mxu0 %v104_v48  ;;  %264 = vmatmul.bf16.gmra.mxu1 %v112_v49 }
  0x66   :  { %304 = vmatmul.bf16.gmra.mxu2 %v120_v1  ;;  %344 = vmatmul.bf16.gmra.mxu3 %v128_v27 }
  0x75   :  { %229 = vmatmul.bf16.gmra.mxu0 %v105_v60  ;;  %269 = vmatmul.bf16.gmra.mxu1 %v113_v61 }
  0x76   :  { %309 = vmatmul.bf16.gmra.mxu2 %v121_v13  ;;  %349 = vmatmul.bf16.gmra.mxu3 %v129_v35 }
  0x85   :  { %234 = vmatmul.bf16.gmra.mxu0 %v106_v8  ;;  %274 = vmatmul.bf16.gmra.mxu1 %v114_v9  ;;  %v131_v9 = vpack.c.bf16 %v99_v7, %v98_v6 }
  0x86   :  { %314 = vmatmul.bf16.gmra.mxu2 %v122_v25  ;;  %354 = vmatmul.bf16.gmra.mxu3 %v130_v54 }
  0x95   :  { %239 = vmatmul.bf16.gmra.mxu0 %v107_v20  ;;  %279 = vmatmul.bf16.gmra.mxu1 %v115_v21 }
  0x96   :  { %319 = vmatmul.bf16.gmra.mxu2 %v123_v33  ;;  %359 = vmatmul.bf16.gmra.mxu3 %v131_v9 }
  0xa2   :  { %v205_v28 = vpop.f32.mrf.mxu0  ;;  %v934_v29 = vpop.f32.mrf.mxu1 }
  0xa3   :  { %366 = vst.msk [vmem:[%s1622_s4] sm:$0xff] %vm365_vm0, %v205_v28  ;;  %v565_v36 = vmul.f32 %v205_v28, %v205_v28  ;;  %v430_v39 = vsel %vm365_vm0, %v205_v28, 0.0 }
  0xa4   :  { %382 = vst.msk [vmem:[%s1622_s4 + $0x80] sm:$0xff] %vm365_vm0, %v934_v29 }
  0xa5   :  { %v629_v43 = vsel %vm365_vm0, %v565_v36, 0.0 }
  0xa9   :  { %v980_v60 = vpop.f32.mrf.mxu2  ;;  %v1061_v20 = vpop.f32.mrf.mxu3 }
  0xaa   :  { %v207_v37 = vpop.f32.mrf.mxu0  ;;  %v945_v38 = vpop.f32.mrf.mxu1  ;;  %398 = vst.msk [vmem:[%s1622_s4 + $0x100] sm:$0xff] %vm365_vm0, %v980_v60 }
  0xab   :  { %367 = vst.msk [vmem:[%s1622_s4 + $0x8] sm:$0xff] %vm365_vm0, %v207_v37  ;;  %v431_v40 = vsel %vm365_vm0, %v207_v37, 0.0  ;;  %v566_v41 = vmul.f32 %v207_v37, %v207_v37 }
  0xac   :  { %v432_v42 = vadd.f32 %v431_v40, %v430_v39  ;;  %383 = vst.msk [vmem:[%s1622_s4 + $0x88] sm:$0xff] %vm365_vm0, %v945_v38 }
  0xad   :  { %v630_v44 = vsel %vm365_vm0, %v566_v41, 0.0  ;;  %414 = vst.msk [vmem:[%s1622_s4 + $0x180] sm:$0xff] %vm365_vm0, %v1061_v20 }
  0xae   :  { %v631_v45 = vadd.f32 %v630_v44, %v629_v43 }
  0xb1   :  { %v1000_v4 = vpop.f32.mrf.mxu2  ;;  %v1086_v24 = vpop.f32.mrf.mxu3 }
  0xb2   :  { %v210_v46 = vpop.f32.mrf.mxu0  ;;  %v960_v47 = vpop.f32.mrf.mxu1  ;;  %399 = vst.msk [vmem:[%s1622_s4 + $0x108] sm:$0xff] %vm365_vm0, %v1000_v4 }
  0xb3   :  { %368 = vst.msk [vmem:[%s1622_s4 + $0x10] sm:$0xff] %vm365_vm0, %v210_v46  ;;  %v433_v48 = vsel %vm365_vm0, %v210_v46, 0.0  ;;  %v567_v49 = vmul.f32 %v210_v46, %v210_v46 }
  0xb4   :  { %v434_v50 = vadd.f32 %v433_v48, %v432_v42  ;;  %384 = vst.msk [vmem:[%s1622_s4 + $0x90] sm:$0xff] %vm365_vm0, %v960_v47 }
  0xb5   :  { %v632_v53 = vsel %vm365_vm0, %v567_v49, 0.0  ;;  %415 = vst.msk [vmem:[%s1622_s4 + $0x188] sm:$0xff] %vm365_vm0, %v1086_v24 }
  0xb6   :  { %v633_v55 = vadd.f32 %v632_v53, %v631_v45 }
  0xb9   :  { %v1023_v13 = vpop.f32.mrf.mxu2  ;;  %v1111_v28 = vpop.f32.mrf.mxu3 }
  0xba   :  { %v212_v56 = vpop.f32.mrf.mxu0  ;;  %v973_v57 = vpop.f32.mrf.mxu1  ;;  %400 = vst.msk [vmem:[%s1622_s4 + $0x110] sm:$0xff] %vm365_vm0, %v1023_v13 }
  0xbb   :  { %369 = vst.msk [vmem:[%s1622_s4 + $0x18] sm:$0xff] %vm365_vm0, %v212_v56  ;;  %v435_v58 = vsel %vm365_vm0, %v212_v56, 0.0  ;;  %v568_v59 = vmul.f32 %v212_v56, %v212_v56 }
  0xbc   :  { %v436_v61 = vadd.f32 %v435_v58, %v434_v50  ;;  %385 = vst.msk [vmem:[%s1622_s4 + $0x98] sm:$0xff] %vm365_vm0, %v973_v57 }
  0xbd   :  { %v634_v62 = vsel %vm365_vm0, %v568_v59, 0.0  ;;  %416 = vst.msk [vmem:[%s1622_s4 + $0x190] sm:$0xff] %vm365_vm0, %v1111_v28 }
  0xbe   :  { %v635_v63 = vadd.f32 %v634_v62, %v633_v55 }
  0xc1   :  { %v1041_v16 = vpop.f32.mrf.mxu2  ;;  %v1136_v33 = vpop.f32.mrf.mxu3 }
  0xc2   :  { %v215_v0 = vpop.f32.mrf.mxu0  ;;  %v993_v1 = vpop.f32.mrf.mxu1  ;;  %401 = vst.msk [vmem:[%s1622_s4 + $0x118] sm:$0xff] %vm365_vm0, %v1041_v16 }
  0xc3   :  { %370 = vst.msk [vmem:[%s1622_s4 + $0x20] sm:$0xff] %vm365_vm0, %v215_v0  ;;  %v437_v2 = vsel %vm365_vm0, %v215_v0, 0.0  ;;  %v569_v3 = vmul.f32 %v215_v0, %v215_v0 }
  0xc4   :  { %v1002_v5 = vadd.f32 %v437_v2, %v436_v61  ;;  %386 = vst.msk [vmem:[%s1622_s4 + $0xa0] sm:$0xff] %vm365_vm0, %v993_v1 }
  0xc5   :  { %v636_v8 = vsel %vm365_vm0, %v569_v3, 0.0  ;;  %417 = vst.msk [vmem:[%s1622_s4 + $0x198] sm:$0xff] %vm365_vm0, %v1136_v33 }
  0xc6   :  { %v1015_v10 = vadd.f32 %v636_v8, %v635_v63 }
  0xc9   :  { %v1059_v19 = vpop.f32.mrf.mxu2  ;;  %v1161_v37 = vpop.f32.mrf.mxu3 }
  0xca   :  { %v217_v11 = vpop.f32.mrf.mxu0  ;;  %v1017_v12 = vpop.f32.mrf.mxu1  ;;  %402 = vst.msk [vmem:[%s1622_s4 + $0x120] sm:$0xff] %vm365_vm0, %v1059_v19 }
  0xcb   :  { %371 = vst.msk [vmem:[%s1622_s4 + $0x28] sm:$0xff] %vm365_vm0, %v217_v11  ;;  %v570_v41 = vmul.f32 %v217_v11, %v217_v11  ;;  %v439_v44 = vsel %vm365_vm0, %v217_v11, 0.0 }
  0xcc   :  { %387 = vst.msk [vmem:[%s1622_s4 + $0xa8] sm:$0xff] %vm365_vm0, %v1017_v12  ;;  %v440_v50 = vadd.f32 %v439_v44, %v1002_v5 }
  0xcd   :  { %418 = vst.msk [vmem:[%s1622_s4 + $0x1a0] sm:$0xff] %vm365_vm0, %v1161_v37  ;;  %v638_v46 = vsel %vm365_vm0, %v570_v41, 0.0 }
  0xce   :  { %v639_v54 = vadd.f32 %v638_v46, %v1015_v10 }
  0xd1   :  { %v1084_v23 = vpop.f32.mrf.mxu2  ;;  %v1186_v43 = vpop.f32.mrf.mxu3 }
  0xd2   :  { %v220_v14 = vpop.f32.mrf.mxu0  ;;  %v1035_v15 = vpop.f32.mrf.mxu1  ;;  %403 = vst.msk [vmem:[%s1622_s4 + $0x128] sm:$0xff] %vm365_vm0, %v1084_v23 }
  0xd3   :  { %372 = vst.msk [vmem:[%s1622_s4 + $0x30] sm:$0xff] %vm365_vm0, %v220_v14  ;;  %v571_v45 = vmul.f32 %v220_v14, %v220_v14  ;;  %v441_v48 = vsel %vm365_vm0, %v220_v14, 0.0 }
  0xd4   :  { %388 = vst.msk [vmem:[%s1622_s4 + $0xb0] sm:$0xff] %vm365_vm0, %v1035_v15  ;;  %v442_v55 = vadd.f32 %v441_v48, %v440_v50 }
  0xd5   :  { %419 = vst.msk [vmem:[%s1622_s4 + $0x1a8] sm:$0xff] %vm365_vm0, %v1186_v43  ;;  %v640_v51 = vsel %vm365_vm0, %v571_v45, 0.0 }
  0xd6   :  { %v641_v2 = vadd.f32 %v640_v51, %v639_v54 }
  0xd9   :  { %v1109_v27 = vpop.f32.mrf.mxu2  ;;  %v1220_v0 = vpop.f32.mrf.mxu3 }
  0xda   :  { %v222_v17 = vpop.f32.mrf.mxu0  ;;  %v1053_v18 = vpop.f32.mrf.mxu1  ;;  %404 = vst.msk [vmem:[%s1622_s4 + $0x130] sm:$0xff] %vm365_vm0, %v1109_v27 }
  0xdb   :  { %373 = vst.msk [vmem:[%s1622_s4 + $0x38] sm:$0xff] %vm365_vm0, %v222_v17  ;;  %v572_v49 = vmul.f32 %v222_v17, %v222_v17  ;;  %v443_v52 = vsel %vm365_vm0, %v222_v17, 0.0 }
  0xdc   :  { %389 = vst.msk [vmem:[%s1622_s4 + $0xb8] sm:$0xff] %vm365_vm0, %v1053_v18  ;;  %v444_v3 = vadd.f32 %v443_v52, %v442_v55 }
  0xdd   :  { %v642_v59 = vsel %vm365_vm0, %v572_v49, 0.0  ;;  %420 = vst.msk [vmem:[%s1622_s4 + $0x1b0] sm:$0xff] %vm365_vm0, %v1220_v0 }
  0xde   :  { %v643_v8 = vadd.f32 %v642_v59, %v641_v2 }
  0xe1   :  { %v1134_v32 = vpop.f32.mrf.mxu2 }
  0xe2   :  { %v225_v21 = vpop.f32.mrf.mxu0  ;;  %v1078_v22 = vpop.f32.mrf.mxu1  ;;  %405 = vst.msk [vmem:[%s1622_s4 + $0x138] sm:$0xff] %vm365_vm0, %v1134_v32 }
  0xe3   :  { %374 = vst.msk [vmem:[%s1622_s4 + $0x40] sm:$0xff] %vm365_vm0, %v225_v21  ;;  %v573_v53 = vmul.f32 %v225_v21, %v225_v21  ;;  %v445_v61 = vsel %vm365_vm0, %v225_v21, 0.0 }
  0xe4   :  { %390 = vst.msk [vmem:[%s1622_s4 + $0xc0] sm:$0xff] %vm365_vm0, %v1078_v22  ;;  %v446_v9 = vadd.f32 %v445_v61, %v444_v3 }
  0xe5   :  { %v644_v5 = vsel %vm365_vm0, %v573_v53, 0.0  ;;  %v1253_v53 = vpop.f32.mrf.mxu3 }
  0xe6   :  { %v645_v17 = vadd.f32 %v644_v5, %v643_v8  ;;  %421 = vst.msk [vmem:[%s1622_s4 + $0x1b8] sm:$0xff] %vm365_vm0, %v1253_v53 }
  0xe9   :  { %v1159_v36 = vpop.f32.mrf.mxu2 }
  0xea   :  { %v227_v25 = vpop.f32.mrf.mxu0  ;;  %v1103_v26 = vpop.f32.mrf.mxu1  ;;  %406 = vst.msk [vmem:[%s1622_s4 + $0x140] sm:$0xff] %vm365_vm0, %v1159_v36 }
  0xeb   :  { %375 = vst.msk [vmem:[%s1622_s4 + $0x48] sm:$0xff] %vm365_vm0, %v227_v25  ;;  %v574_v62 = vmul.f32 %v227_v25, %v227_v25  ;;  %v447_v6 = vsel %vm365_vm0, %v227_v25, 0.0 }
  0xec   :  { %391 = vst.msk [vmem:[%s1622_s4 + $0xc8] sm:$0xff] %vm365_vm0, %v1103_v26  ;;  %v448_v21 = vadd.f32 %v447_v6, %v446_v9 }
  0xed   :  { %v646_v10 = vsel %vm365_vm0, %v574_v62, 0.0 }
  0xee   :  { %v647_v45 = vadd.f32 %v646_v10, %v645_v17 }
  0xf1   :  { %v1184_v42 = vpop.f32.mrf.mxu2 }
  0xf2   :  { %v230_v30 = vpop.f32.mrf.mxu0  ;;  %v1128_v31 = vpop.f32.mrf.mxu1  ;;  %407 = vst.msk [vmem:[%s1622_s4 + $0x148] sm:$0xff] %vm365_vm0, %v1184_v42 }
  0xf3   :  { %376 = vst.msk [vmem:[%s1622_s4 + $0x50] sm:$0xff] %vm365_vm0, %v230_v30  ;;  %v575_v7 = vmul.f32 %v230_v30, %v230_v30  ;;  %v449_v11 = vsel %vm365_vm0, %v230_v30, 0.0 }
  0xf4   :  { %392 = vst.msk [vmem:[%s1622_s4 + $0xd0] sm:$0xff] %vm365_vm0, %v1128_v31  ;;  %v450_v46 = vadd.f32 %v449_v11, %v448_v21  ;;  %v581_v11 = vmul.f32 %v934_v29, %v934_v29 }
  0xf5   :  { %v648_v25 = vsel %vm365_vm0, %v575_v7, 0.0 }
  0xf9   :  { %v1218_v63 = vpop.f32.mrf.mxu2 }
  0xfa   :  { %v232_v34 = vpop.f32.mrf.mxu0  ;;  %v1153_v35 = vpop.f32.mrf.mxu1  ;;  %408 = vst.msk [vmem:[%s1622_s4 + $0x150] sm:$0xff] %vm365_vm0, %v1218_v63 }
  0xfb   :  { %377 = vst.msk [vmem:[%s1622_s4 + $0x58] sm:$0xff] %vm365_vm0, %v232_v34  ;;  %v576_v14 = vmul.f32 %v232_v34, %v232_v34  ;;  %v451_v41 = vsel %vm365_vm0, %v232_v34, 0.0  ;;  %v649_v34 = vadd.f32 %v648_v25, %v647_v45  ;;  %v1286_v25 = vpop.f32.mrf.mxu3  ;;  %v461_v45 = vsel %vm365_vm0, %v934_v29, 0.0 }
  0xfc   :  { %393 = vst.msk [vmem:[%s1622_s4 + $0xd8] sm:$0xff] %vm365_vm0, %v1153_v35  ;;  %v452_v54 = vadd.f32 %v451_v41, %v450_v46  ;;  %v582_v46 = vmul.f32 %v945_v38, %v945_v38  ;;  %v660_v29 = vsel %vm365_vm0, %v581_v11, 0.0 }
  0xfd   :  { %v650_v50 = vsel %vm365_vm0, %v576_v14, 0.0  ;;  %422 = vst.msk [vmem:[%s1622_s4 + $0x1c0] sm:$0xff] %vm365_vm0, %v1286_v25 }
  0xfe   :  { %v651_v61 = vadd.f32 %v650_v50, %v649_v34  ;;  %v583_v34 = vmul.f32 %v960_v47, %v960_v47 }
 0x101   :  { %v1251_v30 = vpop.f32.mrf.mxu2 }
 0x102   :  { %v235_v39 = vpop.f32.mrf.mxu0  ;;  %v1178_v40 = vpop.f32.mrf.mxu1  ;;  %409 = vst.msk [vmem:[%s1622_s4 + $0x158] sm:$0xff] %vm365_vm0, %v1251_v30 }
 0x103   :  { %378 = vst.msk [vmem:[%s1622_s4 + $0x60] sm:$0xff] %vm365_vm0, %v235_v39  ;;  %v577_v44 = vmul.f32 %v235_v39, %v235_v39  ;;  %v453_v51 = vsel %vm365_vm0, %v235_v39, 0.0 }
 0x104   :  { %394 = vst.msk [vmem:[%s1622_s4 + $0xe0] sm:$0xff] %vm365_vm0, %v1178_v40  ;;  %v454_v62 = vadd.f32 %v453_v51, %v452_v54 }
 0x105   :  { %v652_v39 = vsel %vm365_vm0, %v577_v44, 0.0 }
 0x109   :  { %v1284_v21 = vpop.f32.mrf.mxu2 }
 0x10a   :  { %v237_v56 = vpop.f32.mrf.mxu0  ;;  %v1210_v58 = vpop.f32.mrf.mxu1  ;;  %410 = vst.msk [vmem:[%s1622_s4 + $0x160] sm:$0xff] %vm365_vm0, %v1284_v21 }
 0x10b   :  { %379 = vst.msk [vmem:[%s1622_s4 + $0x68] sm:$0xff] %vm365_vm0, %v237_v56  ;;  %v578_v52 = vmul.f32 %v237_v56, %v237_v56  ;;  %v455_v55 = vsel %vm365_vm0, %v237_v56, 0.0  ;;  %v653_v56 = vadd.f32 %v652_v39, %v651_v61  ;;  %v584_v61 = vmul.f32 %v973_v57, %v973_v57 }
 0x10c   :  { %395 = vst.msk [vmem:[%s1622_s4 + $0xe8] sm:$0xff] %vm365_vm0, %v1210_v58  ;;  %v456_v5 = vadd.f32 %v455_v55, %v454_v62  ;;  %v662_v55 = vsel %vm365_vm0, %v582_v46, 0.0 }
 0x10d   :  { %v654_v2 = vsel %vm365_vm0, %v578_v52, 0.0  ;;  %v463_v52 = vsel %vm365_vm0, %v945_v38, 0.0  ;;  %v467_v38 = vsel %vm365_vm0, %v973_v57, 0.0  ;;  %v469_v57 = vsel %vm365_vm0, %v993_v1, 0.0 }
 0x10e   :  { %v655_v7 = vadd.f32 %v654_v2, %v653_v56  ;;  %v585_v56 = vmul.f32 %v993_v1, %v993_v1 }
 0x112   :  { %v240_v48 = vpop.f32.mrf.mxu0  ;;  %v1243_v49 = vpop.f32.mrf.mxu1 }
 0x113   :  { %380 = vst.msk [vmem:[%s1622_s4 + $0x70] sm:$0xff] %vm365_vm0, %v240_v48  ;;  %v579_v59 = vmul.f32 %v240_v48, %v240_v48  ;;  %v457_v3 = vsel %vm365_vm0, %v240_v48, 0.0 }
 0x114   :  { %396 = vst.msk [vmem:[%s1622_s4 + $0xf0] sm:$0xff] %vm365_vm0, %v1243_v49  ;;  %v458_v8 = vadd.f32 %v457_v3, %v456_v5  ;;  %v664_v3 = vsel %vm365_vm0, %v583_v34, 0.0  ;;  %v1323_v5 = vpop.f32.mrf.mxu2  ;;  %v589_v34 = vmul.f32 %v1078_v22, %v1078_v22 }
 0x115   :  { %v656_v6 = vsel %vm365_vm0, %v579_v59, 0.0  ;;  %v465_v59 = vsel %vm365_vm0, %v960_v47, 0.0  ;;  %411 = vst.msk [vmem:[%s1622_s4 + $0x168] sm:$0xff] %vm365_vm0, %v1323_v5  ;;  %v666_v47 = vsel %vm365_vm0, %v584_v61, 0.0  ;;  %v590_v61 = vmul.f32 %v1103_v26, %v1103_v26 }
 0x116   :  { %v657_v41 = vadd.f32 %v656_v6, %v655_v7  ;;  %v1325_v6 = vpop.f32.mrf.mxu3 }
 0x117   :  { %423 = vst.msk [vmem:[%s1622_s4 + $0x1c8] sm:$0xff] %vm365_vm0, %v1325_v6 }
 0x11a   :  { %v242_v9 = vpop.f32.mrf.mxu0  ;;  %v1275_v10 = vpop.f32.mrf.mxu1 }
 0x11b   :  { %381 = vst.msk [vmem:[%s1622_s4 + $0x78] sm:$0xff] %vm365_vm0, %v242_v9  ;;  %v459_v14 = vsel %vm365_vm0, %v242_v9, 0.0  ;;  %v580_v17 = vmul.f32 %v242_v9, %v242_v9  ;;  %v586_v9 = vmul.f32 %v1017_v12, %v1017_v12 }
 0x11c   :  { %v460_v44 = vadd.f32 %v459_v14, %v458_v8  ;;  %397 = vst.msk [vmem:[%s1622_s4 + $0xf8] sm:$0xff] %vm365_vm0, %v1275_v10 }
 0x11d   :  { %v658_v48 = vsel %vm365_vm0, %v580_v17, 0.0  ;;  %v668_v17 = vsel %vm365_vm0, %v585_v56, 0.0  ;;  %v670_v46 = vsel %vm365_vm0, %v586_v9, 0.0  ;;  %v591_v56 = vmul.f32 %v1128_v31, %v1128_v31 }
 0x11e   :  { %v462_v50 = vadd.f32 %v461_v45, %v460_v44  ;;  %v659_v51 = vadd.f32 %v658_v48, %v657_v41  ;;  %v471_v41 = vsel %vm365_vm0, %v1017_v12, 0.0  ;;  %v587_v44 = vmul.f32 %v1035_v15, %v1035_v15 }
 0x11f   :  { %v473_v48 = vsel %vm365_vm0, %v1035_v15, 0.0  ;;  %v475_v12 = vsel %vm365_vm0, %v1053_v18, 0.0 }
 0x120   :  { %v464_v54 = vadd.f32 %v463_v52, %v462_v50  ;;  %v661_v39 = vadd.f32 %v660_v29, %v659_v51  ;;  %v588_v50 = vmul.f32 %v1053_v18, %v1053_v18  ;;  %v672_v52 = vsel %vm365_vm0, %v587_v44, 0.0 }
 0x121   :  { %v477_v18 = vsel %vm365_vm0, %v1078_v22, 0.0 }
 0x122   :  { %v466_v62 = vadd.f32 %v465_v59, %v464_v54  ;;  %v663_v2 = vadd.f32 %v662_v55, %v661_v39  ;;  %v1357_v54 = vpop.f32.mrf.mxu2  ;;  %v1359_v39 = vpop.f32.mrf.mxu3  ;;  %v674_v15 = vsel %vm365_vm0, %v588_v50, 0.0 }
 0x123   :  { %412 = vst.msk [vmem:[%s1622_s4 + $0x170] sm:$0xff] %vm365_vm0, %v1357_v54 }
 0x124   :  { %v468_v7 = vadd.f32 %v467_v38, %v466_v62  ;;  %v665_v8 = vadd.f32 %v664_v3, %v663_v2  ;;  %424 = vst.msk [vmem:[%s1622_s4 + $0x1d0] sm:$0xff] %vm365_vm0, %v1359_v39  ;;  %v676_v3 = vsel %vm365_vm0, %v589_v34, 0.0  ;;  %v479_v38 = vsel %vm365_vm0, %v1103_v26, 0.0 }
 0x125   :  { %v483_v26 = vsel %vm365_vm0, %v1153_v35, 0.0 }
 0x126   :  { %v470_v11 = vadd.f32 %v469_v57, %v468_v7  ;;  %v667_v14 = vadd.f32 %v666_v47, %v665_v8  ;;  %v678_v8 = vsel %vm365_vm0, %v590_v61, 0.0  ;;  %v481_v47 = vsel %vm365_vm0, %v1128_v31, 0.0 }
 0x127   :  { %v592_v57 = vmul.f32 %v1153_v35, %v1153_v35  ;;  %v485_v35 = vsel %vm365_vm0, %v1178_v40, 0.0  ;;  %v597_v61 = vmul.f32 %v980_v60, %v980_v60 }
 0x128   :  { %v472_v1 = vadd.f32 %v471_v41, %v470_v11  ;;  %v669_v45 = vadd.f32 %v668_v17, %v667_v14  ;;  %v680_v14 = vsel %vm365_vm0, %v591_v56, 0.0  ;;  %v593_v17 = vmul.f32 %v1178_v40, %v1178_v40 }
 0x129   :  { %v682_v31 = vsel %vm365_vm0, %v592_v57, 0.0  ;;  %v598_v56 = vmul.f32 %v1000_v4, %v1000_v4  ;;  %v599_v57 = vmul.f32 %v1023_v13, %v1023_v13 }
 0x12a   :  { %v671_v51 = vadd.f32 %v670_v46, %v669_v45  ;;  %v474_v29 = vadd.f32 %v473_v48, %v472_v1  ;;  %v1391_v41 = vpop.f32.mrf.mxu2  ;;  %v1393_v44 = vpop.f32.mrf.mxu3  ;;  %v594_v46 = vmul.f32 %v1210_v58, %v1210_v58 }
 0x12b   :  { %413 = vst.msk [vmem:[%s1622_s4 + $0x178] sm:$0xff] %vm365_vm0, %v1391_v41 }
 0x12c   :  { %v476_v55 = vadd.f32 %v475_v12, %v474_v29  ;;  %v673_v59 = vadd.f32 %v672_v52, %v671_v51  ;;  %425 = vst.msk [vmem:[%s1622_s4 + $0x1d8] sm:$0xff] %vm365_vm0, %v1393_v44  ;;  %v684_v51 = vsel %vm365_vm0, %v593_v17, 0.0  ;;  %v487_v29 = vsel %vm365_vm0, %v1210_v58, 0.0 }
 0x12d   :  { %v595_v52 = vmul.f32 %v1243_v49, %v1243_v49  ;;  %v686_v34 = vsel %vm365_vm0, %v594_v46, 0.0 }
 0x12e   :  { %v478_v62 = vadd.f32 %v477_v18, %v476_v55  ;;  %v675_v2 = vadd.f32 %v674_v15, %v673_v59  ;;  %v489_v55 = vsel %vm365_vm0, %v1243_v49, 0.0  ;;  %v596_v59 = vmul.f32 %v1275_v10, %v1275_v10 }
 0x12f   :  { %v688_v58 = vsel %vm365_vm0, %v595_v52, 0.0  ;;  %v493_v49 = vsel %vm365_vm0, %v980_v60, 0.0  ;;  %v497_v60 = vsel %vm365_vm0, %v1023_v13, 0.0 }
 0x130   :  { %v480_v22 = vadd.f32 %v479_v38, %v478_v62  ;;  %v677_v7 = vadd.f32 %v676_v3, %v675_v2  ;;  %v491_v62 = vsel %vm365_vm0, %v1275_v10, 0.0 }
 0x132   :  { %v482_v9 = vadd.f32 %v481_v47, %v480_v22  ;;  %v679_v11 = vadd.f32 %v678_v8, %v677_v7  ;;  %v1425_v2 = vpop.f32.mrf.mxu3  ;;  %v690_v22 = vsel %vm365_vm0, %v596_v59, 0.0  ;;  %v692_v8 = vsel %vm365_vm0, %v597_v61, 0.0 }
 0x133   :  { %426 = vst.msk [vmem:[%s1622_s4 + $0x1e0] sm:$0xff] %vm365_vm0, %v1425_v2  ;;  %v495_v47 = vsel %vm365_vm0, %v1000_v4, 0.0  ;;  %v499_v4 = vsel %vm365_vm0, %v1041_v16, 0.0 }
 0x134   :  { %v484_v1 = vadd.f32 %v483_v26, %v482_v9  ;;  %v681_v45 = vadd.f32 %v680_v14, %v679_v11  ;;  %v694_v14 = vsel %vm365_vm0, %v598_v56, 0.0  ;;  %v600_v26 = vmul.f32 %v1041_v16, %v1041_v16 }
 0x135   :  { %v602_v16 = vmul.f32 %v1084_v23, %v1084_v23  ;;  %v509_v56 = vsel %vm365_vm0, %v1159_v36, 0.0 }
 0x136   :  { %v486_v48 = vadd.f32 %v485_v35, %v484_v1  ;;  %v683_v50 = vadd.f32 %v682_v31, %v681_v45  ;;  %v696_v45 = vsel %vm365_vm0, %v599_v57, 0.0  ;;  %v601_v31 = vmul.f32 %v1059_v19, %v1059_v19 }
 0x137   :  { %v698_v13 = vsel %vm365_vm0, %v600_v26, 0.0  ;;  %v702_v59 = vsel %vm365_vm0, %v602_v16, 0.0  ;;  %v519_v16 = vsel %vm365_vm0, %v1323_v5, 0.0 }
 0x138   :  { %v685_v40 = vadd.f32 %v684_v51, %v683_v50  ;;  %v488_v12 = vadd.f32 %v487_v29, %v486_v48  ;;  %v501_v50 = vsel %vm365_vm0, %v1059_v19, 0.0  ;;  %v700_v52 = vsel %vm365_vm0, %v601_v31, 0.0 }
 0x139   :  { %v505_v19 = vsel %vm365_vm0, %v1109_v27, 0.0 }
 0x13a   :  { %v687_v15 = vadd.f32 %v686_v34, %v685_v40  ;;  %v490_v18 = vadd.f32 %v489_v55, %v488_v12  ;;  %v1452_v35 = vpop.f32.mrf.mxu3  ;;  %v503_v40 = vsel %vm365_vm0, %v1084_v23, 0.0  ;;  %v603_v12 = vmul.f32 %v1109_v27, %v1109_v27 }
 0x13b   :  { %427 = vst.msk [vmem:[%s1622_s4 + $0x1e8] sm:$0xff] %vm365_vm0, %v1452_v35  ;;  %v507_v23 = vsel %vm365_vm0, %v1134_v32, 0.0 }
 0x13c   :  { %v689_v3 = vadd.f32 %v688_v58, %v687_v15  ;;  %v492_v38 = vadd.f32 %v491_v62, %v490_v18  ;;  %v604_v15 = vmul.f32 %v1134_v32, %v1134_v32  ;;  %v704_v58 = vsel %vm365_vm0, %v603_v12, 0.0 }
 0x13d   :  { %v605_v62 = vmul.f32 %v1159_v36, %v1159_v36  ;;  %v606_v32 = vmul.f32 %v1184_v42, %v1184_v42  ;;  %v513_v36 = vsel %vm365_vm0, %v1218_v63, 0.0  ;;  %v612_v12 = vmul.f32 %v1391_v41, %v1391_v41 }
 0x13e   :  { %v494_v7 = vadd.f32 %v493_v49, %v492_v38  ;;  %v691_v10 = vadd.f32 %v690_v22, %v689_v3  ;;  %v706_v27 = vsel %vm365_vm0, %v604_v15, 0.0 }
 0x140   :  { %v496_v9 = vadd.f32 %v495_v47, %v494_v7  ;;  %v693_v11 = vadd.f32 %v692_v8, %v691_v10  ;;  %v708_v10 = vsel %vm365_vm0, %v605_v62, 0.0  ;;  %v511_v8 = vsel %vm365_vm0, %v1184_v42, 0.0 }
 0x141   :  { %v607_v47 = vmul.f32 %v1218_v63, %v1218_v63  ;;  %v515_v42 = vsel %vm365_vm0, %v1251_v30, 0.0 }
 0x142   :  { %v498_v17 = vadd.f32 %v497_v60, %v496_v9  ;;  %v695_v1 = vadd.f32 %v694_v14, %v693_v11  ;;  %v1479_v3 = vpop.f32.mrf.mxu3  ;;  %v710_v11 = vsel %vm365_vm0, %v606_v32, 0.0  ;;  %v608_v14 = vmul.f32 %v1251_v30, %v1251_v30 }
 0x143   :  { %428 = vst.msk [vmem:[%s1622_s4 + $0x1f0] sm:$0xff] %vm365_vm0, %v1479_v3  ;;  %v610_v30 = vmul.f32 %v1323_v5, %v1323_v5 }
 0x144   :  { %v500_v46 = vadd.f32 %v499_v4, %v498_v17  ;;  %v697_v48 = vadd.f32 %v696_v45, %v695_v1  ;;  %v712_v17 = vsel %vm365_vm0, %v607_v47, 0.0  ;;  %v609_v1 = vmul.f32 %v1284_v21, %v1284_v21 }
 0x145   :  { %v714_v63 = vsel %vm365_vm0, %v608_v14, 0.0  ;;  %v617_v47 = vmul.f32 %v1161_v37, %v1161_v37 }
 0x146   :  { %v502_v51 = vadd.f32 %v501_v50, %v500_v46  ;;  %v699_v29 = vadd.f32 %v698_v13, %v697_v48  ;;  %v517_v46 = vsel %vm365_vm0, %v1284_v21, 0.0  ;;  %v716_v50 = vsel %vm365_vm0, %v609_v1, 0.0 }
 0x147   :  { %v521_v21 = vsel %vm365_vm0, %v1357_v54, 0.0 }
 0x148   :  { %v504_v34 = vadd.f32 %v503_v40, %v502_v51  ;;  %v701_v55 = vadd.f32 %v700_v52, %v699_v29  ;;  %v611_v51 = vmul.f32 %v1357_v54, %v1357_v54  ;;  %v718_v40 = vsel %vm365_vm0, %v610_v30, 0.0 }
 0x149   :  { %v614_v54 = vmul.f32 %v1086_v24, %v1086_v24 }
 0x14a   :  { %v703_v18 = vadd.f32 %v702_v59, %v701_v55  ;;  %v506_v61 = vadd.f32 %v505_v19, %v504_v34  ;;  %v1506_v45 = vpop.f32.mrf.mxu3  ;;  %v613_v59 = vmul.f32 %v1061_v20, %v1061_v20  ;;  %v720_v5 = vsel %vm365_vm0, %v611_v51, 0.0 }
 0x14b   :  { %429 = vst.msk [vmem:[%s1622_s4 + $0x1f8] sm:$0xff] %vm365_vm0, %v1506_v45  ;;  %v523_v19 = vsel %vm365_vm0, %v1391_v41, 0.0  ;;  %v615_v41 = vmul.f32 %v1111_v28, %v1111_v28  ;;  %v726_v32 = vsel %vm365_vm0, %v614_v54, 0.0  ;;  %v622_v51 = vmul.f32 %v1325_v6, %v1325_v6 }
 0x14c   :  { %v508_v38 = vadd.f32 %v507_v23, %v506_v61  ;;  %v705_v49 = vadd.f32 %v704_v58, %v703_v18  ;;  %v525_v61 = vsel %vm365_vm0, %v1061_v20, 0.0  ;;  %v722_v58 = vsel %vm365_vm0, %v612_v12, 0.0 }
 0x14d   :  { %v529_v20 = vsel %vm365_vm0, %v1111_v28, 0.0  ;;  %v533_v28 = vsel %vm365_vm0, %v1161_v37, 0.0  ;;  %v537_v37 = vsel %vm365_vm0, %v1220_v0, 0.0 }
 0x14e   :  { %v510_v22 = vadd.f32 %v509_v56, %v508_v38  ;;  %v707_v7 = vadd.f32 %v706_v27, %v705_v49  ;;  %v724_v38 = vsel %vm365_vm0, %v613_v59, 0.0  ;;  %v527_v49 = vsel %vm365_vm0, %v1086_v24, 0.0 }
 0x14f   :  { %v531_v24 = vsel %vm365_vm0, %v1136_v33, 0.0  ;;  %v624_v59 = vmul.f32 %v1393_v44, %v1393_v44 }
 0x150   :  { %v512_v57 = vadd.f32 %v511_v8, %v510_v22  ;;  %v709_v9 = vadd.f32 %v708_v10, %v707_v7  ;;  %v616_v22 = vmul.f32 %v1136_v33, %v1136_v33  ;;  %v728_v8 = vsel %vm365_vm0, %v615_v41, 0.0 }
 0x151   :  { %v535_v33 = vsel %vm365_vm0, %v1186_v43, 0.0  ;;  %v627_v41 = vmul.f32 %v1479_v3, %v1479_v3 }
 0x152   :  { %v514_v60 = vadd.f32 %v513_v36, %v512_v57  ;;  %v711_v26 = vadd.f32 %v710_v11, %v709_v9  ;;  %v730_v11 = vsel %vm365_vm0, %v616_v22, 0.0  ;;  %v618_v36 = vmul.f32 %v1186_v43, %v1186_v43 }
 0x153   :  { %v539_v43 = vsel %vm365_vm0, %v1253_v53, 0.0 }
 0x154   :  { %v516_v4 = vadd.f32 %v515_v42, %v514_v60  ;;  %v713_v31 = vadd.f32 %v712_v17, %v711_v26  ;;  %v732_v26 = vsel %vm365_vm0, %v617_v47, 0.0  ;;  %v619_v17 = vmul.f32 %v1220_v0, %v1220_v0 }
 0x155   :  { %v541_v0 = vsel %vm365_vm0, %v1286_v25, 0.0 }
 0x156   :  { %v715_v48 = vadd.f32 %v714_v63, %v713_v31  ;;  %v518_v13 = vadd.f32 %v517_v46, %v516_v4  ;;  %v734_v4 = vsel %vm365_vm0, %v618_v36, 0.0  ;;  %v620_v31 = vmul.f32 %v1253_v53, %v1253_v53 }
 0x157   :  { %v736_v30 = vsel %vm365_vm0, %v619_v17, 0.0  ;;  %v543_v53 = vsel %vm365_vm0, %v1325_v6, 0.0  ;;  %v547_v6 = vsel %vm365_vm0, %v1393_v44, 0.0  ;;  %v551_v44 = vsel %vm365_vm0, %v1452_v35, 0.0 }
 0x158   :  { %v717_v29 = vadd.f32 %v716_v50, %v715_v48  ;;  %v520_v52 = vadd.f32 %v519_v16, %v518_v13  ;;  %v621_v48 = vmul.f32 %v1286_v25, %v1286_v25  ;;  %v738_v16 = vsel %vm365_vm0, %v620_v31, 0.0 }
 0x159   :  { %v545_v25 = vsel %vm365_vm0, %v1359_v39, 0.0 }
 0x15a   :  { %v719_v34 = vadd.f32 %v718_v40, %v717_v29  ;;  %v522_v55 = vadd.f32 %v521_v21, %v520_v52  ;;  %v740_v40 = vsel %vm365_vm0, %v621_v48, 0.0  ;;  %v623_v21 = vmul.f32 %v1359_v39, %v1359_v39 }
 0x15b   :  { %v549_v39 = vsel %vm365_vm0, %v1425_v2, 0.0 }
 0x15c   :  { %v721_v15 = vadd.f32 %v720_v5, %v719_v34  ;;  %v524_v18 = vadd.f32 %v523_v19, %v522_v55  ;;  %v742_v55 = vsel %vm365_vm0, %v622_v51, 0.0 }
 0x15e   :  { %v526_v23 = vadd.f32 %v525_v61, %v524_v18  ;;  %v723_v62 = vadd.f32 %v722_v58, %v721_v15  ;;  %v744_v15 = vsel %vm365_vm0, %v623_v21, 0.0  ;;  %v625_v18 = vmul.f32 %v1425_v2, %v1425_v2 }
 0x15f   :  { %v746_v58 = vsel %vm365_vm0, %v624_v59, 0.0  ;;  %v553_v2 = vsel %vm365_vm0, %v1479_v3, 0.0 }
 0x160   :  { %v528_v27 = vadd.f32 %v527_v49, %v526_v23  ;;  %v725_v56 = vadd.f32 %v724_v38, %v723_v62  ;;  %v626_v23 = vmul.f32 %v1452_v35, %v1452_v35  ;;  %v748_v49 = vsel %vm365_vm0, %v625_v18, 0.0 }
 0x161   :  { %v555_v35 = vsel %vm365_vm0, %v1506_v45, 0.0 }
 0x162   :  { %v530_v7 = vadd.f32 %v529_v20, %v528_v27  ;;  %v727_v10 = vadd.f32 %v726_v32, %v725_v56  ;;  %v750_v32 = vsel %vm365_vm0, %v626_v23, 0.0  ;;  %v628_v20 = vmul.f32 %v1506_v45, %v1506_v45 }
 0x164   :  { %v532_v57 = vadd.f32 %v531_v24, %v530_v7  ;;  %v729_v9 = vadd.f32 %v728_v8, %v727_v10  ;;  %v752_v10 = vsel %vm365_vm0, %v627_v41, 0.0  ;;  %v754_v47 = vsel %vm365_vm0, %v628_v20, 0.0 }
 0x166   :  { %v534_v14 = vadd.f32 %v533_v28, %v532_v57  ;;  %v731_v60 = vadd.f32 %v730_v11, %v729_v9 }
 0x168   :  { %v536_v42 = vadd.f32 %v535_v33, %v534_v14  ;;  %v733_v1 = vadd.f32 %v732_v26, %v731_v60 }
 0x16a   :  { %v735_v63 = vadd.f32 %v734_v4, %v733_v1  ;;  %v538_v46 = vadd.f32 %v537_v37, %v536_v42 }
 0x16c   :  { %v540_v13 = vadd.f32 %v539_v43, %v538_v46  ;;  %v737_v50 = vadd.f32 %v736_v30, %v735_v63 }
 0x16e   :  { %v542_v29 = vadd.f32 %v541_v0, %v540_v13  ;;  %v739_v52 = vadd.f32 %v738_v16, %v737_v50 }
 0x170   :  { %v544_v12 = vadd.f32 %v543_v53, %v542_v29  ;;  %v741_v34 = vadd.f32 %v740_v40, %v739_v52 }
 0x172   :  { %v546_v5 = vadd.f32 %v545_v25, %v544_v12  ;;  %v743_v19 = vadd.f32 %v742_v55, %v741_v34 }
 0x174   :  { %v548_v61 = vadd.f32 %v547_v6, %v546_v5  ;;  %v745_v54 = vadd.f32 %v744_v15, %v743_v19 }
 0x176   :  { %v747_v62 = vadd.f32 %v746_v58, %v745_v54  ;;  %v550_v38 = vadd.f32 %v549_v39, %v548_v61 }
 0x178   :  { %v749_v27 = vadd.f32 %v748_v49, %v747_v62  ;;  %v552_v56 = vadd.f32 %v551_v44, %v550_v38 }
 0x17a   :  { %v751_v22 = vadd.f32 %v750_v32, %v749_v27  ;;  %v554_v7 = vadd.f32 %v553_v2, %v552_v56 }
 0x17c   :  { %v753_v8 = vadd.f32 %v752_v10, %v751_v22  ;;  %v556_v24 = vadd.f32 %v555_v35, %v554_v7 }
 0x17e   :  { %v557_v57 = vrot.slane %v556_v24, 4  ;;  %v755_v9 = vadd.f32 %v754_v47, %v753_v8 }
 0x180   :  { %v558_v11 = vadd.f32 %v557_v57, %v556_v24  ;;  %v756_v28 = vrot.slane %v755_v9, 4 }
 0x182   :  { %v559_v36 = vrot.slane %v558_v11, 2  ;;  %v757_v3 = vadd.f32 %v756_v28, %v755_v9 }
 0x184   :  { %v560_v14 = vadd.f32 %v559_v36, %v558_v11  ;;  %v758_v60 = vrot.slane %v757_v3, 2 }
 0x186   :  { %v561_v26 = vrot.slane %v560_v14, 1  ;;  %v759_v33 = vadd.f32 %v758_v60, %v757_v3 }
 0x188   :  { %v562_v17 = vadd.f32 %v561_v26, %v560_v14  ;;  %v760_v42 = vrot.slane %v759_v33, 1 }
 0x18a   :  { %564 = vst.msk [vmem:[%s1623_s5] sm:$0x1] %vm563_vm1, %v562_v17  ;;  %v761_v45 = vadd.f32 %v760_v42, %v759_v33 }
 0x18c   :  { %762 = vst.msk [vmem:[%s1624_s6] sm:$0x1] %vm563_vm1, %v761_v45 }
 0x18d   :  { %775 = vsyncpa [#allocation3], 1 }

// kernel: bottleneck_forward.6
= control target key start
LH: loop header
LB: loop body
LE: loop exit
PB: predicated region body
PF: predicated region fallthrough
CT: control target
= control target key end

     0   :  { %s1546_s27 = smov 0   ;;  %s1548_s28 = smov 0   ;;  %s1770_s0 = inlined_call_operand.vmem [shape: f32[2,16,16,32], index: 0, kind: input, shape index: {}, may-alias: {0,1,2}]   ;;  %s1771_s1 = inlined_call_operand.vmem [shape: f32[2,16,16,32], index: 1, kind: input, shape index: {}, may-alias: {0,1,2}]   ;;  %s1772_s2 = inlined_call_operand.vmem [shape: f32[2,16,16,32], index: 2, kind: input, shape index: {}, may-alias: {0,1,2}]   ;;  %s1773_s3 = inlined_call_operand.vmem [shape: bf16[9,32,32], index: 3, kind: input, shape index: {}]   ;;  %s1774_s4 = inlined_call_operand.vmem [shape: f32[1,32], index: 4, kind: input, shape index: {}]   ;;  %s1775_s5 = inlined_call_operand.vmem [shape: f32[1,32], index: 5, kind: input, shape index: {}]   ;;  %s1776_s6 = inlined_call_operand.vmem [shape: f32[128,32], index: 6, kind: output, shape index: {0}]   ;;  %s1777_s7 = inlined_call_operand.vmem [shape: f32[16,1,32], index: 7, kind: output, shape index: {1}]   ;;  %s1778_s8 = inlined_call_operand.vmem [shape: f32[16,1,32], index: 8, kind: output, shape index: {2}]  }
   0x1   :  { %1779 = sst [smem:[#allocation3_spill]] %s1770_s0  ;;  %s1550_s29 = smov 0  }
   0x2   :  { %s1552_s30 = smov 0   ;;  %s1554_s9 = smov 0  }
   0x3 LB: > { %s28_s10 = sadd.s32 1, %s1490_s29  ;;  %s31_s11 = sadd.s32 1, %s1494_s30  ;;  %s1498_s9 = sphi %s1554_s9, %s19_s9   ;;  %s1494_s30 = sphi %s1552_s30, %s1788_s30   ;;  %s1490_s29 = sphi %s1550_s29, %s1787_s29   ;;  %s1486_s28 = sphi %s1548_s28, %s1786_s28   ;;  %s1482_s27 = sphi %s1546_s27, %s1785_s27  }
   0x4   : > { %p29_p0 = scmp.ge.s32.totalorder %s28_s10, 8  ;;  %p1226_p1 = scmp.ge.s32.totalorder %s1498_s9, 1 }
   0x5   : > { %p397_p2 = scmp.lt.s32.totalorder %s1498_s9, 17 }
   0x6   : > { %s1790_s10 = smov (%p29_p0, %s28_s10), 0  ;;  %s1792_s11 = smov (!%p29_p0, %s31_s11), %s1494_s30 }
   0x7   : > { %p398_p3 = pnand %p1226_p1, %p397_p2  ;;  %p33_p4 = scmp.ge.s32.totalorder %s1792_s11, 2 }
   0x8   : > { %s1590_s18 = sshll.u32 (!%p398_p3), %s1482_s27, 1  ;;  %p487_p5 = scmp.lt.s32.totalorder (!%p398_p3), %s1486_s28, 1 }
   0x9   : > { %s1794_s11 = smov (%p33_p4, %s1792_s11), 0  ;;  %401 = sbr.rel (%p398_p3) target bundleno = 226 (0xe2), region = 44 }
   0xa   : > { %s482_s21 = sadd.s32 (!%p398_p3), 4294967295, %s1590_s18  ;;  %p503_p10 = scmp.lt.s32.totalorder (!%p398_p3), %s1590_s18, 15 }
   0xb   : > { %p483_p6 = scmp.lt.s32.totalorder (!%p398_p3), %s482_s21, 15  ;;  %p1228_p7 = scmp.gt.s32.totalorder (!%p398_p3), %s482_s21, 0 }
   0xc   : > { %p572_p8 = scmp.ge.s32.totalorder (!%p398_p3), %s482_s21, 0  ;;  %p573_p9 = scmp.le.s32.totalorder (!%p398_p3), %s482_s21, 15 }
   0xd   : > { %p1237_p12 = scmp.gt.s32.totalorder (!%p398_p3), %s1590_s18, 0  ;;  %p706_p0 = scmp.ge.s32.totalorder (!%p398_p3), %s1590_s18, 0 }
   0xe   : > { %v1398_v0 = vld [vmem:[%s1773_s3 + $0x18] sm:$0xff]  ;;  %v1396_v1 = vld [vmem:[%s1773_s3 + $0x8] sm:$0xff]  ;;  %vm565_vm0 = vcmask 261120   ;;  %v1397_v3 = vld [vmem:[%s1773_s3 + $0x10] sm:$0xff]  ;;  %vm568_vm1 = vcmask 254976   ;;  %v1500_v5 = vmov 0.0   ;;  %p1622_p13 = pnand %p573_p9, %p572_p8 }
   0xf   : > { %v1400_v2 = vld [vmem:[%s1773_s3 + $0x28] sm:$0xff]  ;;  %634 = vmatpush.bf16.msra.mxu0 %v1398_v0  ;;  %662 = vmatpush.bf16.msra.mxu1 %v1396_v1  ;;  %v1395_v4 = vld [vmem:[%s1773_s3] sm:$0xff]  ;;  %566 = vst.msk [vmem:[#allocation2] sm:$0xff] %vm565_vm0, %v1500_v5  ;;  %s488_s26 = scalar_select %p487_p5, %s1486_s28, 1  ;;  %v1402_v8 = vld [vmem:[%s1773_s3 + $0x38] sm:$0xff]  ;;  %vm985_vm5 = vcmask 253952  }
  0x10   : > { %698 = vmatpush.bf16.msra.mxu2 %v1400_v2  ;;  %v1399_v6 = vld [vmem:[%s1773_s3 + $0x20] sm:$0xff]  ;;  %567 = vst.msk [vmem:[#allocation2 + $0x8] sm:$0xff] %vm565_vm0, %v1500_v5  ;;  %s484_s12 = scalar_select %p483_p6, %s482_s21, 15  ;;  %v1404_v7 = vld [vmem:[%s1773_s3 + $0x48] sm:$0xff]  ;;  %761 = vmatpush.bf16.msra.mxu3 %v1402_v8  ;;  %v1401_v10 = vld [vmem:[%s1773_s3 + $0x30] sm:$0xff] }
  0x11   : > { %569 = vst.msk [vmem:[#allocation2 + $0x10] sm:$0x3] %vm568_vm1, %v1500_v5  ;;  %s1608_s13 = sshll.u32 %s488_s26, 5  ;;  %v1408_v9 = vld [vmem:[%s1773_s3 + $0x68] sm:$0xff]  ;;  %p707_p1 = scmp.le.s32.totalorder %s1590_s18, 15  ;;  %v1403_v13 = vld [vmem:[%s1773_s3 + $0x40] sm:$0xff] }
  0x12   : > { %s1796_s12 = smov (!%p1228_p7, %s484_s12), 0  ;;  %v1454_v11 = vld [vmem:[%s1774_s4] ss:$0 sm:$0xff]  ;;  %s1638_s16 = sadd.s32 1, %s1590_s18  ;;  %v1410_v14 = vld [vmem:[%s1773_s3 + $0x78] sm:$0xff]  ;;  %v1405_v22 = vld [vmem:[%s1773_s3 + $0x50] sm:$0xff] }
  0x13   : > { %635 = vmatpush.bf16.msra.mxu0 %v1397_v3  ;;  %663 = vmatpush.bf16.msra.mxu1 %v1395_v4  ;;  %p489_p11 = scmp.lt.s32.totalorder %s1796_s12, 15  ;;  %v1455_v12 = vld [vmem:[%s1775_s5] ss:$0 sm:$0xff]  ;;  %p1645_p2 = pnand %p707_p1, %p706_p0  ;;  %v1406_v15 = vld [vmem:[%s1773_s3 + $0x58] sm:$0xff]  ;;  %v1409_v29 = vld [vmem:[%s1773_s3 + $0x70] sm:$0xff] }
  0x14   : > { %699 = vmatpush.bf16.msra.mxu2 %v1399_v6  ;;  %s1259_s25 = scalar_select %p1622_p13, 0, 1  ;;  %762 = vmatpush.bf16.msra.mxu3 %v1401_v10  ;;  %v1407_v18 = vld [vmem:[%s1773_s3 + $0x60] sm:$0xff]  ;;  %v1412_v40 = vld [vmem:[%s1773_s3 + $0x88] sm:$0xff] }
  0x15   : > { %s1798_s12 = smov (!%p489_p11, %s1796_s12), 15  ;;  %s1782_s0 = sld [smem:[#allocation3_spill]]  ;;  %v1456_v30 = vld [vmem:[%s1774_s4] ss:$0 sm:$0xff] }
  0x16   : > { %s1233_s26 = sshll.u32 %s1798_s12, 1  ;;  %p523_p3 = scmp.lt.s32.totalorder %s1638_s16, 15  ;;  %v593_v21 = vstv %s1259_s25  ;;  %v1457_v31 = vld [vmem:[%s1775_s5] ss:$0 sm:$0xff] }
  0x17   : > { %797 = vmatpush.bf16.msrb.mxu0 %v1404_v7  ;;  %s493_s21 = sadd.s32 %s1608_s13, %s1233_s26  ;;  %833 = vmatpush.bf16.msrb.mxu1 %v1406_v15  ;;  %vm594_vm2 = vcmp.eq.s32.totalorder %v593_v21, 1  ;;  %p1246_p5 = scmp.gt.s32.totalorder %s1638_s16, 0  ;;  %v1458_v39 = vld [vmem:[%s1774_s4] ss:$0 sm:$0xff] }
  0x18   : > { %897 = vmatpush.bf16.msrb.mxu2 %v1408_v9  ;;  %s1235_s17 = sshll.u32 %s493_s21, 3  ;;  %933 = vmatpush.bf16.msrb.mxu3 %v1410_v14  ;;  %p842_p6 = scmp.ge.s32.totalorder %s1638_s16, 0  ;;  %v1459_v49 = vld [vmem:[%s1775_s5] ss:$0 sm:$0xff] }
  0x19   : > { %s504_s22 = scalar_select %p503_p10, %s1590_s18, 15  ;;  %v1411_v57 = vld [vmem:[%s1773_s3 + $0x80] sm:$0xff] }
  0x1a   : > { %s524_s21 = scalar_select %p523_p3, %s1638_s16, 15 }
  0x1b   : > { %s495_s24 = scalar_lea.vmem %s1782_s0, %s1235_s17  ;;  %798 = vmatpush.bf16.msrb.mxu0 %v1403_v13  ;;  %s1800_s22 = smov (!%p1237_p12, %s504_s22), 0  ;;  %834 = vmatpush.bf16.msrb.mxu1 %v1405_v22 }
  0x1c   : > { %v576_v16 = vld [vmem:[%s495_s24] sm:$0xff]  ;;  %v577_v17 = vld [vmem:[%s495_s24 + $0x8] sm:$0xff]  ;;  %898 = vmatpush.bf16.msrb.mxu2 %v1407_v18  ;;  %p509_p4 = scmp.lt.s32.totalorder %s1800_s22, 15  ;;  %p843_p7 = scmp.le.s32.totalorder %s1638_s16, 15  ;;  %934 = vmatpush.bf16.msrb.mxu3 %v1409_v29 }
  0x1d   : > { %v582_v19 = vmul.f32 %v1454_v11, %v576_v16  ;;  %v583_v20 = vmul.f32 %v1454_v11, %v577_v17  ;;  %s1804_s21 = smov (!%p1246_p5, %s524_s21), 0 }
  0x1e   : > { %s1802_s22 = smov (!%p509_p4, %s1800_s22), 15  ;;  %p1682_p8 = pnand %p843_p7, %p842_p6 }
  0x1f   : > { %v588_v23 = vadd.f32 %v1455_v12, %v582_v19  ;;  %v589_v24 = vadd.f32 %v1455_v12, %v583_v20  ;;  %s1242_s18 = sshll.u32 %s1802_s22, 1  ;;  %p529_p9 = scmp.lt.s32.totalorder %s1804_s21, 15 }
  0x20   : > { %s513_s16 = sadd.s32 %s1242_s18, %s1608_s13 }
  0x21   : > { %v590_v25 = vmax.f32 %v588_v23, 0.0  ;;  %v591_v26 = vmax.f32 %v589_v24, 0.0  ;;  %s1244_s23 = sshll.u32 %s513_s16, 3  ;;  %s1806_s21 = smov (!%p529_p9, %s1804_s21), 15 }
  0x22   : > { %s515_s14 = scalar_lea.vmem %s1771_s1, %s1244_s23  ;;  %s1251_s19 = sshll.u32 %s1806_s21, 1 }
  0x23   : > { %v595_v27 = vsel %vm594_vm2, %v590_v25, 0.0  ;;  %v596_v28 = vsel %vm594_vm2, %v591_v26, 0.0  ;;  %v710_v32 = vld [vmem:[%s515_s14] sm:$0xff]  ;;  %v711_v33 = vld [vmem:[%s515_s14 + $0x8] sm:$0xff]  ;;  %s1784_s18 = scalar_select %p1645_p2, 0, 1 }
  0x24   : > { %597 = vst.msk [vmem:[#allocation2 + $0x1] sm:$0xff] %vm565_vm0, %v595_v27  ;;  %v716_v35 = vmul.f32 %v1456_v30, %v710_v32  ;;  %v717_v36 = vmul.f32 %v1456_v30, %v711_v33  ;;  %s1335_s15 = scalar_select %p1682_p8, 0, 1 }
  0x25   : > { %598 = vst.msk [vmem:[#allocation2 + $0x9] sm:$0xff] %vm565_vm0, %v596_v28  ;;  %v727_v34 = vstv %s1784_s18  ;;  %s533_s16 = sadd.s32 %s1251_s19, %s1608_s13  ;;  %s1254_s18 = sshll.u32 %s1486_s28, 3 }
  0x26   : > { %v722_v37 = vadd.f32 %v1457_v31, %v716_v35  ;;  %v723_v38 = vadd.f32 %v1457_v31, %v717_v36  ;;  %vm728_vm3 = vcmp.eq.s32.totalorder %v727_v34, 1  ;;  %s1253_s12 = sshll.u32 %s533_s16, 3  ;;  %v863_v56 = vstv %s1335_s15  ;;  %s543_s15 = sadd.s32 %s1482_s27, %s1254_s18 }
  0x27   : > { %s535_s13 = scalar_lea.vmem %s1772_s2, %s1253_s12  ;;  %vm864_vm4 = vcmp.eq.s32.totalorder %v863_v56, 1  ;;  %p544_p10 = scmp.lt.s32.totalorder %s543_s15, 15 }
  0x28   : > { %v724_v47 = vmax.f32 %v722_v37, 0.0  ;;  %v725_v48 = vmax.f32 %v723_v38, 0.0  ;;  %v846_v51 = vld [vmem:[%s535_s13] sm:$0xff]  ;;  %v847_v52 = vld [vmem:[%s535_s13 + $0x8] sm:$0xff] }
  0x29   : > { %v852_v54 = vmul.f32 %v1458_v39, %v846_v51  ;;  %v853_v55 = vmul.f32 %v1458_v39, %v847_v52  ;;  %s1808_s15 = smov (!%p544_p10, %s543_s15), 15 }
  0x2a   : > { %v729_v50 = vsel %vm728_vm3, %v724_v47, 0.0  ;;  %v730_v53 = vsel %vm728_vm3, %v725_v48, 0.0  ;;  %s1255_s19 = sshll.u32 %s1808_s15, 3  ;;  %s554_s0 = scalar_lea.vmem %s1777_s7, %s1808_s15 }
  0x2b   : > { %v858_v58 = vadd.f32 %v1459_v49, %v852_v54  ;;  %v859_v59 = vadd.f32 %v1459_v49, %v853_v55  ;;  %s547_s27 = scalar_lea.vmem %s1776_s6, %s1255_s19  ;;  %s561_s21 = scalar_lea.vmem %s1778_s8, %s1808_s15 }
  0x2c   : > { %v606_v41 = vld [vmem:[#allocation2 + $0x1] ss:$2 sm:$0xff]  ;;  %v599_v42 = vld [vmem:[#allocation2] ss:$2 sm:$0xff] }
  0x2d   : > { %v670_v43 = vld [vmem:[#allocation2 + $0x2] ss:$2 sm:$0xff]  ;;  %v607_v44 = vpack.c.bf16 %v606_v41, %v606_v41  ;;  %v600_v45 = vpack.c.bf16 %v599_v42, %v599_v42  ;;  %v860_v60 = vmax.f32 %v858_v58, 0.0  ;;  %v861_v61 = vmax.f32 %v859_v59, 0.0 }
  0x2e   : > { %v671_v46 = vpack.c.bf16 %v670_v43, %v670_v43  ;;  %731 = vst.msk [vmem:[#allocation2 + $0x1] sm:$0xff] %vm565_vm0, %v729_v50 }
  0x2f   : > { %1272 = vmatmul.msk.bf16.vlgmr.msra.gmra.mxu0 %vm565_vm0, %v607_v44  ;;  %1281 = vmatmul.msk.bf16.vlgmr.msra.gmra.mxu1 %vm565_vm0, %v600_v45  ;;  %732 = vst.msk [vmem:[#allocation2 + $0x9] sm:$0xff] %vm565_vm0, %v730_v53  ;;  %v865_v62 = vsel %vm864_vm4, %v860_v60, 0.0  ;;  %v866_v63 = vsel %vm864_vm4, %v861_v61, 0.0 }
  0x30   : > { %1294 = vmatmul.msk.bf16.vlgmr.msra.gmra.mxu2 %vm565_vm0, %v671_v46  ;;  %969 = vmatpush.bf16.msra.mxu0 %v1412_v40 }
  0x34   : > { %970 = vmatpush.bf16.msra.mxu0 %v1411_v57 }
  0x36   : > { %v733_v0 = vld [vmem:[#allocation2] ss:$2 sm:$0xff]  ;;  %v769_v1 = vld [vmem:[#allocation2 + $0x1] ss:$2 sm:$0xff] }
  0x37   : > { %v805_v2 = vld [vmem:[#allocation2 + $0x2] ss:$2 sm:$0xff]  ;;  %v734_v3 = vpack.c.bf16 %v733_v0, %v733_v0  ;;  %v770_v4 = vpack.c.bf16 %v769_v1, %v769_v1 }
  0x38   : > { %867 = vst.msk [vmem:[#allocation2 + $0x1] sm:$0xff] %vm565_vm0, %v865_v62  ;;  %v806_v5 = vpack.c.bf16 %v805_v2, %v805_v2 }
  0x39   : > { %868 = vst.msk [vmem:[#allocation2 + $0x9] sm:$0xff] %vm565_vm0, %v866_v63  ;;  %1308 = vmatmul.msk.bf16.vlgmr.msra.gmra.mxu3 %vm565_vm0, %v734_v3 }
  0x3f   : > { %1321 = vmatmul.msk.bf16.vlgmr.msrb.gmra.mxu0 %vm565_vm0, %v770_v4  ;;  %1334 = vmatmul.msk.bf16.vlgmr.msrb.gmra.mxu1 %vm565_vm0, %v806_v5 }
  0x40   : > { %v869_v6 = vld [vmem:[#allocation2] ss:$2 sm:$0xff]  ;;  %v905_v8 = vld [vmem:[#allocation2 + $0x1] ss:$2 sm:$0xff] }
  0x41   : > { %v870_v7 = vpack.c.bf16 %v869_v6, %v869_v6  ;;  %v906_v9 = vpack.c.bf16 %v905_v8, %v905_v8  ;;  %v941_v10 = vld [vmem:[#allocation2 + $0x2] ss:$2 sm:$0xff] }
  0x42   : > { %v942_v11 = vpack.c.bf16 %v941_v10, %v941_v10 }
  0x43   : > { %1348 = vmatmul.msk.bf16.vlgmr.msrb.gmra.mxu2 %vm565_vm0, %v870_v7 }
  0x49   : > { %1361 = vmatmul.msk.bf16.vlgmr.msrb.gmra.mxu3 %vm565_vm0, %v906_v9 }
  0x4f   : > { %1374 = vmatmul.msk.bf16.vlgmr.msra.gmra.mxu0 %vm565_vm0, %v942_v11 }
  0xac   : > { %v637_v12 = vpop.f32.mrf.mxu0  ;;  %v665_v13 = vpop.f32.mrf.mxu1 }
  0xad   : > { %v666_v21 = vadd.f32 %v665_v13, %v637_v12 }
  0xb3   : > { %v701_v14 = vpop.f32.mrf.mxu2 }
  0xb4   : > { %v639_v15 = vpop.f32.mrf.mxu0  ;;  %v667_v16 = vpop.f32.mrf.mxu1  ;;  %v705_v22 = vadd.f32 %v701_v14, %v666_v21 }
  0xbb   : > { %v703_v17 = vpop.f32.mrf.mxu2 }
  0xbc   : > { %v800_v18 = vpop.f32.mrf.mxu0  ;;  %v836_v19 = vpop.f32.mrf.mxu1 }
  0xbd   : > { %v764_v20 = vpop.f32.mrf.mxu3 }
  0xbe   : > { %v768_v23 = vadd.f32 %v764_v20, %v705_v22 }
  0xc0   : > { %v804_v27 = vadd.f32 %v800_v18, %v768_v23 }
  0xc2   : > { %v840_v29 = vadd.f32 %v836_v19, %v804_v27 }
  0xc4   : > { %v802_v24 = vpop.f32.mrf.mxu0  ;;  %v838_v25 = vpop.f32.mrf.mxu1 }
  0xc5   : > { %v766_v26 = vpop.f32.mrf.mxu3 }
  0xc6   : > { %v900_v28 = vpop.f32.mrf.mxu2 }
  0xc7   : > { %v904_v31 = vadd.f32 %v900_v28, %v840_v29 }
  0xcc   : > { %v972_v30 = vpop.f32.mrf.mxu0 }
  0xcd   : > { %v936_v32 = vpop.f32.mrf.mxu3 }
  0xce   : > { %v902_v33 = vpop.f32.mrf.mxu2  ;;  %v940_v34 = vadd.f32 %v936_v32, %v904_v31 }
  0xd0   : > { %v976_v35 = vadd.f32 %v972_v30, %v940_v34 }
  0xd2   : > { %977 = vst.msk [vmem:[%s547_s27] sm:$0xff] %vm565_vm0, %v976_v35  ;;  %v978_v36 = vsel %vm565_vm0, %v976_v35, 0.0  ;;  %v987_v37 = vmul.f32 %v976_v35, %v976_v35 }
  0xd3   : > { %v979_v38 = vrot.slane %v978_v36, 4 }
  0xd4   : > { %v974_v39 = vpop.f32.mrf.mxu0  ;;  %v988_v40 = vsel %vm565_vm0, %v987_v37, 0.0 }
  0xd5   : > { %v980_v41 = vadd.f32 %v979_v38, %v978_v36  ;;  %v989_v42 = vrot.slane %v988_v40, 4  ;;  %v938_v43 = vpop.f32.mrf.mxu3 }
  0xd7   : > { %v981_v44 = vrot.slane %v980_v41, 2  ;;  %v990_v45 = vadd.f32 %v989_v42, %v988_v40 }
  0xd9   : > { %v982_v46 = vadd.f32 %v981_v44, %v980_v41  ;;  %v991_v47 = vrot.slane %v990_v45, 2 }
  0xdb   : > { %v983_v48 = vrot.slane %v982_v46, 1  ;;  %v992_v49 = vadd.f32 %v991_v47, %v990_v45 }
  0xdd   : > { %v984_v50 = vadd.f32 %v983_v48, %v982_v46  ;;  %v993_v51 = vrot.slane %v992_v49, 1 }
  0xdf   : > { %986 = vst.msk [vmem:[%s554_s0] sm:$0x1] %vm985_vm5, %v984_v50  ;;  %v994_v52 = vadd.f32 %v993_v51, %v992_v49 }
  0xe1   : > { %995 = vst.msk [vmem:[%s561_s21] sm:$0x1] %vm985_vm5, %v994_v52 }
  0xe2 PF: > { %s19_s9 = sadd.s32 1, %s1498_s9   ;;  %s1785_s27 = smov %s1490_s29 }
  0xe3   : > { %p16_p11 = scmp.ge.s32.totalorder %s19_s9, 18   ;;  %s1786_s28 = smov %s1494_s30 }
  0xe4   : > { %s1787_s29 = smov %s1790_s10  ;;  %s1788_s30 = smov %s1794_s11 }
  0xe5   :  { %18 = sbr.rel (!%p16_p11) target bundleno = 3 (0x3), region = 114 }

// kernel: bottleneck_forward.8
= control target key start
LH: loop header
LB: loop body
LE: loop exit
PB: predicated region body
PF: predicated region fallthrough
CT: control target
= control target key end

     0   :  { %s470_s1 = inlined_call_operand.vmem [shape: f32[1,128], index: 1, kind: input, shape index: {}]   ;;  %s471_s2 = inlined_call_operand.vmem [shape: f32[1,128], index: 2, kind: input, shape index: {}]   ;;  %s472_s3 = inlined_call_operand.vmem [shape: bf16[128,128], index: 3, kind: input, shape index: {}]   ;;  %s473_s0 = inlined_call_operand.vmem [shape: f32[128,128], index: 0, kind: input, shape index: {}]   ;;  %s474_s4 = inlined_call_operand.vmem [shape: f32[128,128], index: 4, kind: output, shape index: {0}]   ;;  %s475_s5 = inlined_call_operand.vmem [shape: f32[1,1,128], index: 5, kind: output, shape index: {1}]   ;;  %s476_s6 = inlined_call_operand.vmem [shape: f32[1,1,128], index: 6, kind: output, shape index: {2}]  }
   0x1   :  { %v284_v0 = vld [vmem:[%s472_s3 + $0x38] sm:$0xff]  ;;  %v283_v1 = vld [vmem:[%s472_s3 + $0x30] sm:$0xff]  ;;  %v282_v2 = vld [vmem:[%s472_s3 + $0x28] sm:$0xff] }
   0x2   :  { %108 = vmatpush.bf16.msra.mxu0 %v284_v0  ;;  %285 = vmatpush.bf16.msra.mxu1 %v284_v0  ;;  %v281_v3 = vld [vmem:[%s472_s3 + $0x20] sm:$0xff]  ;;  %v280_v4 = vld [vmem:[%s472_s3 + $0x18] sm:$0xff]  ;;  %v279_v5 = vld [vmem:[%s472_s3 + $0x10] sm:$0xff] }
   0x3   :  { %286 = vmatpush.bf16.msra.mxu2 %v284_v0  ;;  %287 = vmatpush.bf16.msra.mxu3 %v284_v0  ;;  %v278_v6 = vld [vmem:[%s472_s3 + $0x8] sm:$0xff]  ;;  %v277_v7 = vld [vmem:[%s472_s3] sm:$0xff]  ;;  %v22_v20 = vld [vmem:[%s473_s0 + $0x10] sm:$0xff] }
   0x4   :  { %v20_v8 = vld [vmem:[%s473_s0] sm:$0xff]  ;;  %v21_v9 = vld [vmem:[%s473_s0 + $0x8] sm:$0xff]  ;;  %v23_v21 = vld [vmem:[%s473_s0 + $0x18] sm:$0xff] }
   0x5   :  { %v24_v10 = vld [vmem:[%s473_s0 + $0x20] sm:$0xff]  ;;  %v25_v11 = vld [vmem:[%s473_s0 + $0x28] sm:$0xff]  ;;  %v36_v16 = vpack.c.bf16 %v21_v9, %v20_v8  ;;  %v26_v22 = vld [vmem:[%s473_s0 + $0x30] sm:$0xff]  ;;  %v37_v28 = vpack.c.bf16 %v23_v21, %v22_v20 }
   0x6   :  { %109 = vmatpush.bf16.msra.mxu0 %v283_v1  ;;  %288 = vmatpush.bf16.msra.mxu1 %v283_v1  ;;  %v28_v12 = vld [vmem:[%s473_s0 + $0x40] sm:$0xff]  ;;  %v29_v13 = vld [vmem:[%s473_s0 + $0x48] sm:$0xff]  ;;  %v38_v17 = vpack.c.bf16 %v25_v11, %v24_v10  ;;  %v27_v23 = vld [vmem:[%s473_s0 + $0x38] sm:$0xff] }
   0x7   :  { %289 = vmatpush.bf16.msra.mxu2 %v283_v1  ;;  %290 = vmatpush.bf16.msra.mxu3 %v283_v1  ;;  %v32_v14 = vld [vmem:[%s473_s0 + $0x60] sm:$0xff]  ;;  %v33_v15 = vld [vmem:[%s473_s0 + $0x68] sm:$0xff]  ;;  %v40_v18 = vpack.c.bf16 %v29_v13, %v28_v12  ;;  %v30_v24 = vld [vmem:[%s473_s0 + $0x50] sm:$0xff]  ;;  %v39_v29 = vpack.c.bf16 %v27_v23, %v26_v22 }
   0x8   :  { %v42_v19 = vpack.c.bf16 %v33_v15, %v32_v14  ;;  %v31_v25 = vld [vmem:[%s473_s0 + $0x58] sm:$0xff]  ;;  %v34_v26 = vld [vmem:[%s473_s0 + $0x70] sm:$0xff] }
   0x9   :  { %v35_v27 = vld [vmem:[%s473_s0 + $0x78] sm:$0xff]  ;;  %v41_v30 = vpack.c.bf16 %v31_v25, %v30_v24 }
   0xa   :  { %110 = vmatpush.bf16.msra.mxu0 %v282_v2  ;;  %291 = vmatpush.bf16.msra.mxu1 %v282_v2  ;;  %v43_v31 = vpack.c.bf16 %v35_v27, %v34_v26 }
   0xb   :  { %292 = vmatpush.bf16.msra.mxu2 %v282_v2  ;;  %293 = vmatpush.bf16.msra.mxu3 %v282_v2 }
   0xe   :  { %111 = vmatpush.bf16.msra.mxu0 %v281_v3  ;;  %294 = vmatpush.bf16.msra.mxu1 %v281_v3 }
   0xf   :  { %295 = vmatpush.bf16.msra.mxu2 %v281_v3  ;;  %296 = vmatpush.bf16.msra.mxu3 %v281_v3 }
  0x12   :  { %112 = vmatpush.bf16.msra.mxu0 %v280_v4  ;;  %297 = vmatpush.bf16.msra.mxu1 %v280_v4 }
  0x13   :  { %298 = vmatpush.bf16.msra.mxu2 %v280_v4  ;;  %299 = vmatpush.bf16.msra.mxu3 %v280_v4 }
  0x16   :  { %113 = vmatpush.bf16.msra.mxu0 %v279_v5  ;;  %300 = vmatpush.bf16.msra.mxu1 %v279_v5 }
  0x17   :  { %301 = vmatpush.bf16.msra.mxu2 %v279_v5  ;;  %302 = vmatpush.bf16.msra.mxu3 %v279_v5 }
  0x1a   :  { %114 = vmatpush.bf16.msra.mxu0 %v278_v6  ;;  %303 = vmatpush.bf16.msra.mxu1 %v278_v6 }
  0x1b   :  { %304 = vmatpush.bf16.msra.mxu2 %v278_v6  ;;  %305 = vmatpush.bf16.msra.mxu3 %v278_v6 }
  0x1e   :  { %115 = vmatpush.bf16.msra.mxu0 %v277_v7  ;;  %306 = vmatpush.bf16.msra.mxu1 %v277_v7 }
  0x1f   :  { %307 = vmatpush.bf16.msra.mxu2 %v277_v7  ;;  %308 = vmatpush.bf16.msra.mxu3 %v277_v7 }
  0x21   :  { %116 = vmatmul.bf16.vlgmr.msra.gmra.mxu0 %v36_v16  ;;  %126 = vmatmul.bf16.vlgmr.msra.gmra.mxu1 %v38_v17 }
  0x22   :  { %136 = vmatmul.bf16.vlgmr.msra.gmra.mxu2 %v40_v18  ;;  %146 = vmatmul.bf16.vlgmr.msra.gmra.mxu3 %v42_v19 }
  0x31   :  { %121 = vmatmul.bf16.gmra.mxu0 %v37_v28  ;;  %131 = vmatmul.bf16.gmra.mxu1 %v39_v29 }
  0x32   :  { %141 = vmatmul.bf16.gmra.mxu2 %v41_v30  ;;  %151 = vmatmul.bf16.gmra.mxu3 %v43_v31 }
  0x9e   :  { %v117_v32 = vpop.f32.mrf.mxu0  ;;  %v127_v33 = vpop.f32.mrf.mxu1 }
  0x9f   :  { %157 = vst [vmem:[%s474_s4] sm:$0xff] %v117_v32  ;;  %v195_v43 = vmul.f32 %v117_v32, %v117_v32  ;;  %v199_v55 = vmul.f32 %v127_v33, %v127_v33 }
  0xa0   :  { %161 = vst [vmem:[%s474_s4 + $0x20] sm:$0xff] %v127_v33 }
  0xa5   :  { %v137_v34 = vpop.f32.mrf.mxu2  ;;  %v147_v35 = vpop.f32.mrf.mxu3 }
  0xa6   :  { %v119_v36 = vpop.f32.mrf.mxu0  ;;  %v129_v37 = vpop.f32.mrf.mxu1  ;;  %165 = vst [vmem:[%s474_s4 + $0x40] sm:$0xff] %v137_v34  ;;  %v203_v5 = vmul.f32 %v137_v34, %v137_v34  ;;  %v207_v17 = vmul.f32 %v147_v35, %v147_v35 }
  0xa7   :  { %158 = vst [vmem:[%s474_s4 + $0x8] sm:$0xff] %v119_v36  ;;  %v196_v42 = vmul.f32 %v119_v36, %v119_v36  ;;  %v173_v44 = vadd.f32 %v119_v36, %v117_v32  ;;  %v200_v58 = vmul.f32 %v129_v37, %v129_v37 }
  0xa8   :  { %162 = vst [vmem:[%s474_s4 + $0x28] sm:$0xff] %v129_v37 }
  0xa9   :  { %169 = vst [vmem:[%s474_s4 + $0x60] sm:$0xff] %v147_v35  ;;  %v211_v46 = vadd.f32 %v196_v42, %v195_v43 }
  0xad   :  { %v139_v38 = vpop.f32.mrf.mxu2  ;;  %v149_v39 = vpop.f32.mrf.mxu3 }
  0xae   :  { %v122_v40 = vpop.f32.mrf.mxu0  ;;  %v132_v41 = vpop.f32.mrf.mxu1  ;;  %166 = vst [vmem:[%s474_s4 + $0x48] sm:$0xff] %v139_v38  ;;  %v204_v8 = vmul.f32 %v139_v38, %v139_v38  ;;  %v208_v20 = vmul.f32 %v149_v39, %v149_v39 }
  0xaf   :  { %159 = vst [vmem:[%s474_s4 + $0x10] sm:$0xff] %v122_v40  ;;  %v197_v45 = vmul.f32 %v122_v40, %v122_v40  ;;  %v174_v47 = vadd.f32 %v173_v44, %v122_v40  ;;  %v201_v61 = vmul.f32 %v132_v41, %v132_v41 }
  0xb0   :  { %163 = vst [vmem:[%s474_s4 + $0x30] sm:$0xff] %v132_v41 }
  0xb1   :  { %170 = vst [vmem:[%s474_s4 + $0x68] sm:$0xff] %v149_v39  ;;  %v212_v52 = vadd.f32 %v211_v46, %v197_v45 }
  0xb5   :  { %v142_v48 = vpop.f32.mrf.mxu2  ;;  %v152_v49 = vpop.f32.mrf.mxu3 }
  0xb6   :  { %v124_v50 = vpop.f32.mrf.mxu0  ;;  %v134_v51 = vpop.f32.mrf.mxu1  ;;  %167 = vst [vmem:[%s474_s4 + $0x50] sm:$0xff] %v142_v48  ;;  %v205_v12 = vmul.f32 %v142_v48, %v142_v48  ;;  %v209_v24 = vmul.f32 %v152_v49, %v152_v49 }
  0xb7   :  { %160 = vst [vmem:[%s474_s4 + $0x18] sm:$0xff] %v124_v50  ;;  %v175_v53 = vadd.f32 %v174_v47, %v124_v50  ;;  %v198_v54 = vmul.f32 %v124_v50, %v124_v50  ;;  %v202_v3 = vmul.f32 %v134_v51, %v134_v51 }
  0xb8   :  { %164 = vst [vmem:[%s474_s4 + $0x38] sm:$0xff] %v134_v51 }
  0xb9   :  { %v176_v56 = vadd.f32 %v175_v53, %v127_v33  ;;  %v213_v57 = vadd.f32 %v212_v52, %v198_v54  ;;  %171 = vst [vmem:[%s474_s4 + $0x70] sm:$0xff] %v152_v49 }
  0xbb   :  { %v214_v59 = vadd.f32 %v213_v57, %v199_v55  ;;  %v177_v60 = vadd.f32 %v176_v56, %v129_v37 }
  0xbd   :  { %v178_v62 = vadd.f32 %v177_v60, %v132_v41  ;;  %v215_v63 = vadd.f32 %v214_v59, %v200_v58  ;;  %v144_v0 = vpop.f32.mrf.mxu2  ;;  %v154_v1 = vpop.f32.mrf.mxu3 }
  0xbe   :  { %168 = vst [vmem:[%s474_s4 + $0x58] sm:$0xff] %v144_v0  ;;  %v206_v16 = vmul.f32 %v144_v0, %v144_v0  ;;  %v210_v28 = vmul.f32 %v154_v1, %v154_v1 }
  0xbf   :  { %v179_v2 = vadd.f32 %v178_v62, %v134_v51  ;;  %v216_v4 = vadd.f32 %v215_v63, %v201_v61  ;;  %172 = vst [vmem:[%s474_s4 + $0x78] sm:$0xff] %v154_v1 }
  0xc1   :  { %v180_v6 = vadd.f32 %v179_v2, %v137_v34  ;;  %v217_v7 = vadd.f32 %v216_v4, %v202_v3 }
  0xc3   :  { %v218_v9 = vadd.f32 %v217_v7, %v203_v5  ;;  %v181_v10 = vadd.f32 %v180_v6, %v139_v38 }
  0xc5   :  { %v182_v11 = vadd.f32 %v181_v10, %v142_v48  ;;  %v219_v13 = vadd.f32 %v218_v9, %v204_v8 }
  0xc7   :  { %v220_v14 = vadd.f32 %v219_v13, %v205_v12  ;;  %v183_v15 = vadd.f32 %v182_v11, %v144_v0 }
  0xc9   :  { %v184_v18 = vadd.f32 %v183_v15, %v147_v35  ;;  %v221_v19 = vadd.f32 %v220_v14, %v206_v16 }
  0xcb   :  { %v222_v21 = vadd.f32 %v221_v19, %v207_v17  ;;  %v185_v22 = vadd.f32 %v184_v18, %v149_v39 }
  0xcd   :  { %v186_v23 = vadd.f32 %v185_v22, %v152_v49  ;;  %v223_v25 = vadd.f32 %v222_v21, %v208_v20 }
  0xcf   :  { %v224_v26 = vadd.f32 %v223_v25, %v209_v24  ;;  %v187_v27 = vadd.f32 %v186_v23, %v154_v1 }
  0xd1   :  { %v188_v29 = vrot.slane %v187_v27, 4  ;;  %v225_v30 = vadd.f32 %v224_v26, %v210_v28 }
  0xd3   :  { %v189_v31 = vadd.f32 %v188_v29, %v187_v27  ;;  %v226_v32 = vrot.slane %v225_v30, 4 }
  0xd5   :  { %v190_v33 = vrot.slane %v189_v31, 2  ;;  %v227_v34 = vadd.f32 %v226_v32, %v225_v30 }
  0xd7   :  { %v191_v36 = vadd.f32 %v190_v33, %v189_v31  ;;  %v228_v37 = vrot.slane %v227_v34, 2 }
  0xd9   :  { %v192_v38 = vrot.slane %v191_v36, 1  ;;  %v229_v35 = vadd.f32 %v228_v37, %v227_v34 }
  0xdb   :  { %v193_v40 = vadd.f32 %v192_v38, %v191_v36  ;;  %v230_v41 = vrot.slane %v229_v35, 1 }
  0xdd   :  { %194 = vst [vmem:[%s475_s5] sm:$0x1] %v193_v40  ;;  %v231_v39 = vadd.f32 %v230_v41, %v229_v35 }
  0xdf   :  { %232 = vst [vmem:[%s476_s6] sm:$0x1] %v231_v39 }

// kernel: bottleneck_forward.9
= control target key start
LH: loop header
LB: loop body
LE: loop exit
PB: predicated region body
PF: predicated region fallthrough
CT: control target
= control target key end

     0   :  { %s456_s0 = inlined_call_operand.vmem [shape: f32[128,128], index: 0, kind: input, shape index: {}]   ;;  %s457_s1 = inlined_call_operand.vmem [shape: f32[1,128], index: 1, kind: input, shape index: {}]   ;;  %s458_s2 = inlined_call_operand.vmem [shape: f32[1,128], index: 2, kind: input, shape index: {}]   ;;  %s459_s3 = inlined_call_operand.vmem [shape: f32[128,128], index: 3, kind: input, shape index: {}]   ;;  %s460_s4 = inlined_call_operand.vmem [shape: f32[1,128], index: 4, kind: input, shape index: {}]   ;;  %s461_s5 = inlined_call_operand.vmem [shape: f32[1,128], index: 5, kind: input, shape index: {}]   ;;  %s462_s6 = inlined_call_operand.hbm [shape: f32[128,128], index: 6, kind: output, shape index: {}]  }
   0x1   :  { %v24_v0 = vld [vmem:[%s456_s0] sm:$0xff]  ;;  %v25_v7 = vld [vmem:[%s456_s0 + $0x8] sm:$0xff]  ;;  %v26_v13 = vld [vmem:[%s456_s0 + $0x10] sm:$0xff] }
   0x2   :  { %v279_v1 = vld [vmem:[%s457_s1] ss:$0 sm:$0xff]  ;;  %v81_v8 = vld [vmem:[%s459_s3 + $0x8] sm:$0xff]  ;;  %v82_v14 = vld [vmem:[%s459_s3 + $0x10] sm:$0xff] }
   0x3   :  { %v284_v2 = vld [vmem:[%s458_s2] ss:$0 sm:$0xff]  ;;  %v44_v4 = vmul.f32 %v279_v1, %v24_v0  ;;  %v45_v11 = vmul.f32 %v279_v1, %v25_v7  ;;  %v27_v15 = vld [vmem:[%s456_s0 + $0x18] sm:$0xff]  ;;  %v46_v16 = vmul.f32 %v279_v1, %v26_v13  ;;  %v29_v26 = vld [vmem:[%s456_s0 + $0x28] sm:$0xff] }
   0x4   :  { %v80_v3 = vld [vmem:[%s459_s3] sm:$0xff]  ;;  %v47_v18 = vmul.f32 %v279_v1, %v27_v15  ;;  %v83_v19 = vld [vmem:[%s459_s3 + $0x18] sm:$0xff]  ;;  %v85_v27 = vld [vmem:[%s459_s3 + $0x28] sm:$0xff]  ;;  %v49_v39 = vmul.f32 %v279_v1, %v29_v26 }
   0x5   :  { %v293_v5 = vld [vmem:[%s460_s4] ss:$0 sm:$0xff]  ;;  %v64_v9 = vadd.f32 %v284_v2, %v44_v4  ;;  %v65_v23 = vadd.f32 %v284_v2, %v45_v11  ;;  %v66_v28 = vadd.f32 %v284_v2, %v46_v16  ;;  %v30_v36 = vld [vmem:[%s456_s0 + $0x30] sm:$0xff]  ;;  %v31_v42 = vld [vmem:[%s456_s0 + $0x38] sm:$0xff] }
   0x6   :  { %v298_v6 = vld [vmem:[%s461_s5] ss:$0 sm:$0xff]  ;;  %v100_v10 = vmul.f32 %v293_v5, %v80_v3  ;;  %v101_v12 = vmul.f32 %v293_v5, %v81_v8  ;;  %v102_v17 = vmul.f32 %v293_v5, %v82_v14  ;;  %v103_v25 = vmul.f32 %v293_v5, %v83_v19  ;;  %v86_v41 = vld [vmem:[%s459_s3 + $0x30] sm:$0xff]  ;;  %v87_v47 = vld [vmem:[%s459_s3 + $0x38] sm:$0xff] }
   0x7   :  { %v28_v20 = vld [vmem:[%s456_s0 + $0x20] sm:$0xff]  ;;  %v67_v30 = vadd.f32 %v284_v2, %v47_v18  ;;  %v105_v40 = vmul.f32 %v293_v5, %v85_v27  ;;  %v69_v50 = vadd.f32 %v284_v2, %v49_v39  ;;  %v50_v52 = vmul.f32 %v279_v1, %v30_v36  ;;  %v33_v58 = vld [vmem:[%s456_s0 + $0x48] sm:$0xff]  ;;  %v34_v0 = vld [vmem:[%s456_s0 + $0x50] sm:$0xff] }
   0x8   :  { %v84_v21 = vld [vmem:[%s459_s3 + $0x20] sm:$0xff]  ;;  %v120_v22 = vadd.f32 %v298_v6, %v100_v10  ;;  %v121_v24 = vadd.f32 %v298_v6, %v101_v12  ;;  %v122_v29 = vadd.f32 %v298_v6, %v102_v17  ;;  %v48_v31 = vmul.f32 %v279_v1, %v28_v20  ;;  %v89_v63 = vld [vmem:[%s459_s3 + $0x48] sm:$0xff] }
   0x9   :  { %v123_v34 = vadd.f32 %v298_v6, %v103_v25  ;;  %v104_v35 = vmul.f32 %v293_v5, %v84_v21  ;;  %v32_v48 = vld [vmem:[%s456_s0 + $0x40] sm:$0xff]  ;;  %v125_v51 = vadd.f32 %v298_v6, %v105_v40  ;;  %v106_v56 = vmul.f32 %v293_v5, %v86_v41 }
   0xa   :  { %v136_v32 = vadd.f32 %v120_v22, %v64_v9  ;;  %v137_v33 = vadd.f32 %v121_v24, %v65_v23  ;;  %v138_v37 = vadd.f32 %v122_v29, %v66_v28  ;;  %v68_v38 = vadd.f32 %v284_v2, %v48_v31  ;;  %v88_v53 = vld [vmem:[%s459_s3 + $0x40] sm:$0xff] }
   0xb   :  { %v139_v45 = vadd.f32 %v123_v34, %v67_v30  ;;  %v124_v46 = vadd.f32 %v298_v6, %v104_v35  ;;  %v51_v57 = vmul.f32 %v279_v1, %v31_v42  ;;  %v141_v59 = vadd.f32 %v125_v51, %v69_v50 }
   0xc   :  { %v152_v43 = vmax.f32 %v136_v32, 0.0  ;;  %v153_v44 = vmax.f32 %v137_v33, 0.0  ;;  %v154_v49 = vmax.f32 %v138_v37, 0.0  ;;  %v70_v60 = vadd.f32 %v284_v2, %v50_v52 }
   0xd   :  { %v155_v54 = vmax.f32 %v139_v45, 0.0  ;;  %v140_v55 = vadd.f32 %v124_v46, %v68_v38  ;;  %v107_v61 = vmul.f32 %v293_v5, %v87_v47  ;;  %v52_v62 = vmul.f32 %v279_v1, %v32_v48 }
   0xe   :  { %168 = vst [vmem:[#allocation2] sm:$0xff] %v152_v43 }
   0xf   :  { %169 = vst [vmem:[#allocation2 + $0x8] sm:$0xff] %v153_v44 }
  0x10   :  { %11 = vsyncpa [#allocation3], 0  ;;  %170 = vst [vmem:[#allocation2 + $0x10] sm:$0xff] %v154_v49  ;;  %v156_v3 = vmax.f32 %v140_v55, 0.0  ;;  %v126_v4 = vadd.f32 %v298_v6, %v106_v56  ;;  %v71_v7 = vadd.f32 %v284_v2, %v51_v57  ;;  %v108_v8 = vmul.f32 %v293_v5, %v88_v53  ;;  %v90_v9 = vld [vmem:[%s459_s3 + $0x50] sm:$0xff]  ;;  %v35_v10 = vld [vmem:[%s456_s0 + $0x58] sm:$0xff] }
  0x11   :  { %171 = vst [vmem:[#allocation2 + $0x18] sm:$0xff] %v155_v54  ;;  %v157_v11 = vmax.f32 %v141_v59, 0.0  ;;  %v127_v12 = vadd.f32 %v298_v6, %v107_v61  ;;  %v72_v13 = vadd.f32 %v284_v2, %v52_v62  ;;  %v53_v14 = vmul.f32 %v279_v1, %v33_v58  ;;  %v91_v19 = vld [vmem:[%s459_s3 + $0x58] sm:$0xff]  ;;  %v36_v24 = vld [vmem:[%s456_s0 + $0x60] sm:$0xff]  ;;  %v37_v30 = vld [vmem:[%s456_s0 + $0x68] sm:$0xff]  ;;  %s190_s5 = sshll.u32 %s462_s6, 4  ;;  %s191_s5 = int_to_ptr.hbm [resolvable:$true] %s190_s5 }
  0x12   :  { %172 = vst [vmem:[#allocation2 + $0x20] sm:$0xff] %v156_v3  ;;  %v142_v15 = vadd.f32 %v126_v4, %v70_v60  ;;  %v128_v16 = vadd.f32 %v298_v6, %v108_v8  ;;  %v109_v17 = vmul.f32 %v293_v5, %v89_v63  ;;  %v54_v18 = vmul.f32 %v279_v1, %v34_v0  ;;  %v92_v25 = vld [vmem:[%s459_s3 + $0x60] sm:$0xff]  ;;  %v93_v31 = vld [vmem:[%s459_s3 + $0x68] sm:$0xff]  ;;  %v38_v36 = vld [vmem:[%s456_s0 + $0x70] sm:$0xff]  ;;  %s236_s12 = smov 128   ;;  %s237_s13 = smov 8  }
  0x13   :  { %173 = vst [vmem:[#allocation2 + $0x28] sm:$0xff] %v157_v11  ;;  %v143_v20 = vadd.f32 %v127_v12, %v71_v7  ;;  %v73_v21 = vadd.f32 %v284_v2, %v53_v14  ;;  %v110_v22 = vmul.f32 %v293_v5, %v90_v9  ;;  %v55_v23 = vmul.f32 %v279_v1, %v35_v10  ;;  %v94_v45 = vld [vmem:[%s459_s3 + $0x70] sm:$0xff]  ;;  %v39_v46 = vld [vmem:[%s456_s0 + $0x78] sm:$0xff]  ;;  %s235_s0 = smov [#allocation2]  }
  0x14   :  { %v158_v26 = vmax.f32 %v142_v15, 0.0  ;;  %v144_v27 = vadd.f32 %v128_v16, %v72_v13  ;;  %v129_v28 = vadd.f32 %v298_v6, %v109_v17  ;;  %v74_v29 = vadd.f32 %v284_v2, %v54_v18  ;;  %v95_v51 = vld [vmem:[%s459_s3 + $0x78] sm:$0xff]  ;;  %s188_s3 = sshll.u32 %s235_s0, 4  ;;  %s189_s3 = int_to_ptr.vmem [resolvable:$true] %s188_s3 }
  0x15   :  { %v159_v32 = vmax.f32 %v143_v20, 0.0  ;;  %v130_v33 = vadd.f32 %v298_v6, %v110_v22  ;;  %v75_v34 = vadd.f32 %v284_v2, %v55_v23  ;;  %v111_v35 = vmul.f32 %v293_v5, %v91_v19 }
  0x16   :  { %174 = vst [vmem:[#allocation2 + $0x30] sm:$0xff] %v158_v26  ;;  %v160_v37 = vmax.f32 %v144_v27, 0.0  ;;  %v145_v38 = vadd.f32 %v129_v28, %v73_v21  ;;  %v56_v39 = vmul.f32 %v279_v1, %v36_v24  ;;  %v112_v40 = vmul.f32 %v293_v5, %v92_v25 }
  0x17   :  { %175 = vst [vmem:[#allocation2 + $0x38] sm:$0xff] %v159_v32  ;;  %v146_v41 = vadd.f32 %v130_v33, %v74_v29  ;;  %v131_v42 = vadd.f32 %v298_v6, %v111_v35  ;;  %v57_v43 = vmul.f32 %v279_v1, %v37_v30  ;;  %v113_v44 = vmul.f32 %v293_v5, %v93_v31 }
  0x18   :  { %176 = vst [vmem:[#allocation2 + $0x40] sm:$0xff] %v160_v37  ;;  %v161_v47 = vmax.f32 %v145_v38, 0.0  ;;  %v76_v48 = vadd.f32 %v284_v2, %v56_v39  ;;  %v132_v49 = vadd.f32 %v298_v6, %v112_v40  ;;  %v58_v50 = vmul.f32 %v279_v1, %v38_v36 }
  0x19   :  { %v162_v52 = vmax.f32 %v146_v41, 0.0  ;;  %v147_v53 = vadd.f32 %v131_v42, %v75_v34  ;;  %v77_v54 = vadd.f32 %v284_v2, %v57_v43  ;;  %v133_v55 = vadd.f32 %v298_v6, %v113_v44 }
  0x1a   :  { %177 = vst [vmem:[#allocation2 + $0x48] sm:$0xff] %v161_v47  ;;  %v148_v56 = vadd.f32 %v132_v49, %v76_v48  ;;  %v78_v57 = vadd.f32 %v284_v2, %v58_v50  ;;  %v114_v58 = vmul.f32 %v293_v5, %v94_v45  ;;  %v59_v59 = vmul.f32 %v279_v1, %v39_v46 }
  0x1b   :  { %178 = vst [vmem:[#allocation2 + $0x50] sm:$0xff] %v162_v52  ;;  %v163_v60 = vmax.f32 %v147_v53, 0.0  ;;  %v149_v61 = vadd.f32 %v133_v55, %v77_v54  ;;  %v115_v62 = vmul.f32 %v293_v5, %v95_v51 }
  0x1c   :  { %v164_v63 = vmax.f32 %v148_v56, 0.0  ;;  %v134_v0 = vadd.f32 %v298_v6, %v114_v58  ;;  %v79_v3 = vadd.f32 %v284_v2, %v59_v59 }
  0x1d   :  { %179 = vst [vmem:[#allocation2 + $0x58] sm:$0xff] %v163_v60  ;;  %v165_v4 = vmax.f32 %v149_v61, 0.0  ;;  %v135_v7 = vadd.f32 %v298_v6, %v115_v62 }
  0x1e   :  { %180 = vst [vmem:[#allocation2 + $0x60] sm:$0xff] %v164_v63  ;;  %v150_v8 = vadd.f32 %v134_v0, %v78_v57 }
  0x1f   :  { %181 = vst [vmem:[#allocation2 + $0x68] sm:$0xff] %v165_v4  ;;  %v151_v1 = vadd.f32 %v135_v7, %v79_v3 }
  0x20   :  { %v166_v5 = vmax.f32 %v150_v8, 0.0 }
  0x21   :  { %v167_v9 = vmax.f32 %v151_v1, 0.0 }
  0x22   :  { %182 = vst [vmem:[#allocation2 + $0x70] sm:$0xff] %v166_v5 }
  0x23   :  { %183 = vst [vmem:[#allocation2 + $0x78] sm:$0xff] %v167_v9 }
  0x24   :  { %196 = dma.vmem_to_hbm [thread:$0]  %s189_s3, 2048, %s191_s5, [#allocation3], %s236_s12, %s236_s12, %s237_s13  }
  0x25   :  { %233 = dma.done.wait [#allocation3], 2048  }
  0x26   :  { %234 = vsyncadd [#allocation3], 4294965248 }
  0x27   :  { %201 = vsyncpa [#allocation3], 1 }

</bundles_post_ra>
